<compile_context>
chip_gen: v7x
topology: tpu7x:2x2x1
jax: 0.10.0
libtpu: 0.0.40
codegen_flags: <defaults>
</compile_context>

<pallas_src>
import functools

import jax
import jax.numpy as jnp
from jax import lax
from jax.experimental import pallas as pl
from jax.experimental.pallas import tpu as pltpu


def _leaky_relu(y, slope=0.2):
    return jnp.where(y > 0, y, slope * y)


def _round_up(x, m):
    return ((x + m - 1) // m) * m


def _pick_tile_h(h):
    # Prefer >= 2 row-tiles (exercises the halo path, enables pipelining and dual-TC sharding
    # on v7x). Cap at 32 rows for the small test shapes.
    # TODO(synk): sweep TH upward per generation (larger on v5e/v6e 128 MiB VMEM, tighter on
    # v7x 64 MiB) together with vmem_limit_bytes, preserving n_h >= 2 for batch-1 inference.
    for th in (32, 16, 8, 4, 2):
        if h % th == 0 and h // th >= 2:
            return th
    return h


def _topdown_kernel(x_ref, x_hbm_ref, w1id_ref, w2k_ref, w3_ref,
                    pool_ref, out_ref,
                    top_ref, bot_ref, h1pad_ref, halo_sem,
                    *, th, fuse_identity):
    n = pl.program_id(0)
    h = pl.program_id(1)
    n_h = pl.num_programs(1)
    H = x_hbm_ref.shape[1]
    _, W, cin_p = x_ref.shape
    cp = out_ref.shape[-1]

    # ---- kick off the tiny 1-row halo DMAs; they overlap with the main conv1 matmul -------
    r0 = pl.multiple_of(h * th, th)
    top_cp = pltpu.make_async_copy(
        x_hbm_ref.at[n, pl.ds(jnp.maximum(r0 - 1, 0), 1)], top_ref, halo_sem.at[0])
    bot_cp = pltpu.make_async_copy(
        x_hbm_ref.at[n, pl.ds(jnp.minimum(r0 + th, H - 1), 1)], bot_ref, halo_sem.at[1])
    top_cp.start()
    bot_cp.start()

    # ---- conv1 (1x1) fused with the identity 1x1 on the main th rows: one bf16 matmul -----
    x_main = x_ref[...]                                            # (th, W, cin_p) bf16
    h1_full = jnp.dot(x_main.reshape(th * W, cin_p), w1id_ref[...],
                      preferred_element_type=jnp.float32)
    if fuse_identity:
        h1_main = h1_full[:, :cp]
        ident = h1_full[:, cp:]                                    # (th*W, cp) f32
    else:
        h1_main = h1_full
        ident = x_main.reshape(th * W, cin_p).astype(jnp.float32)  # Cin == Cout here
    h1_main = _leaky_relu(h1_main).astype(jnp.bfloat16).reshape(th, W, cp)

    # ---- halo rows: wait for the DMAs, zero-mask at the image border, conv1 on 2 rows -----
    top_cp.wait()
    bot_cp.wait()
    top_m = jnp.where(h > 0, 1.0, 0.0).astype(jnp.bfloat16)
    bot_m = jnp.where(h < n_h - 1, 1.0, 0.0).astype(jnp.bfloat16)
    halo = jnp.concatenate([top_ref[...] * top_m, bot_ref[...] * bot_m], axis=0)  # (2,W,cin_p)
    h1_halo = jnp.dot(halo.reshape(2 * W, cin_p), w1id_ref[...],
                      preferred_element_type=jnp.float32)[:, :cp]
    h1_halo = _leaky_relu(h1_halo).astype(jnp.bfloat16).reshape(2, W, cp)

    # ---- stage the zero-padded conv2 input: direct sub-slice stores, no full concat rebuild
    h1pad_ref[:, 0:1, :] = jnp.zeros((th + 2, 1, cp), jnp.bfloat16)
    h1pad_ref[:, W + 1:W + 2, :] = jnp.zeros((th + 2, 1, cp), jnp.bfloat16)
    h1pad_ref[:, 1:W + 1, :] = jnp.concatenate(
        [h1_halo[0:1], h1_main, h1_halo[1:2]], axis=0)             # (th+2, W, cp)

    # ---- conv2 (3x3, pad=1): one sublane-shifted read per kx; ky taps are free row slices --
    acc = None
    for kx in range(3):
        shifted = h1pad_ref[:, kx:kx + W, :]                       # (th+2, W, cp)
        taps = jnp.concatenate([shifted[ky:ky + th] for ky in range(3)], axis=-1)
        part = jnp.dot(taps.reshape(th * W, 3 * cp), w2k_ref[kx],
                       preferred_element_type=jnp.float32)
        acc = part if acc is None else acc + part
    h2 = _leaky_relu(acc).astype(jnp.bfloat16)                     # (th*W, cp)

    # ---- conv3 (1x1) + residual add ---------------------------------------------------------
    res = jnp.dot(h2, w3_ref[...], preferred_element_type=jnp.float32)
    out = (ident + res).reshape(th, W, cp)
    out_ref[...] = out.astype(out_ref.dtype)

    # ---- fused MaxPool2d(kernel=2, stride=2) ------------------------------------------------
    a = jnp.max(out.reshape(th // 2, 2, W, cp), axis=1)            # row pairs
    pooled = jnp.max(a.reshape(th // 2, W // 2, 2, cp), axis=2)    # column pairs
    pool_ref[...] = pooled.astype(pool_ref.dtype)


def topdown_block_pallas(x_nhwc, w1, w2, w3, wid=None):
    """x_nhwc: (N, H, W, Cin) f32. Returns (pooled, full) NHWC bf16, matching
    TopDownBlock.forward -> (MaxPool2d(2)(res_block(x)), res_block(x))."""
    N, H, W, Cin = x_nhwc.shape
    Cout = w1.shape[1]
    assert H % 2 == 0 and W % 2 == 0, "MaxPool2d(2) expects even spatial dims"

    cin_p = _round_up(Cin, 128)
    cp = _round_up(Cout, 128)
    th = _pick_tile_h(H)
    assert th % 2 == 0
    n_h = H // th

    # TODO(synk): fold the channel pad + bf16 cast into the producer, and gate to a VPU /
    # channel-packed variant when real channel counts are << 128 (lanes mostly wasted here).
    x_p = jnp.pad(x_nhwc, ((0, 0), (0, 0), (0, 0), (0, cin_p - Cin))).astype(jnp.bfloat16)

    w1_p = jnp.pad(w1, ((0, cin_p - Cin), (0, cp - Cout)))
    if wid is not None:
        wid_p = jnp.pad(wid, ((0, cin_p - Cin), (0, cp - Cout)))
        w1id = jnp.concatenate([w1_p, wid_p], axis=1)              # (cin_p, 2*cp)
    else:
        assert Cin == Cout, "identity pass-through requires ch_in == ch_out"
        w1id = w1_p                                                # (cin_p, cp)
    w1id = w1id.astype(jnp.bfloat16)
    wcols = w1id.shape[1]

    # (3,3,Cin,Cout) HWIO -> (kx, ky*cp + cin, cout): K is ky-major so the kernel's per-kx
    # lane-concat of the three ky row-slices lines up with the weight contraction rows.
    w2_p = jnp.pad(w2, ((0, 0), (0, 0), (0, cp - Cout), (0, cp - Cout)))
    w2k = jnp.transpose(w2_p, (1, 0, 2, 3)).reshape(3, 3 * cp, cp).astype(jnp.bfloat16)
    w3_p = jnp.pad(w3, ((0, cp - Cout), (0, cp - Cout))).astype(jnp.bfloat16)

    kernel = functools.partial(_topdown_kernel, th=th, fuse_identity=wid is not None)

    flops = 2 * N * H * W * (cin_p * wcols + 9 * cp * cp + cp * cp)
    bytes_accessed = (x_p.size * 2 + (w1id.size + w2k.size + w3_p.size) * 2
                      + N * H * W * cp * 2 + N * (H // 2) * (W // 2) * cp * 2)

    pooled, full = pl.pallas_call(
        kernel,
        out_shape=(
            jax.ShapeDtypeStruct((N, H // 2, W // 2, cp), jnp.bfloat16),
            jax.ShapeDtypeStruct((N, H, W, cp), jnp.bfloat16),
        ),
        grid_spec=pltpu.PrefetchScalarGridSpec(
            num_scalar_prefetch=0,
            grid=(N, n_h),
            in_specs=[
                pl.BlockSpec((None, th, W, cin_p), lambda n, h: (n, h, 0, 0)),  # main rows
                pl.BlockSpec(memory_space=pl.ANY),                              # halo source
                pl.BlockSpec((cin_p, wcols), lambda n, h: (0, 0)),
                pl.BlockSpec((3, 3 * cp, cp), lambda n, h: (0, 0, 0)),
                pl.BlockSpec((cp, cp), lambda n, h: (0, 0)),
            ],
            out_specs=[
                pl.BlockSpec((None, th // 2, W // 2, cp), lambda n, h: (n, h, 0, 0)),
                pl.BlockSpec((None, th, W, cp), lambda n, h: (n, h, 0, 0)),
            ],
            scratch_shapes=[
                pltpu.VMEM((1, W, cin_p), jnp.bfloat16),            # top halo row
                pltpu.VMEM((1, W, cin_p), jnp.bfloat16),            # bottom halo row
                pltpu.VMEM((th + 2, W + 2, cp), jnp.bfloat16),      # zero-padded conv2 input
                pltpu.SemaphoreType.DMA((2,)),
            ],
        ),
        compiler_params=pltpu.CompilerParams(
            dimension_semantics=("parallel", "parallel"),
            # Safe on v7x (64 MiB physical); sweep larger on v5e/v6e together with TH.
            vmem_limit_bytes=48 * 1024 * 1024,
        ),
        cost_estimate=pl.CostEstimate(
            flops=flops, transcendentals=0, bytes_accessed=bytes_accessed),
    )(x_p, x_p, w1id, w2k, w3_p)

    # TODO(synk): a real consumer keeps the 128-padded bf16 layout; slice only at the edge.
    return pooled[..., :Cout], full[..., :Cout]


def topdown_reference(x_nhwc, w1, w2, w3, wid=None):
    """Pure-JAX reference with the same bf16-matmul / f32-accumulate recipe as the kernel."""
    dn = ("NHWC", "HWIO", "NHWC")
    Cin, Cout = w1.shape

    def conv(inp, w_hwio, pad):
        return lax.conv_general_dilated(
            inp.astype(jnp.bfloat16), w_hwio.astype(jnp.bfloat16),
            window_strides=(1, 1), padding=pad, dimension_numbers=dn,
            preferred_element_type=jnp.float32)

    h = _leaky_relu(conv(x_nhwc, w1.reshape(1, 1, Cin, Cout), "VALID"))
    h = _leaky_relu(conv(h, w2, "SAME"))
    res = conv(h, w3.reshape(1, 1, Cout, Cout), "VALID")
    if wid is not None:
        ident = conv(x_nhwc, wid.reshape(1, 1, Cin, Cout), "VALID")
    else:
        ident = x_nhwc.astype(jnp.bfloat16).astype(jnp.float32)
    full = ident + res
    pooled = lax.reduce_window(full, -jnp.inf, lax.max,
                               (1, 2, 2, 1), (1, 2, 2, 1), "VALID")
    return pooled, full


def make_params(key, ch_in, ch_out):
    k1, k2, k3, k4 = jax.random.split(key, 4)
    w1 = jax.random.normal(k1, (ch_in, ch_out), jnp.float32) * (1.0 / ch_in) ** 0.5
    w2 = jax.random.normal(k2, (3, 3, ch_out, ch_out), jnp.float32) * (1.0 / (9 * ch_out)) ** 0.5
    w3 = jax.random.normal(k3, (ch_out, ch_out), jnp.float32) * (1.0 / ch_out) ** 0.5
    if ch_in != ch_out:
        wid = jax.random.normal(k4, (ch_in, ch_out), jnp.float32) * (1.0 / ch_in) ** 0.5
    else:
        wid = None  # PyTorch identity pass-through
    return w1, w2, w3, wid


if __name__ == "__main__":
    key = jax.random.PRNGKey(0)
    kx1, kp1, kx2, kp2 = jax.random.split(key, 4)

    # Case 1: ch_in != ch_out (identity is a 1x1 conv). Spec input x: (2, 4, 16, 16) NCHW.
    N, ch_in, ch_out, Hs, Ws = 2, 4, 8, 16, 16
    x_nchw = jax.random.normal(kx1, (N, ch_in, Hs, Ws), jnp.float32)
    x_nhwc = jnp.transpose(x_nchw, (0, 2, 3, 1))  # kernel path stays NHWC end-to-end
    w1, w2, w3, wid = make_params(kp1, ch_in, ch_out)

    pooled, full = topdown_block_pallas(x_nhwc, w1, w2, w3, wid)
    jax.block_until_ready((pooled, full))
    ref_pool, ref_full = topdown_reference(x_nhwc, w1, w2, w3, wid)
    assert full.shape == (N, Hs, Ws, ch_out)
    assert pooled.shape == (N, Hs // 2, Ws // 2, ch_out)
    assert jnp.allclose(full.astype(jnp.float32), ref_full, atol=2e-2, rtol=2e-2), \
        "full-res output mismatch"
    assert jnp.allclose(pooled.astype(jnp.float32), ref_pool, atol=2e-2, rtol=2e-2), \
        "pooled output mismatch"

    # Case 2: ch_in == ch_out (identity is a pass-through; its matmul is skipped).
    ch = 8
    x2 = jax.random.normal(kx2, (N, Hs, Ws, ch), jnp.float32)
    w1b, w2b, w3b, widb = make_params(kp2, ch, ch)
    pooled2, full2 = topdown_block_pallas(x2, w1b, w2b, w3b, widb)
    jax.block_until_ready((pooled2, full2))
    ref_pool2, ref_full2 = topdown_reference(x2, w1b, w2b, w3b, widb)
    assert jnp.allclose(full2.astype(jnp.float32), ref_full2, atol=2e-2, rtol=2e-2), \
        "equal-channel full mismatch"
    assert jnp.allclose(pooled2.astype(jnp.float32), ref_pool2, atol=2e-2, rtol=2e-2), \
        "equal-channel pool mismatch"

    print("KERNEL_OK")
</pallas_src>

<mosaic_0001>
module attributes {stable_mosaic.version = 11 : i64} {
  func.func @_topdown_kernel(%arg0: i32, %arg1: i32, %arg2: memref<1x8x16x128xbf16, #tpu.memory_space<vmem>>, %arg3: memref<2x16x16x128xbf16, #tpu.memory_space<any>>, %arg4: memref<128x256xbf16, #tpu.memory_space<vmem>>, %arg5: memref<3x384x128xbf16, #tpu.memory_space<vmem>>, %arg6: memref<128x128xbf16, #tpu.memory_space<vmem>>, %arg7: memref<1x4x8x128xbf16, #tpu.memory_space<vmem>>, %arg8: memref<1x8x16x128xbf16, #tpu.memory_space<vmem>>, %arg9: memref<1x16x128xbf16, #tpu.memory_space<vmem>>, %arg10: memref<1x16x128xbf16, #tpu.memory_space<vmem>>, %arg11: memref<10x18x128xbf16, #tpu.memory_space<vmem>>, %arg12: memref<2x!tpu.dma_semaphore, #tpu.memory_space<semaphore_mem>>) attributes {dimension_semantics = [#tpu.dimension_semantics<parallel>, #tpu.dimension_semantics<parallel>], iteration_bounds = array<i64: 2, 2>, scalar_prefetch = 0 : i64, scratch_operands = 4 : i64, tpu.core_type = #tpu.core_type<tc>, window_params = [{transform_indices = @transform_0, window_bounds = array<i64: 1, 8, 16, 128>}, {}, {pipeline_mode = #tpu.pipeline_mode<synchronous>, transform_indices = @transform_2, window_bounds = array<i64: 128, 256>}, {pipeline_mode = #tpu.pipeline_mode<synchronous>, transform_indices = @transform_3, window_bounds = array<i64: 3, 384, 128>}, {pipeline_mode = #tpu.pipeline_mode<synchronous>, transform_indices = @transform_4, window_bounds = array<i64: 128, 128>}, {transform_indices = @transform_5, window_bounds = array<i64: 1, 4, 8, 128>}, {transform_indices = @transform_6, window_bounds = array<i64: 1, 8, 16, 128>}]} {
    %c8_i32 = arith.constant 8 : i32
    %0 = arith.muli %arg1, %c8_i32 : i32
    %1 = tpu.assume_multiple %0, 8 : i32
    %c1_i32 = arith.constant 1 : i32
    %2 = arith.subi %1, %c1_i32 : i32
    %c0_i32 = arith.constant 0 : i32
    %3 = arith.maxsi %2, %c0_i32 : i32
    %c8_i32_0 = arith.constant 8 : i32
    %4 = arith.addi %1, %c8_i32_0 : i32
    %c15_i32 = arith.constant 15 : i32
    %5 = arith.minsi %4, %c15_i32 : i32
    %c0_i32_1 = arith.constant 0 : i32
    %c0_i32_2 = arith.constant 0 : i32
    %c0_i32_3 = arith.constant 0 : i32
    %6 = tpu.memref_slice %arg3[%arg0, %3, %c0_i32_2, %c0_i32_3] : memref<2x16x16x128xbf16, #tpu.memory_space<any>> -> memref<1x1x16x128xbf16, #tpu.memory_space<any>>
    %7 = tpu.memref_squeeze %6 : memref<1x1x16x128xbf16, #tpu.memory_space<any>> -> memref<1x16x128xbf16, #tpu.memory_space<any>>
    %8 = tpu.memref_slice %arg12[%c0_i32_1] : memref<2x!tpu.dma_semaphore, #tpu.memory_space<semaphore_mem>> -> memref<1x!tpu.dma_semaphore, #tpu.memory_space<semaphore_mem>>
    %9 = tpu.memref_squeeze %8 : memref<1x!tpu.dma_semaphore, #tpu.memory_space<semaphore_mem>> -> memref<!tpu.dma_semaphore, #tpu.memory_space<semaphore_mem>>
    tpu.enqueue_dma source(%7 : memref<1x16x128xbf16, #tpu.memory_space<any>>) target(%arg9 : memref<1x16x128xbf16, #tpu.memory_space<vmem>>) target_semaphore(%9 : memref<!tpu.dma_semaphore, #tpu.memory_space<semaphore_mem>>)
    %c1_i32_4 = arith.constant 1 : i32
    %c0_i32_5 = arith.constant 0 : i32
    %c0_i32_6 = arith.constant 0 : i32
    %10 = tpu.memref_slice %arg3[%arg0, %5, %c0_i32_5, %c0_i32_6] : memref<2x16x16x128xbf16, #tpu.memory_space<any>> -> memref<1x1x16x128xbf16, #tpu.memory_space<any>>
    %11 = tpu.memref_squeeze %10 : memref<1x1x16x128xbf16, #tpu.memory_space<any>> -> memref<1x16x128xbf16, #tpu.memory_space<any>>
    %12 = tpu.memref_slice %arg12[%c1_i32_4] : memref<2x!tpu.dma_semaphore, #tpu.memory_space<semaphore_mem>> -> memref<1x!tpu.dma_semaphore, #tpu.memory_space<semaphore_mem>>
    %13 = tpu.memref_squeeze %12 : memref<1x!tpu.dma_semaphore, #tpu.memory_space<semaphore_mem>> -> memref<!tpu.dma_semaphore, #tpu.memory_space<semaphore_mem>>
    tpu.enqueue_dma source(%11 : memref<1x16x128xbf16, #tpu.memory_space<any>>) target(%arg10 : memref<1x16x128xbf16, #tpu.memory_space<vmem>>) target_semaphore(%13 : memref<!tpu.dma_semaphore, #tpu.memory_space<semaphore_mem>>)
    %c0 = arith.constant 0 : index
    %c0_7 = arith.constant 0 : index
    %c0_8 = arith.constant 0 : index
    %c0_9 = arith.constant 0 : index
    %14 = vector.load %arg2[%c0, %c0_7, %c0_8, %c0_9] : memref<1x8x16x128xbf16, #tpu.memory_space<vmem>>, vector<1x8x16x128xbf16>
    %15 = vector.shape_cast %14 : vector<1x8x16x128xbf16> to vector<8x16x128xbf16>
    %16 = vector.shape_cast %15 : vector<8x16x128xbf16> to vector<128x128xbf16>
    %c0_10 = arith.constant 0 : index
    %c0_11 = arith.constant 0 : index
    %17 = vector.load %arg4[%c0_10, %c0_11] : memref<128x256xbf16, #tpu.memory_space<vmem>>, vector<128x256xbf16>
    %cst = arith.constant dense<0.000000e+00> : vector<128x256xf32>
    %18 = tpu.matmul %16, %17, %cst {dimension_numbers = #tpu.dot_dimension_numbers<[1], [0], [0], [1], [0, 0, 1, 1], [], []>} : vector<128x128xbf16>, vector<128x256xbf16>, vector<128x256xf32> -> vector<128x256xf32>
    %19 = vector.extract_strided_slice %18 {offsets = [0, 0], sizes = [128, 128], strides = [1, 1]} : vector<128x256xf32> to vector<128x128xf32>
    %20 = vector.extract_strided_slice %18 {offsets = [0, 128], sizes = [128, 128], strides = [1, 1]} : vector<128x256xf32> to vector<128x128xf32>
    %cst_12 = arith.constant 0.000000e+00 : f32
    %21 = vector.broadcast %cst_12 : f32 to vector<128x128xf32>
    %22 = arith.cmpf ogt, %19, %21 : vector<128x128xf32>
    %cst_13 = arith.constant 2.000000e-01 : f32
    %23 = vector.broadcast %cst_13 : f32 to vector<128x128xf32>
    %24 = arith.mulf %23, %19 : vector<128x128xf32>
    %25 = arith.select %22, %19, %24 : vector<128x128xi1>, vector<128x128xf32>
    %26 = arith.truncf %25 : vector<128x128xf32> to vector<128x128xbf16>
    %27 = vector.shape_cast %26 : vector<128x128xbf16> to vector<8x16x128xbf16>
    %c0_i32_14 = arith.constant 0 : i32
    %c0_i32_15 = arith.constant 0 : i32
    %c0_i32_16 = arith.constant 0 : i32
    %28 = tpu.memref_slice %arg3[%arg0, %3, %c0_i32_15, %c0_i32_16] : memref<2x16x16x128xbf16, #tpu.memory_space<any>> -> memref<1x1x16x128xbf16, #tpu.memory_space<any>>
    %29 = tpu.memref_squeeze %28 : memref<1x1x16x128xbf16, #tpu.memory_space<any>> -> memref<1x16x128xbf16, #tpu.memory_space<any>>
    %30 = tpu.memref_slice %arg12[%c0_i32_14] : memref<2x!tpu.dma_semaphore, #tpu.memory_space<semaphore_mem>> -> memref<1x!tpu.dma_semaphore, #tpu.memory_space<semaphore_mem>>
    %31 = tpu.memref_squeeze %30 : memref<1x!tpu.dma_semaphore, #tpu.memory_space<semaphore_mem>> -> memref<!tpu.dma_semaphore, #tpu.memory_space<semaphore_mem>>
    tpu.wait_dma2 semaphore(%31 : memref<!tpu.dma_semaphore, #tpu.memory_space<semaphore_mem>>) src(%29 : memref<1x16x128xbf16, #tpu.memory_space<any>>) dst(%arg9 : memref<1x16x128xbf16, #tpu.memory_space<vmem>>)
    %c1_i32_17 = arith.constant 1 : i32
    %c0_i32_18 = arith.constant 0 : i32
    %c0_i32_19 = arith.constant 0 : i32
    %32 = tpu.memref_slice %arg3[%arg0, %5, %c0_i32_18, %c0_i32_19] : memref<2x16x16x128xbf16, #tpu.memory_space<any>> -> memref<1x1x16x128xbf16, #tpu.memory_space<any>>
    %33 = tpu.memref_squeeze %32 : memref<1x1x16x128xbf16, #tpu.memory_space<any>> -> memref<1x16x128xbf16, #tpu.memory_space<any>>
    %34 = tpu.memref_slice %arg12[%c1_i32_17] : memref<2x!tpu.dma_semaphore, #tpu.memory_space<semaphore_mem>> -> memref<1x!tpu.dma_semaphore, #tpu.memory_space<semaphore_mem>>
    %35 = tpu.memref_squeeze %34 : memref<1x!tpu.dma_semaphore, #tpu.memory_space<semaphore_mem>> -> memref<!tpu.dma_semaphore, #tpu.memory_space<semaphore_mem>>
    tpu.wait_dma2 semaphore(%35 : memref<!tpu.dma_semaphore, #tpu.memory_space<semaphore_mem>>) src(%33 : memref<1x16x128xbf16, #tpu.memory_space<any>>) dst(%arg10 : memref<1x16x128xbf16, #tpu.memory_space<vmem>>)
    %c0_i32_20 = arith.constant 0 : i32
    %36 = arith.cmpi sgt, %arg1, %c0_i32_20 : i32
    %cst_21 = arith.constant 1.000000e+00 : f32
    %cst_22 = arith.constant 0.000000e+00 : f32
    %37 = arith.select %36, %cst_21, %cst_22 : f32
    %38 = arith.truncf %37 : f32 to bf16
    %c1_i32_23 = arith.constant 1 : i32
    %39 = arith.cmpi slt, %arg1, %c1_i32_23 : i32
    %cst_24 = arith.constant 1.000000e+00 : f32
    %cst_25 = arith.constant 0.000000e+00 : f32
    %40 = arith.select %39, %cst_24, %cst_25 : f32
    %41 = arith.truncf %40 : f32 to bf16
    %c0_26 = arith.constant 0 : index
    %c0_27 = arith.constant 0 : index
    %c0_28 = arith.constant 0 : index
    %42 = vector.load %arg9[%c0_26, %c0_27, %c0_28] : memref<1x16x128xbf16, #tpu.memory_space<vmem>>, vector<1x16x128xbf16>
    %43 = vector.broadcast %38 : bf16 to vector<1x16x128xbf16>
    %44 = arith.mulf %42, %43 : vector<1x16x128xbf16>
    %c0_29 = arith.constant 0 : index
    %c0_30 = arith.constant 0 : index
    %c0_31 = arith.constant 0 : index
    %45 = vector.load %arg10[%c0_29, %c0_30, %c0_31] : memref<1x16x128xbf16, #tpu.memory_space<vmem>>, vector<1x16x128xbf16>
    %46 = vector.broadcast %41 : bf16 to vector<1x16x128xbf16>
    %47 = arith.mulf %45, %46 : vector<1x16x128xbf16>
    %48 = tpu.concatenate %44, %47 in 0 : vector<1x16x128xbf16>, vector<1x16x128xbf16> -> vector<2x16x128xbf16>
    %49 = vector.shape_cast %48 : vector<2x16x128xbf16> to vector<32x128xbf16>
    %c0_32 = arith.constant 0 : index
    %c0_33 = arith.constant 0 : index
    %50 = vector.load %arg4[%c0_32, %c0_33] : memref<128x256xbf16, #tpu.memory_space<vmem>>, vector<128x256xbf16>
    %cst_34 = arith.constant dense<0.000000e+00> : vector<32x256xf32>
    %51 = tpu.matmul %49, %50, %cst_34 {dimension_numbers = #tpu.dot_dimension_numbers<[1], [0], [0], [1], [0, 0, 1, 1], [], []>} : vector<32x128xbf16>, vector<128x256xbf16>, vector<32x256xf32> -> vector<32x256xf32>
    %52 = vector.extract_strided_slice %51 {offsets = [0, 0], sizes = [32, 128], strides = [1, 1]} : vector<32x256xf32> to vector<32x128xf32>
    %cst_35 = arith.constant 0.000000e+00 : f32
    %53 = vector.broadcast %cst_35 : f32 to vector<32x128xf32>
    %54 = arith.cmpf ogt, %52, %53 : vector<32x128xf32>
    %cst_36 = arith.constant 2.000000e-01 : f32
    %55 = vector.broadcast %cst_36 : f32 to vector<32x128xf32>
    %56 = arith.mulf %55, %52 : vector<32x128xf32>
    %57 = arith.select %54, %52, %56 : vector<32x128xi1>, vector<32x128xf32>
    %58 = arith.truncf %57 : vector<32x128xf32> to vector<32x128xbf16>
    %59 = vector.shape_cast %58 : vector<32x128xbf16> to vector<2x16x128xbf16>
    %cst_37 = arith.constant 0.000000e+00 : bf16
    %60 = vector.broadcast %cst_37 : bf16 to vector<10x1x128xbf16>
    %c0_38 = arith.constant 0 : index
    %c0_39 = arith.constant 0 : index
    %c0_40 = arith.constant 0 : index
    %61 = vector.load %arg11[%c0_38, %c0_39, %c0_40] : memref<10x18x128xbf16, #tpu.memory_space<vmem>>, vector<10x1x128xbf16>
    tpu.vector_store %arg11[%c0_38, %c0_39, %c0_40], %60 {strides = array<i32>} : memref<10x18x128xbf16, #tpu.memory_space<vmem>>, vector<10x1x128xbf16>,
    %cst_41 = arith.constant 0.000000e+00 : bf16
    %62 = vector.broadcast %cst_41 : bf16 to vector<10x1x128xbf16>
    %c0_42 = arith.constant 0 : index
    %c17 = arith.constant 17 : index
    %c0_43 = arith.constant 0 : index
    %63 = vector.load %arg11[%c0_42, %c17, %c0_43] : memref<10x18x128xbf16, #tpu.memory_space<vmem>>, vector<10x1x128xbf16>
    tpu.vector_store %arg11[%c0_42, %c17, %c0_43], %62 {strides = array<i32>} : memref<10x18x128xbf16, #tpu.memory_space<vmem>>, vector<10x1x128xbf16>,
    %64 = vector.extract_strided_slice %59 {offsets = [0, 0, 0], sizes = [1, 16, 128], strides = [1, 1, 1]} : vector<2x16x128xbf16> to vector<1x16x128xbf16>
    %65 = vector.extract_strided_slice %59 {offsets = [1, 0, 0], sizes = [1, 16, 128], strides = [1, 1, 1]} : vector<2x16x128xbf16> to vector<1x16x128xbf16>
    %66 = tpu.concatenate %64, %27, %65 in 0 : vector<1x16x128xbf16>, vector<8x16x128xbf16>, vector<1x16x128xbf16> -> vector<10x16x128xbf16>
    %c0_44 = arith.constant 0 : index
    %c1 = arith.constant 1 : index
    %c0_45 = arith.constant 0 : index
    %67 = vector.load %arg11[%c0_44, %c1, %c0_45] : memref<10x18x128xbf16, #tpu.memory_space<vmem>>, vector<10x16x128xbf16>
    tpu.vector_store %arg11[%c0_44, %c1, %c0_45], %66 {strides = array<i32>} : memref<10x18x128xbf16, #tpu.memory_space<vmem>>, vector<10x16x128xbf16>,
    %c0_46 = arith.constant 0 : index
    %c0_47 = arith.constant 0 : index
    %c0_48 = arith.constant 0 : index
    %68 = vector.load %arg11[%c0_46, %c0_47, %c0_48] : memref<10x18x128xbf16, #tpu.memory_space<vmem>>, vector<10x16x128xbf16>
    %69 = vector.extract_strided_slice %68 {offsets = [0, 0, 0], sizes = [8, 16, 128], strides = [1, 1, 1]} : vector<10x16x128xbf16> to vector<8x16x128xbf16>
    %70 = vector.extract_strided_slice %68 {offsets = [1, 0, 0], sizes = [8, 16, 128], strides = [1, 1, 1]} : vector<10x16x128xbf16> to vector<8x16x128xbf16>
    %71 = vector.extract_strided_slice %68 {offsets = [2, 0, 0], sizes = [8, 16, 128], strides = [1, 1, 1]} : vector<10x16x128xbf16> to vector<8x16x128xbf16>
    %72 = tpu.concatenate %69, %70, %71 in 2 : vector<8x16x128xbf16>, vector<8x16x128xbf16>, vector<8x16x128xbf16> -> vector<8x16x384xbf16>
    %73 = vector.shape_cast %72 : vector<8x16x384xbf16> to vector<128x384xbf16>
    %c0_49 = arith.constant 0 : index
    %c0_50 = arith.constant 0 : index
    %c0_51 = arith.constant 0 : index
    %74 = vector.load %arg5[%c0_49, %c0_50, %c0_51] : memref<3x384x128xbf16, #tpu.memory_space<vmem>>, vector<1x384x128xbf16>
    %75 = vector.shape_cast %74 : vector<1x384x128xbf16> to vector<384x128xbf16>
    %cst_52 = arith.constant dense<0.000000e+00> : vector<128x128xf32>
    %76 = tpu.matmul %73, %75, %cst_52 {dimension_numbers = #tpu.dot_dimension_numbers<[1], [0], [0], [1], [0, 0, 1, 1], [], []>} : vector<128x384xbf16>, vector<384x128xbf16>, vector<128x128xf32> -> vector<128x128xf32>
    %c0_53 = arith.constant 0 : index
    %c1_54 = arith.constant 1 : index
    %c0_55 = arith.constant 0 : index
    %77 = vector.load %arg11[%c0_53, %c1_54, %c0_55] : memref<10x18x128xbf16, #tpu.memory_space<vmem>>, vector<10x16x128xbf16>
    %78 = vector.extract_strided_slice %77 {offsets = [0, 0, 0], sizes = [8, 16, 128], strides = [1, 1, 1]} : vector<10x16x128xbf16> to vector<8x16x128xbf16>
    %79 = vector.extract_strided_slice %77 {offsets = [1, 0, 0], sizes = [8, 16, 128], strides = [1, 1, 1]} : vector<10x16x128xbf16> to vector<8x16x128xbf16>
    %80 = vector.extract_strided_slice %77 {offsets = [2, 0, 0], sizes = [8, 16, 128], strides = [1, 1, 1]} : vector<10x16x128xbf16> to vector<8x16x128xbf16>
    %81 = tpu.concatenate %78, %79, %80 in 2 : vector<8x16x128xbf16>, vector<8x16x128xbf16>, vector<8x16x128xbf16> -> vector<8x16x384xbf16>
    %82 = vector.shape_cast %81 : vector<8x16x384xbf16> to vector<128x384xbf16>
    %c1_56 = arith.constant 1 : index
    %c0_57 = arith.constant 0 : index
    %c0_58 = arith.constant 0 : index
    %83 = vector.load %arg5[%c1_56, %c0_57, %c0_58] : memref<3x384x128xbf16, #tpu.memory_space<vmem>>, vector<1x384x128xbf16>
    %84 = vector.shape_cast %83 : vector<1x384x128xbf16> to vector<384x128xbf16>
    %cst_59 = arith.constant dense<0.000000e+00> : vector<128x128xf32>
    %85 = tpu.matmul %82, %84, %cst_59 {dimension_numbers = #tpu.dot_dimension_numbers<[1], [0], [0], [1], [0, 0, 1, 1], [], []>} : vector<128x384xbf16>, vector<384x128xbf16>, vector<128x128xf32> -> vector<128x128xf32>
    %86 = arith.addf %76, %85 : vector<128x128xf32>
    %c0_60 = arith.constant 0 : index
    %c2 = arith.constant 2 : index
    %c0_61 = arith.constant 0 : index
    %87 = vector.load %arg11[%c0_60, %c2, %c0_61] : memref<10x18x128xbf16, #tpu.memory_space<vmem>>, vector<10x16x128xbf16>
    %88 = vector.extract_strided_slice %87 {offsets = [0, 0, 0], sizes = [8, 16, 128], strides = [1, 1, 1]} : vector<10x16x128xbf16> to vector<8x16x128xbf16>
    %89 = vector.extract_strided_slice %87 {offsets = [1, 0, 0], sizes = [8, 16, 128], strides = [1, 1, 1]} : vector<10x16x128xbf16> to vector<8x16x128xbf16>
    %90 = vector.extract_strided_slice %87 {offsets = [2, 0, 0], sizes = [8, 16, 128], strides = [1, 1, 1]} : vector<10x16x128xbf16> to vector<8x16x128xbf16>
    %91 = tpu.concatenate %88, %89, %90 in 2 : vector<8x16x128xbf16>, vector<8x16x128xbf16>, vector<8x16x128xbf16> -> vector<8x16x384xbf16>
    %92 = vector.shape_cast %91 : vector<8x16x384xbf16> to vector<128x384xbf16>
    %c2_62 = arith.constant 2 : index
    %c0_63 = arith.constant 0 : index
    %c0_64 = arith.constant 0 : index
    %93 = vector.load %arg5[%c2_62, %c0_63, %c0_64] : memref<3x384x128xbf16, #tpu.memory_space<vmem>>, vector<1x384x128xbf16>
    %94 = vector.shape_cast %93 : vector<1x384x128xbf16> to vector<384x128xbf16>
    %cst_65 = arith.constant dense<0.000000e+00> : vector<128x128xf32>
    %95 = tpu.matmul %92, %94, %cst_65 {dimension_numbers = #tpu.dot_dimension_numbers<[1], [0], [0], [1], [0, 0, 1, 1], [], []>} : vector<128x384xbf16>, vector<384x128xbf16>, vector<128x128xf32> -> vector<128x128xf32>
    %96 = arith.addf %86, %95 : vector<128x128xf32>
    %cst_66 = arith.constant 0.000000e+00 : f32
    %97 = vector.broadcast %cst_66 : f32 to vector<128x128xf32>
    %98 = arith.cmpf ogt, %96, %97 : vector<128x128xf32>
    %cst_67 = arith.constant 2.000000e-01 : f32
    %99 = vector.broadcast %cst_67 : f32 to vector<128x128xf32>
    %100 = arith.mulf %99, %96 : vector<128x128xf32>
    %101 = arith.select %98, %96, %100 : vector<128x128xi1>, vector<128x128xf32>
    %102 = arith.truncf %101 : vector<128x128xf32> to vector<128x128xbf16>
    %c0_68 = arith.constant 0 : index
    %c0_69 = arith.constant 0 : index
    %103 = vector.load %arg6[%c0_68, %c0_69] : memref<128x128xbf16, #tpu.memory_space<vmem>>, vector<128x128xbf16>
    %cst_70 = arith.constant dense<0.000000e+00> : vector<128x128xf32>
    %104 = tpu.matmul %102, %103, %cst_70 {dimension_numbers = #tpu.dot_dimension_numbers<[1], [0], [0], [1], [0, 0, 1, 1], [], []>} : vector<128x128xbf16>, vector<128x128xbf16>, vector<128x128xf32> -> vector<128x128xf32>
    %105 = arith.addf %20, %104 : vector<128x128xf32>
    %106 = vector.shape_cast %105 : vector<128x128xf32> to vector<8x16x128xf32>
    %107 = arith.truncf %106 : vector<8x16x128xf32> to vector<8x16x128xbf16>
    %c0_71 = arith.constant 0 : index
    %c0_72 = arith.constant 0 : index
    %c0_73 = arith.constant 0 : index
    %c0_74 = arith.constant 0 : index
    %108 = vector.load %arg8[%c0_71, %c0_72, %c0_73, %c0_74] : memref<1x8x16x128xbf16, #tpu.memory_space<vmem>>, vector<1x8x16x128xbf16>
    %109 = vector.shape_cast %108 : vector<1x8x16x128xbf16> to vector<8x16x128xbf16>
    %110 = vector.shape_cast %107 : vector<8x16x128xbf16> to vector<1x8x16x128xbf16>
    tpu.vector_store %arg8[%c0_71, %c0_72, %c0_73, %c0_74], %110 {strides = array<i32>} : memref<1x8x16x128xbf16, #tpu.memory_space<vmem>>, vector<1x8x16x128xbf16>,
    %111 = vector.shape_cast %106 : vector<8x16x128xf32> to vector<4x2x16x128xf32>
    %cst_75 = arith.constant dense<0xFF800000> : vector<4x16x128xf32>
    %112 = vector.multi_reduction <maximumf>, %111, %cst_75 [1] : vector<4x2x16x128xf32> to vector<4x16x128xf32>
    %113 = vector.shape_cast %112 : vector<4x16x128xf32> to vector<4x8x2x128xf32>
    %cst_76 = arith.constant dense<0xFF800000> : vector<4x8x128xf32>
    %114 = vector.multi_reduction <maximumf>, %113, %cst_76 [2] : vector<4x8x2x128xf32> to vector<4x8x128xf32>
    %115 = arith.truncf %114 : vector<4x8x128xf32> to vector<4x8x128xbf16>
    %c0_77 = arith.constant 0 : index
    %c0_78 = arith.constant 0 : index
    %c0_79 = arith.constant 0 : index
    %c0_80 = arith.constant 0 : index
    %116 = vector.load %arg7[%c0_77, %c0_78, %c0_79, %c0_80] : memref<1x4x8x128xbf16, #tpu.memory_space<vmem>>, vector<1x4x8x128xbf16>
    %117 = vector.shape_cast %116 : vector<1x4x8x128xbf16> to vector<4x8x128xbf16>
    %118 = vector.shape_cast %115 : vector<4x8x128xbf16> to vector<1x4x8x128xbf16>
    tpu.vector_store %arg7[%c0_77, %c0_78, %c0_79, %c0_80], %118 {strides = array<i32>} : memref<1x4x8x128xbf16, #tpu.memory_space<vmem>>, vector<1x4x8x128xbf16>,
    return
  }
  func.func @transform_0(%arg0: i32, %arg1: i32) -> (i32, i32, i32, i32) {
    %c0_i32 = arith.constant 0 : i32
    %c0_i32_0 = arith.constant 0 : i32
    %c0_i32_1 = arith.constant 0 : i32
    return %arg0, %arg1, %c0_i32, %c0_i32_0 : i32, i32, i32, i32
  }
  func.func @transform_2(%arg0: i32, %arg1: i32) -> (i32, i32) {
    %c0_i32 = arith.constant 0 : i32
    %c0_i32_0 = arith.constant 0 : i32
    %c0_i32_1 = arith.constant 0 : i32
    return %c0_i32, %c0_i32_0 : i32, i32
  }
  func.func @transform_3(%arg0: i32, %arg1: i32) -> (i32, i32, i32) {
    %c0_i32 = arith.constant 0 : i32
    %c0_i32_0 = arith.constant 0 : i32
    %c0_i32_1 = arith.constant 0 : i32
    %c0_i32_2 = arith.constant 0 : i32
    return %c0_i32, %c0_i32_0, %c0_i32_1 : i32, i32, i32
  }
  func.func @transform_4(%arg0: i32, %arg1: i32) -> (i32, i32) {
    %c0_i32 = arith.constant 0 : i32
    %c0_i32_0 = arith.constant 0 : i32
    %c0_i32_1 = arith.constant 0 : i32
    return %c0_i32, %c0_i32_0 : i32, i32
  }
  func.func @transform_5(%arg0: i32, %arg1: i32) -> (i32, i32, i32, i32) {
    %c0_i32 = arith.constant 0 : i32
    %c0_i32_0 = arith.constant 0 : i32
    %c0_i32_1 = arith.constant 0 : i32
    return %arg0, %arg1, %c0_i32, %c0_i32_0 : i32, i32, i32, i32
  }
  func.func @transform_6(%arg0: i32, %arg1: i32) -> (i32, i32, i32, i32) {
    %c0_i32 = arith.constant 0 : i32
    %c0_i32_0 = arith.constant 0 : i32
    %c0_i32_1 = arith.constant 0 : i32
    return %arg0, %arg1, %c0_i32, %c0_i32_0 : i32, i32, i32, i32
  }
}

</mosaic_0001>

<bundles_post_ra>
// kernel: tpu_custom_call.1
= control target key start
LH: loop header
LB: loop body
LE: loop exit
PB: predicated region body
PF: predicated region fallthrough
CT: control target
= control target key end

     0   :  { %s6539_s0 = inlined_call_operand.hbm [shape: bf16[2,16,16,128], index: 0, kind: input, shape index: {}]   ;;  %s6540_s1 = inlined_call_operand.hbm [shape: bf16[2,16,16,128], index: 1, kind: input, shape index: {}]   ;;  %s6541_s2 = inlined_call_operand.hbm [shape: bf16[128,256], index: 2, kind: input, shape index: {}]   ;;  %s6542_s3 = inlined_call_operand.hbm [shape: bf16[3,384,128], index: 3, kind: input, shape index: {}]   ;;  %s6543_s4 = inlined_call_operand.hbm [shape: bf16[128,128], index: 4, kind: input, shape index: {}]   ;;  %s6544_s5 = inlined_call_operand.hbm [shape: bf16[2,8,8,128], index: 5, kind: output, shape index: {0}]   ;;  %s6545_s6 = inlined_call_operand.hbm [shape: bf16[2,16,16,128], index: 6, kind: output, shape index: {1}]  }
   0x1   :  { %6558 = sst [smem:[#allocation42_spill]] %s6541_s2 }
   0x2   :  { %6559 = sst [smem:[#allocation43_spill]] %s6542_s3 }
   0x3   :  { %6560 = sst [smem:[#allocation44_spill]] %s6543_s4 }
   0x4   :  { %6561 = sst [smem:[#allocation45_spill]] %s6544_s5 }
   0x5   :  { %6562 = sst [smem:[#allocation46_spill]] %s6545_s6 }
   0x6   :  { %12 = vsyncpa [#allocation7], 0 }
   0x7   :  { %14 = vsyncpa [#allocation7 + $0x1], 0 }
   0x8   :  { %15 = vsyncpa [#allocation10], 0 }
   0x9   :  { %16 = vsyncpa [#allocation13], 0 }
   0xa   :  { %17 = vsyncpa [#allocation8], 0 }
   0xb   :  { %19 = vsyncpa [#allocation8 + $0x1], 0 }
   0xc   :  { %20 = vsyncpa [#allocation16], 0 }
   0xd   :  { %22 = vsyncpa [#allocation16 + $0x1], 0  ;;  %s5422_s21 = smov 0   ;;  %s5424_s22 = smov 0  }
   0xe   :  { %s5426_s23 = smov 0   ;;  %s5428_s24 = smov 0  }
   0xf   :  { %s5430_s25 = smov 0   ;;  %s5432_s26 = smov 0  }
  0x10   :  { %s5434_s27 = smov 0   ;;  %s5436_s28 = smov 0  }
  0x11 LB: > { %6563 = sst [smem:[#allocation30_spill]] %s5341_s21  ;;  %s3937_s29 = sadd.s32 4294967295, %s5369_s28   ;;  %s5369_s28 = sphi %s5436_s28, %s28_s28   ;;  %s5365_s27 = sphi %s5434_s27, %s6625_s27   ;;  %s5361_s26 = sphi %s5432_s26, %s6624_s26   ;;  %s5357_s25 = sphi %s5430_s25, %s6623_s25   ;;  %s5353_s24 = sphi %s5428_s24, %s6622_s24   ;;  %s5349_s23 = sphi %s5426_s23, %s6621_s23   ;;  %s5345_s22 = sphi %s5424_s22, %s6620_s22   ;;  %s5341_s21 = sphi %s5422_s21, %s6619_s21  }
  0x12   : > { %s3938_s30 = sadd.s32 4294967294, %s5369_s28   ;;  %p62_p0 = scmp.ne.s32.totalorder %s5345_s22, %s5341_s21 }
  0x13   : > { %p5466_p1 = scmp.eq.s32.totalorder %s3937_s29, 0  ;;  %p5470_p2 = scmp.eq.s32.totalorder %s3937_s29, 3 }
  0x14   : > { %p157_p3 = scmp.eq.s32.totalorder %s3938_s30, 3  ;;  %p3939_p5 = scmp.ge.s32.totalorder %s5369_s28, 1 }
  0x15   : > { %s6564_s7 = scalar_select %p5466_p1, 1, 0 }
  0x16   : > { %s6565_s8 = scalar_select %p5470_p2, 1, 0 }
  0x17   : > { %p5476_p4 = por %p5466_p1, %p62_p0  ;;  %p5481_p6 = por %p157_p3, %p62_p0 }
  0x18   : > { %p192_p7 = scmp.lt.s32.totalorder %s5369_s28, 5  ;;  %s5371_s12 = smov [#allocation9]  }
  0x19   : > { %s6566_s9 = scalar_select %p5476_p4, 1, 0 }
  0x1a   : > { %s6567_s10 = scalar_select %p5481_p6, 1, 0 }
  0x1b   : > { %p5486_p8 = pnand %p3939_p5, %p192_p7  ;;  %s204_s13 = sshll.u32 %s5371_s12, 4  ;;  %s205_s13 = int_to_ptr.vmem [resolvable:$true] %s204_s13 }
  0x1c   : > { %6568 = sst [smem:[#allocation31_spill]] %s6567_s10  ;;  %s5372_s15 = smov [#allocation11]  }
  0x1d   : > { %s6569_s11 = scalar_select %p5486_p8, 1, 0 }
  0x1e   : > { %p4793_p9 = pneg %p5486_p8  ;;  %s217_s16 = sshll.u32 %s5372_s15, 4  ;;  %s5498_s16 = int_to_ptr.vmem [resolvable:$true] %s217_s16 }
  0x1f   : > { %s6571_s2 = sld [smem:[#allocation42_spill]] }
  0x20   : > { %p5494_p10 = pnand %p4793_p9, %p5466_p1 }
  0x22   : > { %p5508_p12 = pneg %p5494_p10 }
  0x25   : > { %s5065_s19 = scalar_lea.hbm %s6571_s2, 2048 }
  0x26   : > { %p5066_p11 = scmp.ne.s32.totalorder %s6571_s2, %s5065_s19  ;;  %p5072_p3 = scmp.lt.u32.totalorder %s5065_s19, %s6571_s2 }
  0x28   : > { %p5068_p13 = pnand %p5508_p12, %p5066_p11 }
  0x2a   : > { %p5069_p0 = pneg %p5068_p13 }
  0x2c   : > { %p5074_p5 = pnand %p5072_p3, %p5069_p0 }
  0x2e   : > { %5077 = shalt.err (!%p5074_p5)
}
  0x2f   : > { %s5078_s17 = scalar_lea.vmem %s205_s13, 2048  ;;  %p5086_p1 = scmp.lt.s32.totalorder %s205_s13, %s205_s13 }
  0x30   : > { %p5079_p7 = scmp.ne.s32.totalorder %s205_s13, %s5078_s17  ;;  %p5087_p4 = scmp.lt.s32.totalorder %s5078_s17, %s5078_s17 }
  0x32   : > { %p5081_p9 = pnand %p5079_p7, %p5508_p12  ;;  %p5088_p8 = por %p5087_p4, %p5086_p1 }
  0x34   : > { %p5082_p6 = pneg %p5081_p9 }
  0x36   : > { %p5089_p2 = pnand %p5088_p8, %p5082_p6 }
  0x38   : > { %5092 = shalt.err (!%p5089_p2)
}
  0x39   : > { %s5373_s18 = smov 128   ;;  %s5374_s20 = smov 8  }
  0x3a   : > { %4796 = dma.hbm_to_vmem [thread:$0]  (!%p5494_p10), %s6571_s2, 2048, %s205_s13, [#allocation10], %s5373_s18, %s5373_s18, %s5374_s20  }
  0x3b   : > { %s6573_s3 = sld [smem:[#allocation43_spill]] }
  0x41   : > { %s5093_s10 = scalar_lea.hbm %s6573_s3, 9216 }
  0x42   : > { %p5094_p11 = scmp.ne.s32.totalorder %s6573_s3, %s5093_s10  ;;  %p5100_p4 = scmp.lt.u32.totalorder %s5093_s10, %s6573_s3 }
  0x44   : > { %p5096_p1 = pnand %p5094_p11, %p5508_p12 }
  0x46   : > { %p5097_p2 = pneg %p5096_p1 }
  0x48   : > { %p5102_p6 = pnand %p5100_p4, %p5097_p2 }
  0x4a   : > { %5105 = shalt.err (!%p5102_p6)
}
  0x4b   : > { %s5106_s13 = scalar_lea.vmem %s5498_s16, 9216  ;;  %p5114_p3 = scmp.lt.s32.totalorder %s5498_s16, %s5498_s16 }
  0x4c   : > { %p5107_p8 = scmp.ne.s32.totalorder %s5498_s16, %s5106_s13  ;;  %p5115_p5 = scmp.lt.s32.totalorder %s5106_s13, %s5106_s13 }
  0x4e   : > { %p5109_p13 = pnand %p5107_p8, %p5508_p12  ;;  %p5116_p7 = por %p5115_p5, %p5114_p3 }
  0x50   : > { %p5110_p0 = pneg %p5109_p13 }
  0x52   : > { %p5117_p9 = pnand %p5116_p7, %p5110_p0 }
  0x54   : > { %5120 = shalt.err (!%p5117_p9)
}
  0x55   : > { %s6554_s5 = smov 64   ;;  %s6555_s6 = smov 4  }
  0x56   : > { %4799 = dma.hbm_to_vmem [thread:$0]  (!%p5494_p10), %s6573_s3, 9216, %s5498_s16, [#allocation10], %s6554_s5, %s6554_s5, %s6555_s6  }
  0x57   : > { %s5377_s18 = smov [#allocation12]   ;;  %s6574_s4 = sld [smem:[#allocation44_spill]] }
  0x58   : > { %s230_s20 = sshll.u32 %s5377_s18, 4  ;;  %s231_s20 = int_to_ptr.vmem [resolvable:$true] %s230_s20 }
  0x5d   : > { %s5121_s12 = scalar_lea.hbm %s6574_s4, 1024 }
  0x5e   : > { %p5122_p11 = scmp.ne.s32.totalorder %s6574_s4, %s5121_s12  ;;  %p5128_p4 = scmp.lt.u32.totalorder %s5121_s12, %s6574_s4 }
  0x60   : > { %p5124_p1 = pnand %p5122_p11, %p5508_p12 }
  0x62   : > { %p5125_p2 = pneg %p5124_p1 }
  0x64   : > { %p5130_p6 = pnand %p5128_p4, %p5125_p2 }
  0x66   : > { %5133 = shalt.err (!%p5130_p6)
}
  0x67   : > { %s5134_s16 = scalar_lea.vmem %s231_s20, 1024  ;;  %p5142_p3 = scmp.lt.s32.totalorder %s231_s20, %s231_s20 }
  0x68   : > { %p5135_p8 = scmp.ne.s32.totalorder %s231_s20, %s5134_s16  ;;  %p5143_p5 = scmp.lt.s32.totalorder %s5134_s16, %s5134_s16 }
  0x6a   : > { %p5137_p13 = pnand %p5135_p8, %p5508_p12  ;;  %p5144_p7 = por %p5143_p5, %p5142_p3 }
  0x6c   : > { %p5138_p0 = pneg %p5137_p13 }
  0x6e   : > { %p5145_p9 = pnand %p5144_p7, %p5138_p0 }
  0x70   : > { %5148 = shalt.err (!%p5145_p9)
}
  0x71   : > { %4802 = dma.hbm_to_vmem [thread:$0]  (!%p5494_p10), %s6574_s4, 1024, %s231_s20, [#allocation13], %s6554_s5, %s6554_s5, %s6555_s6  }
  0x72   : > { %s37_s14 = sadd.s32 1, %s5361_s26  ;;  %s40_s30 = sadd.s32 1, %s5365_s27 }
  0x73   : > { %p38_p12 = scmp.ge.s32.totalorder %s37_s14, 2  ;;  %s49_s10 = sadd.s32 1, %s5349_s23 }
  0x74   : > { %p56_p11 = scmp.ne.s32.totalorder %s5349_s23, %s5345_s22  ;;  %p57_p1 = scmp.eq.s32.totalorder %s5369_s28, 0 }
  0x75   : > { %s6627_s14 = smov (%p38_p12, %s37_s14), 0  ;;  %s6629_s30 = smov (!%p38_p12, %s40_s30), %s5365_s27 }
  0x76   : > { %s45_s18 = ssub.s32 %s5361_s26, %s6627_s14  ;;  %p42_p2 = scmp.ge.s32.totalorder %s6629_s30, 2 }
  0x77   : > { %p6575_p4 = scmp.ne.s32.totalorder %s6565_s8, 0  ;;  %p5588_p10 = por %p57_p1, %p56_p11 }
  0x78   : > { %p4817_p8 = scmp.lt.s32.totalorder %s5369_s28, 4  ;;  %s6631_s30 = smov (%p42_p2, %s6629_s30), 0 }
  0x79   : > { %p5584_p6 = por %p6575_p4, %p56_p11  ;;  %6578 = sst [smem:[#allocation32_spill]] %s6631_s30 }
  0x7a   : > { %s244_s19 = sand.u32 1, %s5349_s23   ;;  %s4194_s12 = sshll.u32 %s5361_s26, 4 }
  0x7b   : > { %s44_s15 = ssub.s32 %s5365_s27, %s6631_s30  ;;  %s3944_s13 = sshll.u32 %s244_s19, 6 }
  0x7c   : > { %s46_s17 = sor.u32 %s45_s18, %s44_s15  ;;  %s3947_s8 = sshll.u32 %s5365_s27, 5 }
  0x7d   : > { %p47_p13 = scmp.eq.s32.totalorder %s46_s17, 0  ;;  %s248_s16 = scalar_lea.vmem [#allocation6], %s3944_s13 }
  0x7e   : > { %s258_s2 = sshll.u32 %s248_s16, 4  ;;  %s255_s5 = sadd.s32 %s4194_s12, %s3947_s8  ;;  %s5603_s2 = int_to_ptr.vmem [resolvable:$true] %s258_s2 }
  0x7f   : > { %s5601_s21 = scalar_select %p47_p13, %s5349_s23, %s49_s10  }
  0x80   : > { %s3948_s6 = sshll.u32 %s255_s5, 6  ;;  %p5609_p0 = pnand %p4817_p8, %p5588_p10 }
  0x81   : > { %s5616_s18 = scalar_lea.hbm %s6539_s0, %s3948_s6  ;;  %s5618_s10 = scalar_lea.sflag [#allocation7], %s244_s19 }
  0x82   : > { %s5149_s5 = scalar_lea.hbm %s5616_s18, 1024  ;;  %p5151_p5 = pneg %p5609_p0 }
  0x83   : > { %p5150_p3 = scmp.ne.s32.totalorder %s5616_s18, %s5149_s5  ;;  %s5154_s30 = scalar_lea.hbm %s6539_s0, 4096 }
  0x84   : > { %p5155_p12 = scmp.lt.u32.totalorder %s5616_s18, %s6539_s0  ;;  %p5156_p11 = scmp.lt.u32.totalorder %s5154_s30, %s5149_s5 }
  0x85   : > { %p5152_p7 = pnand %p5151_p5, %p5150_p3  ;;  %p5158_p2 = scmp.lt.u32.totalorder %s5149_s5, %s5616_s18 }
  0x86   : > { %p5157_p1 = por %p5156_p11, %p5155_p12 }
  0x87   : > { %p5153_p9 = pneg %p5152_p7 }
  0x88   : > { %p5159_p4 = por %p5158_p2, %p5157_p1 }
  0x8a   : > { %p5160_p10 = pnand %p5159_p4, %p5153_p9 }
  0x8c   : > { %5163 = shalt.err (!%p5160_p10)
}
  0x8d   : > { %s5164_s19 = scalar_lea.vmem %s5603_s2, 1024  ;;  %s5378_s15 = smov [#allocation6]  }
  0x8e   : > { %p5165_p8 = scmp.ne.s32.totalorder %s5603_s2, %s5164_s19  ;;  %s5169_s17 = sshll.u32 %s5378_s15, 4  ;;  %s5170_s17 = int_to_ptr.vmem [resolvable:$false] %s5169_s17 }
  0x8f   : > { %s5171_s13 = scalar_lea.vmem %s5170_s17, 2048  ;;  %p5172_p7 = scmp.lt.s32.totalorder %s5603_s2, %s5170_s17 }
  0x90   : > { %p5167_p13 = pnand %p5165_p8, %p5151_p5  ;;  %p5173_p12 = scmp.lt.s32.totalorder %s5171_s13, %s5164_s19 }
  0x92   : > { %p5168_p3 = pneg %p5167_p13  ;;  %p5174_p11 = por %p5173_p12, %p5172_p7 }
  0x94   : > { %p5175_p1 = pnand %p5174_p11, %p5168_p3 }
  0x96   : > { %5178 = shalt.err (!%p5175_p1)
}
  0x97   : > { %s6580_s8 = smov 4   ;;  %s6581_s16 = smov 64  }
  0x98   : > { %4806 = dma.hbm_to_vmem [thread:$0]  (!%p5609_p0), %s5616_s18, 1024, %s5603_s2, %s5618_s10, %s6581_s16, %s6581_s16, %s6580_s8  }
  0x99   : > { %p6582_p5 = scmp.ne.s32.totalorder %s6569_s11, 0 }
  0x9b   : > { %270 = sbr.rel (%p6582_p5) target bundleno = 1444 (0x5a4), region = 36 }
  0xa2   : > { %s5652_s5 = sand.u32 1, %s5345_s22   ;;  %p6583_p9 = scmp.ne.s32.totalorder %s6566_s9, 0 }
  0xa3   : > { %s6557_s20 = sshll.u32 %s5652_s5, 6  ;;  %s273_s4 = scalar_lea.sflag [#allocation7], %s5652_s5 }
  0xa4   : > { %s5658_s3 = scalar_lea.vmem [#allocation6], %s6557_s20 }
  0xa5   : > { %5316 = dma.done.wait (%p6583_p9), %s273_s4, 1024  }
  0xa6   : > { %5318 = vsyncadd (%p6583_p9), %s273_s4, 4294966272  ;;  %p6584_p0 = scmp.ne.s32.totalorder %s6564_s7, 0 }
  0xa8   : > { %5320 = dma.done.wait (%p6584_p0), [#allocation10], 11264  }
  0xa9   : > { %5322 = vsyncadd (%p6584_p0), [#allocation10], 4294956032 }
  0xaa   : > { %5324 = dma.done.wait (%p6584_p0), [#allocation13], 1024  }
  0xab   : > { %5326 = vsyncadd (%p6584_p0), [#allocation13], 4294966272  ;;  %v5379_v0 = vmov 0   ;;  %v4899_v1 = vld [vmem:[#allocation9 + $0x4] ss:$8 sps:$4 sm:$0xff]   ;;  %v4925_v19 = vld [vmem:[%s5658_s3 + $0x10] sm:$0xff]  }
  0xac   : > { %555 = vmatprep.mubr.bf16.mxu0 %v5379_v0  ;;  %v4901_v2 = vld [vmem:[#allocation9] ss:$8 sps:$4 sm:$0xff]   ;;  %523 = vmatprep.subr.bf16.mxu0 %v4899_v1  ;;  %v4902_v3 = vld [vmem:[#allocation9 + $0x14] ss:$8 sps:$4 sm:$0xff]   ;;  %v4904_v4 = vld [vmem:[#allocation9 + $0x10] ss:$8 sps:$4 sm:$0xff]  }
  0xad   : > { %524 = vmatpush1.bf16.msra.mxu0 %v4901_v2  ;;  %v4905_v5 = vld [vmem:[#allocation9 + $0x24] ss:$8 sps:$4 sm:$0xff]   ;;  %v4907_v6 = vld [vmem:[#allocation9 + $0x20] ss:$8 sps:$4 sm:$0xff]   ;;  %v4908_v7 = vld [vmem:[#allocation9 + $0x34] ss:$8 sps:$4 sm:$0xff]  }
  0xae   : > { %525 = vmatprep.subr.bf16.mxu0 %v4902_v3  ;;  %v4910_v8 = vld [vmem:[#allocation9 + $0x30] ss:$8 sps:$4 sm:$0xff]   ;;  %v4911_v9 = vld [vmem:[#allocation9 + $0x44] ss:$8 sps:$4 sm:$0xff]   ;;  %v4913_v10 = vld [vmem:[#allocation9 + $0x40] ss:$8 sps:$4 sm:$0xff]  }
  0xaf   : > { %v4914_v11 = vld [vmem:[#allocation9 + $0x54] ss:$8 sps:$4 sm:$0xff]   ;;  %v4916_v12 = vld [vmem:[#allocation9 + $0x50] ss:$8 sps:$4 sm:$0xff]   ;;  %v4917_v13 = vld [vmem:[#allocation9 + $0x64] ss:$8 sps:$4 sm:$0xff]  }
  0xb0   : > { %v4919_v14 = vld [vmem:[#allocation9 + $0x60] ss:$8 sps:$4 sm:$0xff]   ;;  %v4920_v15 = vld [vmem:[#allocation9 + $0x74] ss:$8 sps:$4 sm:$0xff]   ;;  %v4922_v16 = vld [vmem:[#allocation9 + $0x70] ss:$8 sps:$4 sm:$0xff]  }
  0xb1   : > { %526 = vmatpush1.bf16.msra.mxu0 %v4904_v4  ;;  %v4923_v17 = vld [vmem:[%s5658_s3] sm:$0xff]   ;;  %v4924_v18 = vld [vmem:[%s5658_s3 + $0x8] sm:$0xff]   ;;  %v4926_v20 = vld [vmem:[%s5658_s3 + $0x18] sm:$0xff]   ;;  %s3956_s7 = sshll.u32 %s5353_s24, 3  ;;  %s5692_s18 = sshll.u32 %s5357_s25, 5 }
  0xb2   : > { %527 = vmatprep.subr.bf16.mxu0 %v4905_v5  ;;  %v4927_v21 = vld [vmem:[%s5658_s3 + $0x20] sm:$0xff]   ;;  %v4928_v22 = vld [vmem:[%s5658_s3 + $0x28] sm:$0xff]   ;;  %v4929_v23 = vld [vmem:[%s5658_s3 + $0x30] sm:$0xff]   ;;  %s3957_s9 = sadd.s32 4294967295, %s3956_s7  ;;  %s328_s11 = sadd.s32 8, %s3956_s7 }
  0xb3   : > { %v4930_v24 = vld [vmem:[%s5658_s3 + $0x38] sm:$0xff]   ;;  %p326_p2 = scmp.gt.s32.totalorder %s3957_s9, 0  ;;  %p329_p4 = scmp.lt.s32.totalorder %s328_s11, 15 }
  0xb4   : > { %s5380_s6 = smov [#allocation2]   ;;  %s3954_s13 = sshll.u32 %s5652_s5, 4 }
  0xb5   : > { %528 = vmatpush1.bf16.msra.mxu0 %v4907_v6  ;;  %s6633_s9 = smov (!%p326_p2, %s3957_s9), 0  ;;  %s6635_s11 = smov (!%p329_p4, %s328_s11), 15 }
  0xb6   : > { %529 = vmatprep.subr.bf16.mxu0 %v4908_v7  ;;  %s3958_s2 = sshll.u32 %s6633_s9, 1  ;;  %s343_s12 = sshll.u32 %s5380_s6, 4  ;;  %s344_s12 = int_to_ptr.vmem [resolvable:$true] %s343_s12 }
  0xb7   : > { %s333_s10 = sadd.s32 %s5692_s18, %s3958_s2  ;;  %s3961_s8 = sshll.u32 %s6635_s11, 1 }
  0xb8   : > { %s3960_s30 = sshll.u32 %s333_s10, 6  ;;  %s5181_s7 = scalar_lea.hbm %s6540_s1, 4096 }
  0xb9   : > { %530 = vmatpush1.bf16.msra.mxu0 %v4910_v8  ;;  %s335_s17 = scalar_lea.hbm %s6540_s1, %s3960_s30 }
  0xba   : > { %531 = vmatprep.subr.bf16.mxu0 %v4911_v9  ;;  %s5179_s16 = scalar_lea.hbm %s335_s17, 128  ;;  %p5182_p8 = scmp.lt.u32.totalorder %s335_s17, %s6540_s1 }
  0xbb   : > { %p5180_p10 = scmp.ne.s32.totalorder %s335_s17, %s5179_s16  ;;  %p5183_p13 = scmp.lt.u32.totalorder %s5181_s7, %s5179_s16 }
  0xbc   : > { %p5185_p7 = scmp.lt.u32.totalorder %s5179_s16, %s335_s17 }
  0xbd   : > { %532 = vmatpush1.bf16.msra.mxu0 %v4913_v10  ;;  %p5184_p3 = por %p5183_p13, %p5182_p8 }
  0xbe   : > { %533 = vmatprep.subr.bf16.mxu0 %v4914_v11 }
  0xbf   : > { %p5186_p12 = por %p5185_p7, %p5184_p3 }
  0xc1   : > { %534 = vmatpush1.bf16.msra.mxu0 %v4916_v12  ;;  %p5187_p11 = pnand %p5186_p12, %p5180_p10 }
  0xc2   : > { %535 = vmatprep.subr.bf16.mxu0 %v4917_v13 }
  0xc5   : > { %536 = vmatpush1.bf16.msra.mxu0 %v4919_v14 }
  0xc6   : > { %537 = vmatprep.subr.bf16.mxu0 %v4920_v15 }
  0xc9   : > { %538 = vmatpush1.bf16.msra.mxu0 %v4922_v16 }
  0xcc   : > { %556 = vmatmul.mubr.bf16.vlgmr.msra.gmra.mrb[0].mxu0 %v4923_v17 }
  0xcd   : > { %565 = vmatprep.mubr.bf16.mxu0 %v5379_v0 }
  0xd4   : > { %566 = vmatmul.mubr.bf16.gmra.mrb[4].mxu0 %v4924_v18 }
  0xd5   : > { %575 = vmatprep.mubr.bf16.mxu0 %v5379_v0 }
  0xdc   : > { %576 = vmatmul.mubr.bf16.gmra.mrb[8].mxu0 %v4925_v19 }
  0xdd   : > { %585 = vmatprep.mubr.bf16.mxu0 %v5379_v0 }
  0xe4   : > { %586 = vmatmul.mubr.bf16.gmra.mrb[12].mxu0 %v4926_v20 }
  0xe5   : > { %595 = vmatprep.mubr.bf16.mxu0 %v5379_v0 }
  0xec   : > { %596 = vmatmul.mubr.bf16.gmra.mrb[16].mxu0 %v4927_v21 }
  0xed   : > { %605 = vmatprep.mubr.bf16.mxu0 %v5379_v0 }
  0xf4   : > { %606 = vmatmul.mubr.bf16.gmra.mrb[20].mxu0 %v4928_v22 }
  0xf5   : > { %615 = vmatprep.mubr.bf16.mxu0 %v5379_v0 }
  0xfc   : > { %616 = vmatmul.mubr.bf16.gmra.mrb[24].mxu0 %v4929_v23 }
  0xfd   : > { %625 = vmatprep.mubr.bf16.mxu0 %v5379_v0 }
 0x104   : > { %626 = vmatmul.mubr.bf16.gmra.mrb[28].mxu0 %v4930_v24 }
 0x105   : > { %5190 = shalt.err (!%p5187_p11)  }
 0x106   : > { %s5191_s2 = scalar_lea.vmem %s344_s12, 128  ;;  %p5196_p5 = scmp.lt.s32.totalorder %s344_s12, %s344_s12 }
 0x107   : > { %p5192_p1 = scmp.ne.s32.totalorder %s344_s12, %s5191_s2  ;;  %p5197_p9 = scmp.lt.s32.totalorder %s5191_s2, %s5191_s2 }
 0x109   : > { %p5198_p0 = por %p5197_p9, %p5196_p5 }
 0x10b   : > { %p5199_p2 = pnand %p5198_p0, %p5192_p1 }
 0x10d   : > { %5202 = shalt.err (!%p5199_p2)  }
 0x10e   : > { %346 = dma.hbm_to_vmem [thread:$0]  %s335_s17, 128, %s344_s12, [#allocation5] }
 0x10f   : > { %s348_s11 = sadd.s32 %s3961_s8, %s5692_s18  ;;  %s5381_s30 = smov [#allocation3]  }
 0x110   : > { %s3962_s10 = sshll.u32 %s348_s11, 6  ;;  %s359_s20 = sshll.u32 %s5381_s30, 4  ;;  %s360_s20 = int_to_ptr.vmem [resolvable:$true] %s359_s20 }
 0x111   : > { %s350_s15 = scalar_lea.hbm %s6540_s1, %s3962_s10 }
 0x112   : > { %s5203_s16 = scalar_lea.hbm %s350_s15, 128  ;;  %p5206_p10 = scmp.lt.u32.totalorder %s350_s15, %s6540_s1 }
 0x113   : > { %p5204_p4 = scmp.ne.s32.totalorder %s350_s15, %s5203_s16  ;;  %p5207_p8 = scmp.lt.u32.totalorder %s5181_s7, %s5203_s16 }
 0x114   : > { %p5209_p3 = scmp.lt.u32.totalorder %s5203_s16, %s350_s15 }
 0x115   : > { %p5208_p13 = por %p5207_p8, %p5206_p10 }
 0x117   : > { %p5210_p7 = por %p5209_p3, %p5208_p13 }
 0x119   : > { %p5211_p12 = pnand %p5210_p7, %p5204_p4 }
 0x11b   : > { %5214 = shalt.err (!%p5211_p12)  }
 0x11c   : > { %s5215_s12 = scalar_lea.vmem %s360_s20, 128  ;;  %p5220_p1 = scmp.lt.s32.totalorder %s360_s20, %s360_s20 }
 0x11d   : > { %p5216_p11 = scmp.ne.s32.totalorder %s360_s20, %s5215_s12  ;;  %p5221_p5 = scmp.lt.s32.totalorder %s5215_s12, %s5215_s12 }
 0x11f   : > { %p5222_p9 = por %p5221_p5, %p5220_p1 }
 0x121   : > { %p5223_p0 = pnand %p5222_p9, %p5216_p11 }
 0x123   : > { %5226 = shalt.err (!%p5223_p0)  }
 0x124   : > { %362 = dma.hbm_to_vmem [thread:$0]  %s350_s15, 128, %s360_s20, [#allocation5 + $0x1] }
 0x125   : > { %s5779_s17 = scalar_lea.vmem [#allocation14], %s3954_s13  ;;  %s6594_s8 = sshll.u32 %s5652_s5, 6 }
 0x126   : > { %s5783_s7 = scalar_lea.vmem [#allocation15], %s6594_s8 }
 0x19f   : > { %v557_v25 = vpop.f32.mrb[0].mxu0 }
 0x1a0   : > { %vm636_vm0 = vcmp.gt.f32.partialorder %v557_v25, 0.0  ;;  %v652_v26 = vmul.f32 0.2, %v557_v25  ;;  %v5713_v27 = vpop.f32.mrb[1].mxu0 }
 0x1a1   : > { %v561_v28 = vpop.f32.mrb[2].mxu0 }
 0x1a2   : > { %v5715_v29 = vsel %vm636_vm0, %v557_v25, %v652_v26  ;;  %vm637_vm1 = vcmp.gt.f32.partialorder %v561_v28, 0.0  ;;  %v653_v30 = vmul.f32 0.2, %v561_v28  ;;  %v5717_v31 = vpop.f32.mrb[3].mxu0 }
 0x1a4   : > { %v5719_v32 = vsel %vm637_vm1, %v561_v28, %v653_v30 }
 0x1a7   : > { %v567_v33 = vpop.f32.mrb[4].mxu0 }
 0x1a8   : > { %vm638_vm2 = vcmp.gt.f32.partialorder %v567_v33, 0.0  ;;  %v654_v34 = vmul.f32 0.2, %v567_v33  ;;  %v5721_v35 = vpop.f32.mrb[5].mxu0 }
 0x1a9   : > { %v571_v36 = vpop.f32.mrb[6].mxu0 }
 0x1aa   : > { %v5723_v37 = vsel %vm638_vm2, %v567_v33, %v654_v34  ;;  %vm639_vm3 = vcmp.gt.f32.partialorder %v571_v36, 0.0  ;;  %v655_v38 = vmul.f32 0.2, %v571_v36  ;;  %v5725_v39 = vpop.f32.mrb[7].mxu0 }
 0x1ac   : > { %v5727_v40 = vsel %vm639_vm3, %v571_v36, %v655_v38 }
 0x1af   : > { %v577_v41 = vpop.f32.mrb[8].mxu0 }
 0x1b0   : > { %vm640_vm4 = vcmp.gt.f32.partialorder %v577_v41, 0.0  ;;  %v656_v42 = vmul.f32 0.2, %v577_v41  ;;  %v5729_v43 = vpop.f32.mrb[9].mxu0 }
 0x1b1   : > { %v581_v44 = vpop.f32.mrb[10].mxu0 }
 0x1b2   : > { %v5731_v45 = vsel %vm640_vm4, %v577_v41, %v656_v42  ;;  %vm641_vm5 = vcmp.gt.f32.partialorder %v581_v44, 0.0  ;;  %v657_v46 = vmul.f32 0.2, %v581_v44  ;;  %v5733_v47 = vpop.f32.mrb[11].mxu0 }
 0x1b3   : > { %6585 = vst [vmem:[#allocation33_spill] sm:$0xff] %v5733_v47 }
 0x1b4   : > { %v5735_v48 = vsel %vm641_vm5, %v581_v44, %v657_v46 }
 0x1b7   : > { %v587_v49 = vpop.f32.mrb[12].mxu0 }
 0x1b8   : > { %vm642_vm6 = vcmp.gt.f32.partialorder %v587_v49, 0.0  ;;  %v658_v50 = vmul.f32 0.2, %v587_v49  ;;  %v5737_v51 = vpop.f32.mrb[13].mxu0 }
 0x1b9   : > { %v591_v52 = vpop.f32.mrb[14].mxu0 }
 0x1ba   : > { %v5739_v53 = vsel %vm642_vm6, %v587_v49, %v658_v50  ;;  %vm643_vm7 = vcmp.gt.f32.partialorder %v591_v52, 0.0  ;;  %v659_v54 = vmul.f32 0.2, %v591_v52  ;;  %v5741_v55 = vpop.f32.mrb[15].mxu0 }
 0x1bc   : > { %v5743_v56 = vsel %vm643_vm7, %v591_v52, %v659_v54 }
 0x1bf   : > { %v597_v57 = vpop.f32.mrb[16].mxu0 }
 0x1c0   : > { %vm644_vm8 = vcmp.gt.f32.partialorder %v597_v57, 0.0  ;;  %v660_v58 = vmul.f32 0.2, %v597_v57  ;;  %v5745_v59 = vpop.f32.mrb[17].mxu0 }
 0x1c1   : > { %6586 = vst [vmem:[#allocation34_spill] sm:$0xff] %v5745_v59  ;;  %v601_v60 = vpop.f32.mrb[18].mxu0 }
 0x1c2   : > { %v5747_v61 = vsel %vm644_vm8, %v597_v57, %v660_v58  ;;  %vm645_vm9 = vcmp.gt.f32.partialorder %v601_v60, 0.0  ;;  %v661_v62 = vmul.f32 0.2, %v601_v60  ;;  %v5749_v63 = vpop.f32.mrb[19].mxu0 }
 0x1c3   : > { %6587 = vst [vmem:[#allocation35_spill] sm:$0xff] %v5749_v63 }
 0x1c4   : > { %v5751_v1 = vsel %vm645_vm9, %v601_v60, %v661_v62 }
 0x1c7   : > { %v607_v2 = vpop.f32.mrb[20].mxu0 }
 0x1c8   : > { %vm646_vm10 = vcmp.gt.f32.partialorder %v607_v2, 0.0  ;;  %v662_v3 = vmul.f32 0.2, %v607_v2  ;;  %v5753_v4 = vpop.f32.mrb[21].mxu0 }
 0x1c9   : > { %6588 = vst [vmem:[#allocation36_spill] sm:$0xff] %v5753_v4  ;;  %v611_v5 = vpop.f32.mrb[22].mxu0 }
 0x1ca   : > { %v5755_v6 = vsel %vm646_vm10, %v607_v2, %v662_v3  ;;  %vm647_vm11 = vcmp.gt.f32.partialorder %v611_v5, 0.0  ;;  %v663_v7 = vmul.f32 0.2, %v611_v5  ;;  %v5757_v8 = vpop.f32.mrb[23].mxu0 }
 0x1cb   : > { %6589 = vst [vmem:[#allocation37_spill] sm:$0xff] %v5757_v8 }
 0x1cc   : > { %v5759_v9 = vsel %vm647_vm11, %v611_v5, %v663_v7 }
 0x1cf   : > { %v617_v10 = vpop.f32.mrb[24].mxu0 }
 0x1d0   : > { %vm648_vm12 = vcmp.gt.f32.partialorder %v617_v10, 0.0  ;;  %v664_v11 = vmul.f32 0.2, %v617_v10  ;;  %v5761_v12 = vpop.f32.mrb[25].mxu0 }
 0x1d1   : > { %6590 = vst [vmem:[#allocation38_spill] sm:$0xff] %v5761_v12  ;;  %v621_v13 = vpop.f32.mrb[26].mxu0 }
 0x1d2   : > { %v5763_v14 = vsel %vm648_vm12, %v617_v10, %v664_v11  ;;  %vm649_vm13 = vcmp.gt.f32.partialorder %v621_v13, 0.0  ;;  %v665_v15 = vmul.f32 0.2, %v621_v13  ;;  %v5765_v16 = vpop.f32.mrb[27].mxu0 }
 0x1d3   : > { %6591 = vst [vmem:[#allocation39_spill] sm:$0xff] %v5765_v16 }
 0x1d4   : > { %v5767_v17 = vsel %vm649_vm13, %v621_v13, %v665_v15 }
 0x1d7   : > { %v627_v18 = vpop.f32.mrb[28].mxu0 }
 0x1d8   : > { %vm650_vm14 = vcmp.gt.f32.partialorder %v627_v18, 0.0  ;;  %v666_v19 = vmul.f32 0.2, %v627_v18  ;;  %v5769_v20 = vpop.f32.mrb[29].mxu0 }
 0x1d9   : > { %6592 = vst [vmem:[#allocation40_spill] sm:$0xff] %v5769_v20  ;;  %v631_v21 = vpop.f32.mrb[30].mxu0 }
 0x1da   : > { %v5771_v22 = vsel %vm650_vm14, %v627_v18, %v666_v19  ;;  %vm651_vm15 = vcmp.gt.f32.partialorder %v631_v21, 0.0  ;;  %v667_v23 = vmul.f32 0.2, %v631_v21  ;;  %v5773_v24 = vpop.f32.mrb[31].mxu0 }
 0x1db   : > { %6593 = vst [vmem:[#allocation41_spill] sm:$0xff] %v5773_v24 }
 0x1dc   : > { %v5775_v25 = vsel %vm651_vm15, %v631_v21, %v667_v23 }
 0x1dd   : > { %5327 = dma.done.wait [#allocation5], 128 }
 0x1de   : > { %5328 = vsyncadd [#allocation5], 4294967168 }
 0x1df   : > { %5329 = dma.done.wait [#allocation5 + $0x1], 128 }
 0x1e0   : > { %5330 = vsyncadd [#allocation5 + $0x1], 4294967168  ;;  %863 = vmatprep.mubr.bf16.mxu1 %v5379_v0  ;;  %p699_p2 = scmp.gt.s32.totalorder %s5353_s24, 0  ;;  %p711_p4 = scmp.lt.s32.totalorder %s5353_s24, 1  ;;  %v4931_v26 = vld [vmem:[#allocation9 + $0x4] ss:$8 sps:$4 sm:$0xff]  }
 0x1e1   : > { %v4933_v28 = vld [vmem:[#allocation9] ss:$8 sps:$4 sm:$0xff]   ;;  %831 = vmatprep.subr.bf16.mxu1 %v4931_v26  ;;  %v4934_v30 = vld [vmem:[#allocation9 + $0x14] ss:$8 sps:$4 sm:$0xff]   ;;  %v4936_v33 = vld [vmem:[#allocation9 + $0x10] ss:$8 sps:$4 sm:$0xff]  }
 0x1e2   : > { %s700_s9 = scalar_select %p699_p2, 1.0, 0.0  ;;  %832 = vmatpush1.bf16.msra.mxu1 %v4933_v28  ;;  %v4937_v34 = vld [vmem:[#allocation9 + $0x24] ss:$8 sps:$4 sm:$0xff]   ;;  %v4939_v36 = vld [vmem:[#allocation9 + $0x20] ss:$8 sps:$4 sm:$0xff]   ;;  %v4200_v28 = vpack.c.bf16 %v5727_v40, %v5727_v40 }
 0x1e3   : > { %s712_s2 = scalar_select %p711_p4, 1.0, 0.0  ;;  %833 = vmatprep.subr.bf16.mxu1 %v4934_v30  ;;  %v4940_v38 = vld [vmem:[#allocation9 + $0x34] ss:$8 sps:$4 sm:$0xff]   ;;  %v4942_v41 = vld [vmem:[#allocation9 + $0x30] ss:$8 sps:$4 sm:$0xff]  }
 0x1e4   : > { %s703_s11 = sshrl.u32 %s700_s9, 16  ;;  %p702_p10 = scmp.ne.f32.partialorder %s700_s9, %s700_s9  ;;  %v4943_v42 = vld [vmem:[#allocation9 + $0x44] ss:$8 sps:$4 sm:$0xff]   ;;  %v4945_v49 = vld [vmem:[#allocation9 + $0x40] ss:$8 sps:$4 sm:$0xff]   ;;  %v4957_v52 = vld [vmem:[#allocation11 + $0x150] sm:$0xff]  }
 0x1e5   : > { %s704_s10 = sand.u32 1, %s703_s11  ;;  %s715_s30 = sshrl.u32 %s712_s2, 16  ;;  %v4955_v44 = vld [vmem:[#allocation11 + $0x140] sm:$0xff]   ;;  %v4956_v46 = vld [vmem:[#allocation11 + $0x148] sm:$0xff]   ;;  %v4946_v50 = vld [vmem:[#allocation9 + $0x54] ss:$8 sps:$4 sm:$0xff]  }
 0x1e6   : > { %s705_s13 = sadd.s32 32767, %s704_s10  ;;  %s716_s6 = sand.u32 1, %s715_s30  ;;  %834 = vmatpush1.bf16.msra.mxu1 %v4936_v33  ;;  %4567 = vmatprep.subr.bf16.mxu0 %v4955_v44  ;;  %v4948_v54 = vld [vmem:[#allocation9 + $0x50] ss:$8 sps:$4 sm:$0xff]   ;;  %v4949_v57 = vld [vmem:[#allocation9 + $0x64] ss:$8 sps:$4 sm:$0xff]  }
 0x1e7   : > { %s706_s20 = sadd.s32 %s705_s13, %s700_s9  ;;  %s717_s15 = sadd.s32 32767, %s716_s6  ;;  %835 = vmatprep.subr.bf16.mxu1 %v4937_v34  ;;  %4568 = vmatpush3.bf16.msra.mxu0 %v4955_v44  ;;  %v4958_v58 = vld [vmem:[#allocation11 + $0x158] sm:$0xff]   ;;  %v4951_v60 = vld [vmem:[#allocation9 + $0x60] ss:$8 sps:$4 sm:$0xff]   ;;  %vm894_vm0 = vcmask 1040384   ;;  %v4201_v34 = vpack.c.bf16 %v5731_v45, %v5731_v45  ;;  %vm1211_vm5 = vcmask 1043456  }
 0x1e8   : > { %s707_s19 = sand.u32 4294901760, %s706_s20  ;;  %s718_s16 = sadd.s32 %s717_s15, %s712_s2  ;;  %4569 = vmatprep.subr.bf16.mxu0 %v4956_v46  ;;  %v4952_v62 = vld [vmem:[#allocation9 + $0x74] ss:$8 sps:$4 sm:$0xff]   ;;  %v4959_v2 = vld [vmem:[#allocation11 + $0x160] sm:$0xff]   ;;  %v4954_v3 = vld [vmem:[#allocation9 + $0x70] ss:$8 sps:$4 sm:$0xff]  }
 0x1e9   : > { %s6637_s19 = smov (%p702_p10, %s707_s19), 2143289344  ;;  %p714_p8 = scmp.ne.f32.partialorder %s712_s2, %s712_s2  ;;  %v723_v5 = vld [vmem:[#allocation2] sm:$0xff]  ;;  %v729_v11 = vld [vmem:[#allocation3] sm:$0xff]  ;;  %vm895_vm1 = vsmask.f32 256  ;;  %v1063_v44 = vshrl.u32 %v4201_v34, 16 }
 0x1ea   : > { %s719_s4 = sand.u32 4294901760, %s718_s16  ;;  %s710_s3 = sshrl.u32 %s6637_s19, 16  ;;  %836 = vmatpush1.bf16.msra.mxu1 %v4939_v36  ;;  %vm5805_vm2 = vmand %vm894_vm0, %vm895_vm1  ;;  %v903_v19 = vld [vmem:[#allocation4 + $0x18] sm:$0x1]  ;;  %vm927_vm3 = vsmask.f32 7938  ;;  %v4202_v36 = vpack.c.bf16 %v5735_v48, %v5735_v48 }
 0x1eb   : > { %s6639_s4 = smov (%p714_p8, %s719_s4), 2143289344  ;;  %837 = vmatprep.subr.bf16.mxu1 %v4940_v38  ;;  %s724_s12 = sshll.u32 %s710_s3, 16  ;;  %4570 = vmatpush3.bf16.msra.mxu0 %v4956_v46  ;;  %v904_v21 = vsel %vm5805_vm2, 0, %v903_v19  ;;  %v906_v23 = vld [vmem:[#allocation4 + $0x24] sm:$0x1]  ;;  %vm5812_vm4 = vmand %vm894_vm0, %vm927_vm3  ;;  %v1065_v45 = vrot.slane %v1063_v44, 7 }
 0x1ec   : > { %s722_s8 = sshrl.u32 %s6639_s4, 16  ;;  %4571 = vmatprep.subr.bf16.mxu0 %v4957_v52  ;;  %s725_s2 = sor.u32 %s724_s12, %s710_s3  ;;  %905 = vst [vmem:[#allocation4 + $0x18] sm:$0x1] %v904_v21  ;;  %v907_v30 = vsel %vm5805_vm2, 0, %v906_v23  ;;  %v935_v33 = vld [vmem:[#allocation4 + $0x20] sm:$0x1]  ;;  %vm5831_vm7 = vmand %vm1211_vm5, %vm927_vm3 }
 0x1ed   : > { %s730_s9 = sshll.u32 %s722_s8, 16  ;;  %v726_v7 = vstv %s725_s2  ;;  %908 = vst [vmem:[#allocation4 + $0x24] sm:$0x1] %v907_v30  ;;  %v936_v38 = vsel %vm5812_vm4, 0, %v935_v33  ;;  %v1071_v46 = vshrl.u32 %v4202_v36, 16  ;;  %v1066_v48 = vshll.u32 %v4201_v34, 16 }
 0x1ee   : > { %838 = vmatpush1.bf16.msra.mxu1 %v4942_v41  ;;  %v728_v10 = vmul.bf16 %v726_v7, %v723_v5  ;;  %s731_s11 = sor.u32 %s730_s9, %s722_s8  ;;  %937 = vst [vmem:[#allocation4 + $0x20] sm:$0x1] %v936_v38  ;;  %vm1009_vm6 = vsmask.f32 4368  ;;  %v4960_v19 = vld [vmem:[#allocation11 + $0x100] sm:$0xff]   ;;  %v4204_v30 = vpack.c.bf16 %v5743_v56, %v5743_v56  ;;  %vm2347_vm10 = vcmask 1046528  }
 0x1ef   : > { %839 = vmatprep.subr.bf16.mxu1 %v4943_v42  ;;  %4572 = vmatpush3.bf16.msra.mxu0 %v4957_v52  ;;  %v732_v13 = vstv %s731_s11  ;;  %v1054_v42 = vshrl.u32 %v4200_v28, 16  ;;  %vm5836_vm8 = vmor %vm895_vm1, %vm1009_vm6  ;;  %v912_v33 = vld [vmem:[#allocation4 + $0x3c] sm:$0x1]  ;;  %vm1451_vm9 = vsmask.f32 7424  ;;  %v5018_v18 = vld [vmem:[#allocation11 + $0x1c8] sm:$0xff]  }
 0x1f0   : > { %4573 = vmatprep.subr.bf16.mxu0 %v4958_v58  ;;  %v734_v15 = vmul.bf16 %v732_v13, %v729_v11  ;;  %v1069_v11 = vrot.slane %v1065_v45, 4  ;;  %v1074_v13 = vshll.u32 %v4202_v36, 16  ;;  %v4961_v34 = vld [vmem:[#allocation11 + $0xc0] sm:$0xff]   ;;  %v918_v16 = vld [vmem:[#allocation4 + $0x54] sm:$0x1]  ;;  %s4263_s10 = sshll.u32 %s5353_s24, 4 }
 0x1f1   : > { %v1056_v52 = vrot.slane %v1054_v42, 7  ;;  %v941_v42 = vld [vmem:[#allocation4 + $0x38] sm:$0x1]  ;;  %s3757_s13 = sadd.s32 %s4263_s10, %s5692_s18  ;;  %s3760_s20 = sshll.u32 %s5783_s7, 4  ;;  %s6428_s20 = int_to_ptr.vmem [resolvable:$true] %s3760_s20 }
 0x1f2   : > { %840 = vmatpush1.bf16.msra.mxu1 %v4945_v49  ;;  %s4189_s30 = sshll.u32 %s3757_s13, 6  ;;  %s6612_s19 = sld [smem:[#allocation46_spill]] }
 0x1f3   : > { %841 = vmatprep.subr.bf16.mxu1 %v4946_v50  ;;  %4574 = vmatpush3.bf16.msra.mxu0 %v4958_v58  ;;  %v1227_v7 = vld [vmem:[#allocation4 + $0x18] sm:$0xf]  ;;  %v1061_v36 = vrot.slane %v1056_v52, 4  ;;  %s3726_s16 = scalar_lea.sflag [#allocation16], %s5652_s5  ;;  %s5227_s4 = scalar_lea.vmem %s6428_s20, 1024 }
 0x1f4   : > { %4575 = vmatprep.subr.bf16.mxu0 %v4959_v2  ;;  %p5228_p13 = scmp.ne.s32.totalorder %s6428_s20, %s5227_s4  ;;  %s5383_s3 = smov [#allocation15]  }
 0x1f5   : > { %s5231_s12 = sshll.u32 %s5383_s3, 4  ;;  %s5232_s12 = int_to_ptr.vmem [resolvable:$false] %s5231_s12 }
 0x1f6   : > { %842 = vmatpush1.bf16.msra.mxu1 %v4948_v54  ;;  %v1057_v54 = vshll.u32 %v4200_v28, 16  ;;  %v4203_v28 = vpack.c.bf16 %v5739_v53, %v5739_v53  ;;  %v942_v53 = vsel %vm5812_vm4, 0, %v941_v42  ;;  %p5229_p3 = pnand %p5228_p13, %p5584_p6  ;;  %s5233_s8 = scalar_lea.vmem %s5232_s12, 2048 }
 0x1f7   : > { %843 = vmatprep.subr.bf16.mxu1 %v4949_v57  ;;  %4576 = vmatpush3.bf16.msra.mxu0 %v4959_v2  ;;  %v1073_v2 = vrot.slane %v1071_v46, 7  ;;  %v1088_v46 = vshrl.u32 %v4204_v30, 16  ;;  %943 = vst [vmem:[#allocation4 + $0x38] sm:$0x1] %v942_v53  ;;  %v4967_v53 = vld [vmem:[#allocation11 + $0xd0] sm:$0xff]   ;;  %p5234_p12 = scmp.lt.s32.totalorder %s6428_s20, %s5232_s12  ;;  %p5235_p11 = scmp.lt.s32.totalorder %s5233_s8, %s5227_s4 }
 0x1f8   : > { %v1080_v56 = vshrl.u32 %v4203_v28, 16  ;;  %s6426_s15 = scalar_lea.hbm %s6612_s19, %s4189_s30  ;;  %p5230_p7 = pneg %p5229_p3 }
 0x1f9   : > { %v1076_v38 = vor.u32 %v1074_v13, %v1073_v2  ;;  %v1078_v44 = vrot.slane %v1073_v2, 4  ;;  %v1091_v13 = vshll.u32 %v4204_v30, 16  ;;  %p5236_p1 = por %p5235_p11, %p5234_p12 }
 0x1fa   : > { %844 = vmatpush1.bf16.msra.mxu1 %v4951_v60 }
 0x1fb   : > { %845 = vmatprep.subr.bf16.mxu1 %v4952_v62  ;;  %v1059_v62 = vor.u32 %v1057_v54, %v1056_v52  ;;  %v944_v54 = vld [vmem:[#allocation4 + $0x44] sm:$0x1]  ;;  %p5237_p5 = pnand %p5236_p1, %p5230_p7 }
 0x1fe   : > { %846 = vmatpush1.bf16.msra.mxu1 %v4954_v3  ;;  %v909_v3 = vld [vmem:[#allocation4 + $0x30] sm:$0x1] }
 0x1ff   : > { %4311 = vmatprep.subr.bf16.mxu1 %v4960_v19 }
 0x201   : > { %864 = vmatmul.mubr.bf16.vlgmr.msra.gmra.mrb[0].mxu1 %v728_v10  ;;  %v1068_v10 = vor.u32 %v1066_v48, %v1065_v45  ;;  %v4205_v45 = vpack.c.bf16 %v5747_v61, %v5747_v61  ;;  %v5864_v48 = vpack.c.bf16 %v5751_v1, %v5751_v1  ;;  %v1090_v61 = vrot.slane %v1088_v46, 7 }
 0x202   : > { %871 = vmatprep.mubr.bf16.mxu1 %v5379_v0  ;;  %v4199_v0 = vpack.c.bf16 %v5723_v37, %v5723_v37  ;;  %v938_v37 = vld [vmem:[#allocation4 + $0x2c] sm:$0x1]  ;;  %4312 = vmatpush3.bf16.msra.mxu1 %v4961_v34  ;;  %v945_v1 = vsel %vm5812_vm4, 0, %v944_v54  ;;  %v1245_v54 = vld [vmem:[#allocation4 + $0x38] sm:$0x1] }
 0x203   : > { %v939_v40 = vsel %vm5812_vm4, 0, %v938_v37  ;;  %v913_v37 = vsel %vm5805_vm2, 0, %v912_v33  ;;  %946 = vst [vmem:[#allocation4 + $0x44] sm:$0x1] %v945_v1  ;;  %v1093_v33 = vor.u32 %v1091_v13, %v1090_v61  ;;  %v1105_v30 = vshrl.u32 %v5864_v48, 16  ;;  %v4968_v1 = vld [vmem:[#allocation11 + $0x178] sm:$0xff]  }
 0x204   : > { %v1046_v41 = vshrl.u32 %v4199_v0, 16  ;;  %v1049_v50 = vshll.u32 %v4199_v0, 16  ;;  %940 = vst [vmem:[#allocation4 + $0x2c] sm:$0x1] %v939_v40  ;;  %v1234_v0 = vld [vmem:[#allocation4 + $0x24] sm:$0xf] }
 0x205   : > { %v1231_v40 = vld [vmem:[#allocation4 + $0x20] sm:$0x1]  ;;  %914 = vst [vmem:[#allocation4 + $0x3c] sm:$0x1] %v913_v37 }
 0x206   : > { %v1048_v49 = vrot.slane %v1046_v41, 7  ;;  %v1235_v41 = vsel %vm5831_vm7, %v1068_v10, %v1234_v0  ;;  %v1100_v0 = vshll.u32 %v4205_v45, 16 }
 0x207   : > { %1236 = vst [vmem:[#allocation4 + $0x24] sm:$0xf] %v1235_v41 }
 0x208   : > { %v1051_v58 = vor.u32 %v1049_v50, %v1048_v49  ;;  %v1052_v60 = vrot.slane %v1048_v49, 4  ;;  %v1232_v49 = vsel %vm5805_vm2, %v1061_v36, %v1231_v40  ;;  %v1077_v50 = vsel %vm5836_vm8, %v1069_v11, %v1076_v38  ;;  %v4964_v11 = vld [vmem:[#allocation11 + $0xc8] sm:$0xff]   ;;  %v4965_v36 = vld [vmem:[#allocation11 + $0x170] sm:$0xff]  }
 0x209   : > { %872 = vmatmul.mubr.bf16.gmra.mrb[4].mxu1 %v734_v15  ;;  %v910_v15 = vsel %vm5805_vm2, 0, %v909_v3  ;;  %1233 = vst [vmem:[#allocation4 + $0x20] sm:$0x1] %v1232_v49  ;;  %1237 = vst [vmem:[#allocation4 + $0x28] sm:$0xf] %v1077_v50  ;;  %v1082_v3 = vrot.slane %v1080_v56, 7 }
 0x20a   : > { %v1060_v21 = vsel %vm5836_vm8, %v1052_v60, %v1059_v62  ;;  %v1228_v23 = vsel %vm5831_vm7, %v1051_v58, %v1227_v7  ;;  %911 = vst [vmem:[#allocation4 + $0x30] sm:$0x1] %v910_v15  ;;  %v897_v58 = vld [vmem:[#allocation4] sm:$0x1]  ;;  %v1083_v7 = vshll.u32 %v4203_v28, 16  ;;  %v4966_v38 = vld [vmem:[#allocation11 + $0x110] sm:$0xff]  }
 0x20b   : > { %1229 = vst [vmem:[#allocation4 + $0x18] sm:$0xf] %v1228_v23  ;;  %1230 = vst [vmem:[#allocation4 + $0x1c] sm:$0xf] %v1060_v21  ;;  %v1238_v52 = vld [vmem:[#allocation4 + $0x2c] sm:$0x1] }
 0x20c   : > { %v4962_v60 = vld [vmem:[#allocation11 + $0x168] sm:$0xff]   ;;  %v1239_v2 = vsel %vm5805_vm2, %v1078_v44, %v1238_v52  ;;  %v898_v10 = vsel %vm5805_vm2, 0, %v897_v58  ;;  %v929_v15 = vld [vmem:[#allocation4 + $0x8] sm:$0x1]  ;;  %v1085_v19 = vor.u32 %v1083_v7, %v1082_v3  ;;  %v1086_v21 = vrot.slane %v1082_v3, 4 }
 0x20d   : > { %v4963_v62 = vld [vmem:[#allocation11 + $0x108] sm:$0xff]   ;;  %1240 = vst [vmem:[#allocation4 + $0x2c] sm:$0x1] %v1239_v2  ;;  %899 = vst [vmem:[#allocation4] sm:$0x1] %v898_v10  ;;  %4577 = vmatprep.subr.bf16.mxu0 %v4962_v60  ;;  %v1097_v23 = vshrl.u32 %v4205_v45, 16  ;;  %v5880_v44 = vpack.c.bf16 %v5715_v29, %v5715_v29 }
 0x20e   : > { %4313 = vmatprep.subr.bf16.mxu1 %v4963_v62  ;;  %v930_v28 = vsel %vm5812_vm4, 0, %v929_v15  ;;  %4578 = vmatpush3.bf16.msra.mxu0 %v4962_v60  ;;  %v1108_v40 = vshll.u32 %v5864_v48, 16  ;;  %v1289_v46 = vld [vmem:[#allocation4 + $0x24] sm:$0xf]  ;;  %v1094_v49 = vsel %vm5836_vm8, %v1086_v21, %v1093_v33  ;;  %v1095_v50 = vrot.slane %v1090_v61, 4  ;;  %v4969_v15 = vld [vmem:[#allocation11 + $0x118] sm:$0xff]  }
 0x20f   : > { %4314 = vmatpush3.bf16.msra.mxu1 %v4964_v11  ;;  %931 = vst [vmem:[#allocation4 + $0x8] sm:$0x1] %v930_v28  ;;  %v1099_v37 = vrot.slane %v1097_v23, 7  ;;  %4579 = vmatprep.subr.bf16.mxu0 %v4965_v36  ;;  %1244 = vst [vmem:[#allocation4 + $0x34] sm:$0xf] %v1094_v49  ;;  %v5889_v29 = vrot.slane %v1105_v30, 7 }
 0x210   : > { %4315 = vmatprep.subr.bf16.mxu1 %v4966_v38  ;;  %v1248_v58 = vld [vmem:[#allocation4 + $0x3c] sm:$0xf]  ;;  %v5891_v60 = vld [vmem:[#allocation4 + $0x20] ss:$0 sps:$4 sm:$0x11]   ;;  %v1246_v62 = vsel %vm5805_vm2, %v1095_v50, %v1245_v54  ;;  %v1029_v2 = vshrl.u32 %v5880_v44, 16 }
 0x211   : > { %v1241_v34 = vld [vmem:[#allocation4 + $0x30] sm:$0xf]  ;;  %v1102_v45 = vor.u32 %v1100_v0, %v1099_v37  ;;  %v1103_v48 = vrot.slane %v1099_v37, 4  ;;  %v924_v3 = vld [vmem:[#allocation4 + $0x6c] sm:$0x1]  ;;  %v1110_v11 = vor.u32 %v1108_v40, %v5889_v29  ;;  %v1484_v33 = vshll.u32 %v5891_v60, 16 }
 0x212   : > { %v1287_v41 = vld [vmem:[#allocation4 + $0x18] sm:$0xf]  ;;  %v1242_v42 = vsel %vm5831_vm7, %v1085_v19, %v1241_v34  ;;  %v5882_v56 = vld [vmem:[#allocation4 + $0x1c] sm:$0xf]  ;;  %4580 = vmatpush3.bf16.msra.mxu0 %v4965_v36  ;;  %v5897_v10 = vld [vmem:[#allocation4 + $0x28] sm:$0xf]  ;;  %v4198_v40 = vpack.c.bf16 %v5719_v32, %v5719_v32 }
 0x213   : > { %1243 = vst [vmem:[#allocation4 + $0x30] sm:$0xf] %v1242_v42  ;;  %v5887_v52 = vcombine.low %v1287_v41, %v5882_v56  ;;  %4316 = vmatpush3.bf16.msra.mxu1 %v4967_v53  ;;  %1247 = vst [vmem:[#allocation4 + $0x38] sm:$0x1] %v1246_v62  ;;  %v1249_v61 = vsel %vm5831_vm7, %v1102_v45, %v1248_v58  ;;  %v925_v13 = vsel %vm5805_vm2, 0, %v924_v3  ;;  %v4970_v0 = vld [vmem:[#allocation11 + $0xd8] sm:$0xff]   ;;  %4581 = vmatprep.subr.bf16.mxu0 %v4968_v1 }
 0x214   : > { %v5906_v21 = vcombine.low %v1289_v46, %v5897_v10  ;;  %1250 = vst [vmem:[#allocation4 + $0x3c] sm:$0xf] %v1249_v61  ;;  %926 = vst [vmem:[#allocation4 + $0x6c] sm:$0x1] %v925_v13  ;;  %v956_v23 = vld [vmem:[#allocation4 + $0x74] sm:$0x1]  ;;  %v1111_v34 = vsel %vm5836_vm8, %v1103_v48, %v1110_v11  ;;  %4317 = vmatprep.subr.bf16.mxu1 %v4969_v15 }
 0x215   : > { %v1479_v7 = vshll.u32 %v5887_v52, 16  ;;  %v1477_v19 = vshrl.u32 %v5887_v52, 16  ;;  %v5911_v30 = vrot.slane %v1029_v2, 7  ;;  %v957_v36 = vsel %vm5812_vm4, 0, %v956_v23  ;;  %1251 = vst [vmem:[#allocation4 + $0x40] sm:$0xf] %v1111_v34 }
 0x216   : > { %v1112_v38 = vrot.slane %v5889_v29, 4  ;;  %958 = vst [vmem:[#allocation4 + $0x74] sm:$0x1] %v957_v36  ;;  %4582 = vmatpush3.bf16.msra.mxu0 %v4968_v1  ;;  %v1486_v42 = vrot.slane %v1484_v33, 1  ;;  %v4973_v53 = vld [vmem:[#allocation11 + $0x40] sm:$0xff]   ;;  %v1489_v49 = vshrl.u32 %v5906_v21, 16  ;;  %v5937_v1 = vpack.c.bf16 %v5755_v6, %v5755_v6 }
 0x217   : > { %v1481_v28 = vrot.slane %v1479_v7, 1  ;;  %4318 = vmatpush3.bf16.msra.mxu1 %v4970_v0  ;;  %v5916_v37 = vld [vmem:[#allocation4 + $0x2c] ss:$0 sps:$4 sm:$0x11]   ;;  %v4974_v46 = vld [vmem:[#allocation11 + $0x120] sm:$0xff]   ;;  %v1491_v50 = vshll.u32 %v5906_v21, 16  ;;  %4391 = vmatprep.subr.bf16.mxu0 %v4973_v53  ;;  %v5950_v53 = vpack.c.bf16 %v5759_v9, %v5759_v9 }
 0x218   : > { %v1496_v48 = vshll.u32 %v5916_v37, 16  ;;  %v4978_v29 = vld [vmem:[#allocation11 + $0xe0] sm:$0xff]   ;;  %v5926_v58 = vld [vmem:[#allocation4 + $0x34] sm:$0xf]  ;;  %v1035_v62 = vrot.slane %v5911_v30, 4  ;;  %4319 = vmatprep.subr.bf16.mxu1 %v4974_v46  ;;  %v1037_v13 = vshrl.u32 %v4198_v40, 16  ;;  %v5954_v46 = vpack.c.bf16 %v5763_v14, %v5763_v14 }
 0x219   : > { %v1482_v41 = vor.u32 %v1481_v28, %v1477_v19  ;;  %v1493_v32 = vrot.slane %v1491_v50, 1  ;;  %v1252_v11 = vld [vmem:[#allocation4 + $0x44] sm:$0x1]  ;;  %v4977_v19 = vld [vmem:[#allocation11] sm:$0xff]   ;;  %v1213_v63 = vld [vmem:[#allocation4] sm:$0xf] }
 0x21a   : > { %v1291_v54 = vld [vmem:[#allocation4 + $0x30] sm:$0xf]  ;;  %v5933_v3 = vld [vmem:[#allocation4 + $0x38] ss:$0 sps:$4 sm:$0x11]   ;;  %v1498_v7 = vrot.slane %v1496_v48, 1  ;;  %v1253_v33 = vsel %vm5805_vm2, %v1112_v38, %v1252_v11 }
 0x21b   : > { %v5923_v45 = vsel %vm1451_vm9, %v1482_v41, %v1486_v42  ;;  %v5931_v2 = vcombine.low %v1291_v54, %v5926_v58  ;;  %v1293_v61 = vld [vmem:[#allocation4 + $0x3c] sm:$0xf]  ;;  %v1494_v15 = vor.u32 %v1493_v32, %v1489_v49  ;;  %4320 = vmatpush3.bf16.msra.mxu1 %v4978_v29  ;;  %v4980_v23 = vld [vmem:[#allocation11 + $0x128] sm:$0xff]   ;;  %v1508_v41 = vshll.u32 %v5933_v3, 16  ;;  %1254 = vst [vmem:[#allocation4 + $0x44] sm:$0x1] %v1253_v33 }
 0x21c   : > { %4583 = vmatprep.mubr.bf16.mxu0 %v5923_v45  ;;  %v4979_v34 = vld [vmem:[#allocation11 + $0x48] sm:$0xff]   ;;  %v5946_v6 = vrot.slane %v1037_v13, 7  ;;  %4321 = vmatprep.subr.bf16.mxu1 %v4980_v23  ;;  %v900_v54 = vld [vmem:[#allocation4 + $0xc] sm:$0x1]  ;;  %v932_v48 = vld [vmem:[#allocation4 + $0x14] sm:$0x1] }
 0x21d   : > { %v1501_v0 = vshrl.u32 %v5931_v2, 16  ;;  %v1503_v28 = vshll.u32 %v5931_v2, 16  ;;  %v4982_v36 = vld [vmem:[#allocation11 + $0xe8] sm:$0xff]   ;;  %v5957_v49 = vsel %vm1451_vm9, %v1494_v15, %v1498_v7  ;;  %v1040_v29 = vshll.u32 %v4198_v40, 16  ;;  %v4985_v33 = vld [vmem:[#allocation11 + $0x50] sm:$0xff]  }
 0x21e   : > { %v5944_v42 = vld [vmem:[#allocation4 + $0x40] sm:$0xf]  ;;  %4584 = vmatmul.mubr.bf16.vlgmr.msra.gmra.mrb[32].mxu0 %v5957_v49  ;;  %v1510_v32 = vrot.slane %v1508_v41, 1  ;;  %v901_v9 = vsel %vm5805_vm2, 0, %v900_v54  ;;  %v933_v14 = vsel %vm5812_vm4, 0, %v932_v48  ;;  %v1032_v7 = vshll.u32 %v5880_v44, 16 }
 0x21f   : > { %v1505_v38 = vrot.slane %v1503_v28, 1  ;;  %v5960_v50 = vcombine.low %v1293_v61, %v5944_v42  ;;  %4392 = vmatpush3.bf16.msra.mxu0 %v4977_v19  ;;  %v4981_v11 = vld [vmem:[#allocation11 + $0x8] sm:$0xff]   ;;  %4322 = vmatpush3.bf16.msra.mxu1 %v4982_v36  ;;  %v4986_v61 = vld [vmem:[#allocation11 + $0x130] sm:$0xff]   ;;  %902 = vst [vmem:[#allocation4 + $0xc] sm:$0x1] %v901_v9  ;;  %v1042_v40 = vor.u32 %v1040_v29, %v5946_v6  ;;  %v1044_v23 = vrot.slane %v5946_v6, 4 }
 0x220   : > { %934 = vst [vmem:[#allocation4 + $0x14] sm:$0x1] %v933_v14  ;;  %v915_v28 = vld [vmem:[#allocation4 + $0x48] sm:$0x1]  ;;  %4393 = vmatprep.subr.bf16.mxu0 %v4979_v34  ;;  %v1114_v19 = vshrl.u32 %v5937_v1, 16  ;;  %4323 = vmatprep.subr.bf16.mxu1 %v4986_v61  ;;  %v4992_v6 = vld [vmem:[#allocation11 + $0x138] sm:$0xff]  }
 0x221   : > { %v1506_v13 = vor.u32 %v1505_v38, %v1501_v0  ;;  %v1515_v15 = vshll.u32 %v5960_v50, 16  ;;  %v1513_v41 = vshrl.u32 %v5960_v50, 16  ;;  %v4990_v54 = vld [vmem:[#allocation11 + $0xf0] sm:$0xff]   ;;  %v916_v44 = vsel %vm5805_vm2, 0, %v915_v28  ;;  %v4991_v9 = vld [vmem:[#allocation11 + $0x58] sm:$0xff]  }
 0x222   : > { %v1117_v0 = vshll.u32 %v5937_v1, 16  ;;  %v4989_v48 = vld [vmem:[#allocation11 + $0x10] sm:$0xff]   ;;  %v1043_v34 = vsel %vm5836_vm8, %v1035_v62, %v1042_v40  ;;  %917 = vst [vmem:[#allocation4 + $0x48] sm:$0x1] %v916_v44  ;;  %v1122_v29 = vshrl.u32 %v5950_v53, 16  ;;  %v4994_v14 = vld [vmem:[#allocation11 + $0xf8] sm:$0xff]   ;;  %v1034_v62 = vor.u32 %v1032_v7, %v5911_v30 }
 0x223   : > { %v5977_v36 = vsel %vm1451_vm9, %v1506_v13, %v1510_v32  ;;  %v1517_v38 = vrot.slane %v1515_v15, 1  ;;  %1223 = vst [vmem:[#allocation4 + $0x10] sm:$0xf] %v1043_v34  ;;  %v947_v1 = vld [vmem:[#allocation4 + $0x50] sm:$0x1]  ;;  %v1116_v32 = vrot.slane %v1114_v19, 7  ;;  %4394 = vmatpush3.bf16.msra.mxu0 %v4981_v11  ;;  %4324 = vmatpush3.bf16.msra.mxu1 %v4990_v54  ;;  %v4210_v28 = vpack.c.bf16 %v5767_v17, %v5767_v17 }
 0x224   : > { %4587 = vmatprep.mubr.bf16.mxu0 %v5977_v36  ;;  %v1125_v13 = vshll.u32 %v5950_v53, 16  ;;  %v1131_v61 = vshrl.u32 %v5954_v46, 16  ;;  %v5987_v15 = vld [vmem:[#allocation4 + $0x44] ss:$0 sps:$4 sm:$0x11]   ;;  %v948_v40 = vsel %vm5812_vm4, 0, %v947_v1  ;;  %4395 = vmatprep.subr.bf16.mxu0 %v4985_v33 }
 0x225   : > { %v1518_v44 = vor.u32 %v1517_v38, %v1513_v41  ;;  %4325 = vmatprep.subr.bf16.mxu1 %v4992_v6  ;;  %949 = vst [vmem:[#allocation4 + $0x50] sm:$0x1] %v948_v40  ;;  %v1119_v19 = vor.u32 %v1117_v0, %v1116_v32  ;;  %v1120_v53 = vrot.slane %v1116_v32, 4  ;;  %v1124_v34 = vrot.slane %v1122_v29, 7  ;;  %v950_v11 = vld [vmem:[#allocation4 + $0x5c] sm:$0x1] }
 0x226   : > { %v1520_v24 = vshll.u32 %v5987_v15, 16  ;;  %v919_v30 = vsel %vm5805_vm2, 0, %v918_v16  ;;  %v951_v7 = vsel %vm5812_vm4, 0, %v950_v11  ;;  %v1133_v54 = vrot.slane %v1131_v61, 7  ;;  %v921_v1 = vld [vmem:[#allocation4 + $0x60] sm:$0x1] }
 0x227   : > { %v1220_v17 = vld [vmem:[#allocation4 + $0xc] sm:$0xf]  ;;  %v1224_v33 = vld [vmem:[#allocation4 + $0x14] sm:$0x1]  ;;  %v1127_v41 = vor.u32 %v1125_v13, %v1124_v34  ;;  %920 = vst [vmem:[#allocation4 + $0x54] sm:$0x1] %v919_v30  ;;  %v4211_v38 = vpack.c.bf16 %v5771_v22, %v5771_v22  ;;  %v4212_v6 = vpack.c.bf16 %v5775_v25, %v5775_v25  ;;  %4396 = vmatpush3.bf16.msra.mxu0 %v4989_v48 }
 0x228   : > { %952 = vst [vmem:[#allocation4 + $0x5c] sm:$0x1] %v951_v7  ;;  %v1134_v0 = vshll.u32 %v5954_v46, 16  ;;  %v1522_v29 = vrot.slane %v1520_v24, 1  ;;  %v4993_v16 = vld [vmem:[#allocation11 + $0x18] sm:$0xff]   ;;  %4326 = vmatpush3.bf16.msra.mxu1 %v4994_v14  ;;  %v1221_v32 = vsel %vm5831_vm7, %v1034_v62, %v1220_v17  ;;  %v1225_v13 = vsel %vm5805_vm2, %v1044_v23, %v1224_v33  ;;  %4397 = vmatprep.subr.bf16.mxu0 %v4991_v9  ;;  %v4999_v25 = vld [vmem:[#allocation11 + $0x60] sm:$0xff]  }
 0x229   : > { %v1129_v61 = vrot.slane %v1124_v34, 4  ;;  %v953_v40 = vld [vmem:[#allocation4 + $0x68] sm:$0x1]  ;;  %1222 = vst [vmem:[#allocation4 + $0xc] sm:$0xf] %v1221_v32  ;;  %v1128_v22 = vsel %vm5836_vm8, %v1120_v53, %v1127_v41  ;;  %v1137_v24 = vrot.slane %v1133_v54, 4 }
 0x22a   : > { %1226 = vst [vmem:[#allocation4 + $0x14] sm:$0x1] %v1225_v13  ;;  %v1255_v46 = vld [vmem:[#allocation4 + $0x48] sm:$0xf]  ;;  %v1139_v48 = vshrl.u32 %v4210_v28, 16  ;;  %v1142_v11 = vshll.u32 %v4210_v28, 16  ;;  %v6011_v14 = vsel %vm1451_vm9, %v1518_v44, %v1522_v29  ;;  %v1136_v53 = vor.u32 %v1134_v0, %v1133_v54 }
 0x22b   : > { %v1256_v62 = vsel %vm5831_vm7, %v1119_v19, %v1255_v46  ;;  %1258 = vst [vmem:[#allocation4 + $0x4c] sm:$0xf] %v1128_v22  ;;  %v922_v23 = vsel %vm5805_vm2, 0, %v921_v1  ;;  %v954_v9 = vsel %vm5812_vm4, 0, %v953_v40  ;;  %4588 = vmatmul.mubr.bf16.gmra.mrb[36].mxu0 %v6011_v14  ;;  %v1148_v28 = vshrl.u32 %v4211_v38, 16  ;;  %v5004_v7 = vld [vmem:[#allocation11 + $0x20] sm:$0xff]  }
 0x22c   : > { %1257 = vst [vmem:[#allocation4 + $0x48] sm:$0xf] %v1256_v62  ;;  %v1141_v34 = vrot.slane %v1139_v48, 7  ;;  %923 = vst [vmem:[#allocation4 + $0x60] sm:$0x1] %v922_v23  ;;  %v1156_v44 = vshrl.u32 %v4212_v6, 16  ;;  %4398 = vmatpush3.bf16.msra.mxu0 %v4993_v16 }
 0x22d   : > { %955 = vst [vmem:[#allocation4 + $0x68] sm:$0x1] %v954_v9  ;;  %v1259_v30 = vld [vmem:[#allocation4 + $0x50] sm:$0x1]  ;;  %v1151_v19 = vshll.u32 %v4211_v38, 16  ;;  %v1159_v17 = vshll.u32 %v4212_v6, 16  ;;  %4399 = vmatprep.subr.bf16.mxu0 %v4999_v25 }
 0x22e   : > { %v6020_v33 = vld [vmem:[#allocation4 + $0x10] sm:$0xf]  ;;  %v1260_v26 = vsel %vm5805_vm2, %v1129_v61, %v1259_v30  ;;  %v1144_v1 = vor.u32 %v1142_v11, %v1141_v34  ;;  %v1146_v41 = vrot.slane %v1141_v34, 4  ;;  %v5005_v29 = vld [vmem:[#allocation11 + $0x68] sm:$0xff]   ;;  %v1150_v54 = vrot.slane %v1148_v28, 7  ;;  %v5009_v23 = vld [vmem:[#allocation11 + $0x70] sm:$0xff]  }
 0x22f   : > { %1261 = vst [vmem:[#allocation4 + $0x50] sm:$0x1] %v1260_v26  ;;  %v1262_v0 = vld [vmem:[#allocation4 + $0x54] sm:$0xf]  ;;  %v1266_v32 = vld [vmem:[#allocation4 + $0x5c] sm:$0x1] }
 0x230   : > { %v1158_v13 = vrot.slane %v1156_v44, 7  ;;  %v1145_v16 = vsel %vm5836_vm8, %v1137_v24, %v1144_v1  ;;  %v1263_v38 = vsel %vm5831_vm7, %v1136_v53, %v1262_v0  ;;  %v1267_v6 = vsel %vm5805_vm2, %v1146_v41, %v1266_v32  ;;  %v5006_v40 = vld [vmem:[#allocation11 + $0x28] sm:$0xff]   ;;  %v1285_v61 = vld [vmem:[#allocation4 + $0xc] sm:$0xf]  ;;  %4400 = vmatpush3.bf16.msra.mxu0 %v5004_v7  ;;  %v5013_v41 = vld [vmem:[#allocation11 + $0x78] sm:$0xff]  }
 0x231   : > { %1264 = vst [vmem:[#allocation4 + $0x54] sm:$0xf] %v1263_v38  ;;  %1265 = vst [vmem:[#allocation4 + $0x58] sm:$0xf] %v1145_v16  ;;  %v1153_v22 = vor.u32 %v1151_v19, %v1150_v54  ;;  %v1154_v46 = vrot.slane %v1150_v54, 4  ;;  %v6031_v11 = vcombine.low %v1285_v61, %v6020_v33  ;;  %4401 = vmatprep.subr.bf16.mxu0 %v5005_v29  ;;  %v5012_v1 = vld [vmem:[#allocation11 + $0x30] sm:$0xff]  }
 0x232   : > { %1268 = vst [vmem:[#allocation4 + $0x5c] sm:$0x1] %v1267_v6  ;;  %v1161_v25 = vor.u32 %v1159_v17, %v1158_v13  ;;  %v1163_v48 = vrot.slane %v1158_v13, 4  ;;  %v6033_v24 = vld [vmem:[#allocation4 + $0x14] ss:$0 sps:$4 sm:$0x11]  }
 0x233   : > { %v6035_v62 = vld [vmem:[#allocation4 + $0x4c] sm:$0xf]  ;;  %v1295_v9 = vld [vmem:[#allocation4 + $0x48] sm:$0xf]  ;;  %v1269_v34 = vld [vmem:[#allocation4 + $0x60] sm:$0xf] }
 0x234   : > { %v1162_v53 = vsel %vm5836_vm8, %v1154_v46, %v1161_v25  ;;  %v1273_v28 = vld [vmem:[#allocation4 + $0x68] sm:$0x1]  ;;  %v1465_v44 = vshrl.u32 %v6031_v11, 16  ;;  %v1467_v30 = vshll.u32 %v6031_v11, 16  ;;  %v1472_v7 = vshll.u32 %v6033_v24, 16  ;;  %4402 = vmatpush3.bf16.msra.mxu0 %v5006_v40  ;;  %v5015_v29 = vld [vmem:[#allocation11 + $0x1c0] sm:$0xff]  }
 0x235   : > { %v6043_v19 = vcombine.low %v1295_v9, %v6035_v62  ;;  %1272 = vst [vmem:[#allocation4 + $0x64] sm:$0xf] %v1162_v53  ;;  %v1270_v17 = vsel %vm5831_vm7, %v1153_v22, %v1269_v34  ;;  %v1274_v26 = vsel %vm5805_vm2, %v1163_v48, %v1273_v28  ;;  %4403 = vmatprep.subr.bf16.mxu0 %v5009_v23  ;;  %v5014_v22 = vld [vmem:[#allocation11 + $0x38] sm:$0xff]   ;;  %v6064_v53 = vld [vmem:[#allocation11 + $0x80] sm:$0xff]   ;;  %v1217_v4 = vld [vmem:[#allocation4 + $0x8] sm:$0x1] }
 0x236   : > { %v1469_v54 = vrot.slane %v1467_v30, 1  ;;  %v1474_v0 = vrot.slane %v1472_v7, 1  ;;  %1271 = vst [vmem:[#allocation4 + $0x60] sm:$0xf] %v1270_v17  ;;  %1275 = vst [vmem:[#allocation4 + $0x68] sm:$0x1] %v1274_v26  ;;  %4471 = vmatprep.subr.bf16.mxu1 %v5015_v29 }
 0x237   : > { %v1525_v32 = vshrl.u32 %v6043_v19, 16  ;;  %v1527_v13 = vshll.u32 %v6043_v19, 16  ;;  %v6051_v16 = vld [vmem:[#allocation4 + $0x50] ss:$0 sps:$4 sm:$0x11]  }
 0x238   : > { %v1470_v38 = vor.u32 %v1469_v54, %v1465_v44  ;;  %v1297_v40 = vld [vmem:[#allocation4 + $0x54] sm:$0xf]  ;;  %v6053_v61 = vld [vmem:[#allocation4 + $0x58] sm:$0xf]  ;;  %v1532_v46 = vshll.u32 %v6051_v16, 16  ;;  %4404 = vmatpush3.bf16.msra.mxu0 %v5012_v1 }
 0x239   : > { %v1529_v6 = vrot.slane %v1527_v13, 1  ;;  %v6057_v25 = vcombine.low %v1297_v40, %v6053_v61  ;;  %v6059_v48 = vld [vmem:[#allocation4 + $0x5c] ss:$0 sps:$4 sm:$0x11]   ;;  %4405 = vmatprep.subr.bf16.mxu0 %v5013_v41 }
 0x23a   : > { %v6062_v9 = vsel %vm1451_vm9, %v1470_v38, %v1474_v0  ;;  %v1534_v34 = vrot.slane %v1532_v46, 1  ;;  %v1544_v30 = vshll.u32 %v6059_v48, 16 }
 0x23b   : > { %v1530_v23 = vor.u32 %v1529_v6, %v1525_v32  ;;  %1807 = vmatprep.mubr.bf16.mxu1 %v6062_v9  ;;  %v1537_v28 = vshrl.u32 %v6057_v25, 16  ;;  %v1539_v44 = vshll.u32 %v6057_v25, 16 }
 0x23c   : > { %v6070_v7 = vld [vmem:[#allocation4 + $0x64] sm:$0xf]  ;;  %v1546_v1 = vrot.slane %v1544_v30, 1  ;;  %4406 = vmatpush3.bf16.msra.mxu0 %v5014_v22 }
 0x23d   : > { %v6073_v17 = vsel %vm1451_vm9, %v1530_v23, %v1534_v34  ;;  %v1541_v26 = vrot.slane %v1539_v44, 1  ;;  %v1299_v29 = vld [vmem:[#allocation4 + $0x60] sm:$0xf]  ;;  %v6079_v54 = vld [vmem:[#allocation4 + $0x68] ss:$0 sps:$4 sm:$0x11]   ;;  %4599 = vmatprep.subr.bf16.mxu0 %v6064_v53 }
 0x23e   : > { %4591 = vmatprep.mubr.bf16.mxu0 %v6073_v17  ;;  %v6077_v41 = vcombine.low %v1299_v29, %v6070_v7  ;;  %v1556_v38 = vshll.u32 %v6079_v54, 16  ;;  %v2308_v34 = vld [vmem:[#allocation4 + $0xc] sm:$0xe]  ;;  %v2352_v44 = vrot.slane %v6033_v24, 1 }
 0x23f   : > { %v1542_v0 = vor.u32 %v1541_v26, %v1537_v28  ;;  %v4092_v28 = vcombine.low %v2308_v34, %v6020_v33 }
 0x240   : > { %v1549_v32 = vshrl.u32 %v6077_v41, 16  ;;  %v1551_v13 = vshll.u32 %v6077_v41, 16  ;;  %v1558_v22 = vrot.slane %v1556_v38, 1 }
 0x241   : > { %v6086_v6 = vsel %vm1451_vm9, %v1542_v0, %v1546_v1  ;;  %v2351_v30 = vrot.slane %v4092_v28, 1 }
 0x242   : > { %4592 = vmatmul.mubr.bf16.gmra.mrb[40].mxu0 %v6086_v6  ;;  %v1553_v40 = vrot.slane %v1551_v13, 1 }
 0x243   : > { %v6096_v26 = vsel %vm2347_vm10, %v2351_v30, %v2352_v44 }
 0x244   : > { %v1554_v46 = vor.u32 %v1553_v40, %v1549_v32 }
 0x246   : > { %v6090_v23 = vsel %vm1451_vm9, %v1554_v46, %v1558_v22 }
 0x247   : > { %4595 = vmatprep.mubr.bf16.mxu0 %v6090_v23 }
 0x2d4   : > { %v865_v1 = vpop.f32.mrb[0].mxu1 }
 0x2d5   : > { %vm880_vm11 = vcmp.gt.f32.partialorder %v865_v1, 0.0  ;;  %v884_v29 = vmul.f32 0.2, %v865_v1  ;;  %v867_v0 = vpop.f32.mrb[1].mxu1 }
 0x2d6   : > { %v868_v32 = vpop.f32.mrb[2].mxu1 }
 0x2d7   : > { %v888_v13 = vsel %vm880_vm11, %v865_v1, %v884_v29  ;;  %vm881_vm12 = vcmp.gt.f32.partialorder %v868_v32, 0.0  ;;  %v885_v38 = vmul.f32 0.2, %v868_v32  ;;  %v870_v40 = vpop.f32.mrb[3].mxu1 }
 0x2d8   : > { %v4195_v22 = vpack.c.bf16 %v888_v13, %v888_v13 }
 0x2d9   : > { %v889_v46 = vsel %vm881_vm12, %v868_v32, %v885_v38 }
 0x2da   : > { %v1012_v12 = vshrl.u32 %v4195_v22, 16  ;;  %v4196_v33 = vpack.c.bf16 %v889_v46, %v889_v46  ;;  %v1015_v24 = vshll.u32 %v4195_v22, 16 }
 0x2dc   : > { %v1014_v34 = vrot.slane %v1012_v12, 7  ;;  %v1020_v28 = vshrl.u32 %v4196_v33, 16  ;;  %v873_v20 = vpop.f32.mrb[4].mxu1  ;;  %v1023_v0 = vshll.u32 %v4196_v33, 16 }
 0x2dd   : > { %vm882_vm13 = vcmp.gt.f32.partialorder %v873_v20, 0.0  ;;  %v886_v44 = vmul.f32 0.2, %v873_v20  ;;  %v875_v30 = vpop.f32.mrb[5].mxu1 }
 0x2de   : > { %v1017_v8 = vor.u32 %v1015_v24, %v1014_v34  ;;  %v1022_v59 = vrot.slane %v1020_v28, 7  ;;  %v876_v1 = vpop.f32.mrb[6].mxu1  ;;  %v1018_v29 = vrot.slane %v1014_v34, 4  ;;  %v1276_v30 = vld [vmem:[#allocation4 + $0x6c] sm:$0xf] }
 0x2df   : > { %v890_v47 = vsel %vm882_vm13, %v873_v20, %v886_v44  ;;  %vm883_vm14 = vcmp.gt.f32.partialorder %v876_v1, 0.0  ;;  %v887_v13 = vmul.f32 0.2, %v876_v1  ;;  %v878_v32 = vpop.f32.mrb[7].mxu1 }
 0x2e0   : > { %v1214_v12 = vsel %vm5831_vm7, %v1017_v8, %v1213_v63  ;;  %v1025_v38 = vor.u32 %v1023_v0, %v1022_v59  ;;  %v1027_v40 = vrot.slane %v1022_v59, 4  ;;  %v4213_v22 = vpack.c.bf16 %v890_v47, %v890_v47  ;;  %v1280_v0 = vld [vmem:[#allocation4 + $0x74] sm:$0x1] }
 0x2e1   : > { %1215 = vst [vmem:[#allocation4] sm:$0xf] %v1214_v12  ;;  %v891_v46 = vsel %vm883_vm14, %v876_v1, %v887_v13 }
 0x2e2   : > { %v1026_v24 = vsel %vm5836_vm8, %v1018_v29, %v1025_v38  ;;  %v1218_v33 = vsel %vm5805_vm2, %v1027_v40, %v1217_v4  ;;  %v1165_v28 = vshrl.u32 %v4213_v22, 16  ;;  %v4214_v20 = vpack.c.bf16 %v891_v46, %v891_v46 }
 0x2e3   : > { %1216 = vst [vmem:[#allocation4 + $0x4] sm:$0xf] %v1026_v24  ;;  %1219 = vst [vmem:[#allocation4 + $0x8] sm:$0x1] %v1218_v33  ;;  %v1168_v44 = vshll.u32 %v4213_v22, 16 }
 0x2e4   : > { %v1167_v34 = vrot.slane %v1165_v28, 7  ;;  %v1173_v32 = vshrl.u32 %v4214_v20, 16  ;;  %v1176_v59 = vshll.u32 %v4214_v20, 16 }
 0x2e6   : > { %v1170_v63 = vor.u32 %v1168_v44, %v1167_v34  ;;  %v1175_v8 = vrot.slane %v1173_v32, 7  ;;  %v1171_v1 = vrot.slane %v1167_v34, 4 }
 0x2e8   : > { %v1277_v47 = vsel %vm5831_vm7, %v1170_v63, %v1276_v30  ;;  %v1178_v29 = vor.u32 %v1176_v59, %v1175_v8  ;;  %v1180_v13 = vrot.slane %v1175_v8, 4  ;;  %v1283_v4 = vld [vmem:[#allocation4] sm:$0xf]  ;;  %v5016_v8 = vld [vmem:[#allocation11 + $0x180] sm:$0xff]  }
 0x2e9   : > { %1278 = vst [vmem:[#allocation4 + $0x6c] sm:$0xf] %v1277_v47  ;;  %v2307_v38 = vld [vmem:[#allocation4] sm:$0xe] }
 0x2ea   : > { %v1284_v12 = vld [vmem:[#allocation4 + $0x4] sm:$0xf]  ;;  %v1179_v40 = vsel %vm5836_vm8, %v1171_v1, %v1178_v29  ;;  %v1281_v22 = vsel %vm5805_vm2, %v1180_v13, %v1280_v0  ;;  %v5001_v24 = vld [vmem:[#allocation4 + $0x8] ss:$0 sps:$4 sm:$0x11]  }
 0x2eb   : > { %v4023_v46 = vcombine.low %v1283_v4, %v1284_v12  ;;  %v4091_v33 = vcombine.low %v2307_v38, %v1284_v12  ;;  %1279 = vst [vmem:[#allocation4 + $0x70] sm:$0xf] %v1179_v40  ;;  %1282 = vst [vmem:[#allocation4 + $0x74] sm:$0x1] %v1281_v22  ;;  %v1460_v28 = vshll.u32 %v5001_v24, 16  ;;  %v2349_v34 = vrot.slane %v5001_v24, 1 }
 0x2ec   : > { %v5019_v12 = vld [vmem:[#allocation11 + $0x188] sm:$0xff]   ;;  %v5021_v22 = vld [vmem:[#allocation11 + $0x1d0] sm:$0xff]  }
 0x2ed   : > { %v1455_v57 = vshll.u32 %v4023_v46, 16  ;;  %v2348_v20 = vrot.slane %v4091_v33, 1  ;;  %v1453_v44 = vshrl.u32 %v4023_v46, 16  ;;  %v1462_v5 = vrot.slane %v1460_v28, 1 }
 0x2ef   : > { %v1457_v30 = vrot.slane %v1455_v57, 1  ;;  %v6111_v32 = vsel %vm2347_vm10, %v2348_v20, %v2349_v34 }
 0x2f0   : > { %v1301_v59 = vld [vmem:[#allocation4 + $0x6c] sm:$0xf] }
 0x2f1   : > { %v1458_v63 = vor.u32 %v1457_v30, %v1453_v44  ;;  %v2316_v1 = vld [vmem:[#allocation4 + $0x6c] sm:$0xe] }
 0x2f2   : > { %v1302_v0 = vld [vmem:[#allocation4 + $0x70] sm:$0xf]  ;;  %v5011_v13 = vld [vmem:[#allocation4 + $0x74] ss:$0 sps:$4 sm:$0x11]   ;;  %v5022_v30 = vld [vmem:[#allocation11 + $0x190] sm:$0xff]  }
 0x2f3   : > { %v1463_v47 = vsel %vm1451_vm9, %v1458_v63, %v1462_v5  ;;  %v6114_v29 = vcombine.low %v1301_v59, %v1302_v0  ;;  %v4100_v4 = vcombine.low %v2316_v1, %v1302_v0  ;;  %v1568_v40 = vshll.u32 %v5011_v13, 16  ;;  %v5024_v63 = vld [vmem:[#allocation11 + $0x1d8] sm:$0xff]   ;;  %v5027_v59 = vld [vmem:[#allocation11 + $0x1e0] sm:$0xff]   ;;  %v5030_v0 = vld [vmem:[#allocation11 + $0x1e8] sm:$0xff]  }
 0x2f4   : > { %1808 = vmatmul.mubr.bf16.vlgmr.msra.gmra.mrb[8].mxu1 %v1463_v47  ;;  %v2376_v33 = vrot.slane %v5011_v13, 1  ;;  %v5028_v47 = vld [vmem:[#allocation11 + $0x1a0] sm:$0xff]   ;;  %v5031_v1 = vld [vmem:[#allocation11 + $0x1a8] sm:$0xff]   ;;  %v5033_v13 = vld [vmem:[#allocation11 + $0x1f0] sm:$0xff]  }
 0x2f5   : > { %1815 = vmatprep.mubr.bf16.mxu1 %v5923_v45  ;;  %4472 = vmatpush3.bf16.msra.mxu1 %v5016_v8  ;;  %v1563_v38 = vshll.u32 %v6114_v29, 16  ;;  %v2375_v24 = vrot.slane %v4100_v4, 1  ;;  %v1561_v57 = vshrl.u32 %v6114_v29, 16  ;;  %v1570_v44 = vrot.slane %v1568_v40, 1  ;;  %v5025_v8 = vld [vmem:[#allocation11 + $0x198] sm:$0xff]  }
 0x2f6   : > { %4473 = vmatprep.subr.bf16.mxu1 %v5018_v18  ;;  %v5020_v18 = vld [vmem:[#allocation11 + $0x88] sm:$0xff]   ;;  %v5026_v4 = vld [vmem:[#allocation11 + $0x98] sm:$0xff]  }
 0x2f7   : > { %v1565_v28 = vrot.slane %v1563_v38, 1  ;;  %v6120_v20 = vsel %vm2347_vm10, %v2375_v24, %v2376_v33  ;;  %v5032_v38 = vld [vmem:[#allocation11 + $0xa8] sm:$0xff]  }
 0x2f8   : > { %v2310_v24 = vld [vmem:[#allocation4 + $0x24] sm:$0xe] }
 0x2f9   : > { %4474 = vmatpush3.bf16.msra.mxu1 %v5019_v12  ;;  %v1566_v34 = vor.u32 %v1565_v28, %v1561_v57  ;;  %v5034_v12 = vld [vmem:[#allocation11 + $0x1b0] sm:$0xff]   ;;  %v2311_v57 = vld [vmem:[#allocation4 + $0x30] sm:$0xe] }
 0x2fa   : > { %4475 = vmatprep.subr.bf16.mxu1 %v5021_v22  ;;  %v4095_v28 = vcombine.low %v2311_v57, %v5926_v58 }
 0x2fb   : > { %v1571_v5 = vsel %vm1451_vm9, %v1566_v34, %v1570_v44  ;;  %v2312_v34 = vld [vmem:[#allocation4 + $0x3c] sm:$0xe] }
 0x2fc   : > { %1816 = vmatmul.mubr.bf16.gmra.mrb[12].mxu1 %v6062_v9  ;;  %4596 = vmatmul.mubr.bf16.gmra.mrb[44].mxu0 %v1571_v5  ;;  %v5023_v9 = vld [vmem:[#allocation11 + $0x90] sm:$0xff]   ;;  %v4096_v44 = vcombine.low %v2312_v34, %v5944_v42  ;;  %v5047_v5 = vld [vmem:[#allocation11 + $0x218] sm:$0xff]  }
 0x2fd   : > { %1823 = vmatprep.mubr.bf16.mxu1 %v5957_v49  ;;  %2145 = vmatprep.mubr.bf16.mxu0 %v6031_v11 }
 0x2fe   : > { %4476 = vmatpush3.bf16.msra.mxu1 %v5022_v30  ;;  %v5044_v30 = vld [vmem:[#allocation11 + $0x208] sm:$0xff]   ;;  %v2363_v58 = vrot.slane %v4096_v44, 1 }
 0x2ff   : > { %4477 = vmatprep.subr.bf16.mxu1 %v5024_v63 }
 0x302   : > { %4478 = vmatpush3.bf16.msra.mxu1 %v5025_v8  ;;  %v2314_v8 = vld [vmem:[#allocation4 + $0x54] sm:$0xe] }
 0x303   : > { %4479 = vmatprep.subr.bf16.mxu1 %v5027_v59 }
 0x304   : > { %1824 = vmatmul.mubr.bf16.gmra.mrb[16].mxu1 %v5923_v45  ;;  %2146 = vmatmul.mubr.bf16.vlgmr.msra.gmra.mrb[48].mxu0 %v4023_v46  ;;  %v5035_v45 = vld [vmem:[#allocation11 + $0x1f8] sm:$0xff]  }
 0x305   : > { %1831 = vmatprep.mubr.bf16.mxu1 %v5977_v36  ;;  %4600 = vmatpush3.bf16.msra.mxu0 %v6064_v53  ;;  %v5029_v53 = vld [vmem:[#allocation11 + $0xa0] sm:$0xff]   ;;  %v5036_v46 = vld [vmem:[#allocation11 + $0x1b8] sm:$0xff]  }
 0x306   : > { %2153 = vmatprep.mubr.bf16.mxu0 %v5887_v52  ;;  %4601 = vmatprep.subr.bf16.mxu0 %v5020_v18 }
 0x307   : > { %4480 = vmatpush3.bf16.msra.mxu1 %v5028_v47  ;;  %v2315_v47 = vld [vmem:[#allocation4 + $0x60] sm:$0xe] }
 0x308   : > { %4481 = vmatprep.subr.bf16.mxu1 %v5030_v0 }
 0x309   : > { %4602 = vmatpush3.bf16.msra.mxu0 %v5020_v18  ;;  %v5050_v18 = vld [vmem:[#allocation11 + $0x228] sm:$0xff]  }
 0x30a   : > { %4603 = vmatprep.subr.bf16.mxu0 %v5023_v9 }
 0x30b   : > { %4482 = vmatpush3.bf16.msra.mxu1 %v5031_v1  ;;  %v5060_v1 = vld [vmem:[#allocation12 + $0x18] sm:$0xff]  }
 0x30c   : > { %1832 = vmatmul.mubr.bf16.gmra.mrb[20].mxu1 %v5957_v49  ;;  %4483 = vmatprep.subr.bf16.mxu1 %v5033_v13  ;;  %v5037_v49 = vld [vmem:[#allocation11 + $0xb0] sm:$0xff]   ;;  %v5061_v13 = vld [vmem:[#allocation12 + $0x20] sm:$0xff]  }
 0x30d   : > { %2154 = vmatmul.mubr.bf16.gmra.mrb[52].mxu0 %v6031_v11  ;;  %1839 = vmatprep.mubr.bf16.mxu1 %v6011_v14  ;;  %v5040_v11 = vld [vmem:[#allocation11 + $0xb8] sm:$0xff]  }
 0x30e   : > { %2161 = vmatprep.mubr.bf16.mxu0 %v5906_v21  ;;  %4604 = vmatpush3.bf16.msra.mxu0 %v5023_v9  ;;  %v5053_v9 = vld [vmem:[#allocation11 + $0x238] sm:$0xff]  }
 0x30f   : > { %4605 = vmatprep.subr.bf16.mxu0 %v5026_v4  ;;  %4484 = vmatpush3.bf16.msra.mxu1 %v5034_v12  ;;  %v5063_v12 = vld [vmem:[#allocation12 + $0x30] sm:$0xff]  }
 0x310   : > { %4485 = vmatprep.subr.bf16.mxu1 %v5035_v45 }
 0x312   : > { %4606 = vmatpush3.bf16.msra.mxu0 %v5026_v4  ;;  %v5062_v4 = vld [vmem:[#allocation12 + $0x28] sm:$0xff]  }
 0x313   : > { %4607 = vmatprep.subr.bf16.mxu0 %v5029_v53  ;;  %4486 = vmatpush3.bf16.msra.mxu1 %v5036_v46 }
 0x314   : > { %1840 = vmatmul.mubr.bf16.gmra.mrb[24].mxu1 %v5977_v36  ;;  %v5043_v36 = vld [vmem:[#allocation11 + $0x200] sm:$0xff]  }
 0x315   : > { %2162 = vmatmul.mubr.bf16.gmra.mrb[56].mxu0 %v5887_v52  ;;  %1847 = vmatprep.mubr.bf16.mxu1 %v6073_v17 }
 0x316   : > { %2169 = vmatprep.mubr.bf16.mxu0 %v5931_v2  ;;  %4608 = vmatpush3.bf16.msra.mxu0 %v5029_v53 }
 0x317   : > { %4609 = vmatprep.subr.bf16.mxu0 %v5032_v38 }
 0x31a   : > { %4610 = vmatpush3.bf16.msra.mxu0 %v5032_v38 }
 0x31b   : > { %4611 = vmatprep.subr.bf16.mxu0 %v5037_v49 }
 0x31c   : > { %1848 = vmatmul.mubr.bf16.gmra.mrb[28].mxu1 %v6011_v14  ;;  %v2309_v14 = vld [vmem:[#allocation4 + $0x18] sm:$0xe] }
 0x31d   : > { %2170 = vmatmul.mubr.bf16.gmra.mrb[60].mxu0 %v5906_v21  ;;  %1855 = vmatprep.mubr.bf16.mxu1 %v6086_v6  ;;  %v4093_v40 = vcombine.low %v2309_v14, %v5882_v56 }
 0x31e   : > { %2177 = vmatprep.mubr.bf16.mxu0 %v5960_v50  ;;  %4612 = vmatpush3.bf16.msra.mxu0 %v5037_v49 }
 0x31f   : > { %4613 = vmatprep.subr.bf16.mxu0 %v5040_v11  ;;  %v2354_v22 = vrot.slane %v4093_v40, 1 }
 0x322   : > { %4614 = vmatpush3.bf16.msra.mxu0 %v5040_v11 }
 0x323   : > { %4631 = vmatprep.subr.bf16.mxu0 %v5043_v36 }
 0x324   : > { %1856 = vmatmul.mubr.bf16.gmra.mrb[32].mxu1 %v6073_v17  ;;  %v2355_v17 = vrot.slane %v5891_v60, 1 }
 0x325   : > { %2178 = vmatmul.mubr.bf16.gmra.mrb[64].mxu0 %v5931_v2  ;;  %1863 = vmatprep.mubr.bf16.mxu1 %v6090_v23  ;;  %v4094_v23 = vcombine.low %v2310_v24, %v5897_v10  ;;  %v2360_v10 = vrot.slane %v4095_v28, 1 }
 0x326   : > { %2185 = vmatprep.mubr.bf16.mxu0 %v6043_v19  ;;  %v6153_v33 = vsel %vm2347_vm10, %v2354_v22, %v2355_v17 }
 0x327   : > { %v2357_v56 = vrot.slane %v4094_v23, 1 }
 0x32c   : > { %1864 = vmatmul.mubr.bf16.gmra.mrb[36].mxu1 %v6086_v6  ;;  %v2358_v6 = vrot.slane %v5916_v37, 1 }
 0x32d   : > { %2186 = vmatmul.mubr.bf16.gmra.mrb[68].mxu0 %v5960_v50  ;;  %2613 = vmatprep.mubr.bf16.mxu1 %v6096_v26 }
 0x32e   : > { %2193 = vmatprep.mubr.bf16.mxu0 %v6057_v25  ;;  %v6162_v60 = vsel %vm2347_vm10, %v2357_v56, %v2358_v6 }
 0x334   : > { %2614 = vmatmul.mubr.bf16.vlgmr.msra.gmra.mrb[40].mxu1 %v6111_v32  ;;  %v2361_v32 = vrot.slane %v5933_v3, 1  ;;  %v2313_v3 = vld [vmem:[#allocation4 + $0x48] sm:$0xe] }
 0x335   : > { %2194 = vmatmul.mubr.bf16.gmra.mrb[72].mxu0 %v6043_v19  ;;  %2621 = vmatprep.mubr.bf16.mxu1 %v6153_v33  ;;  %v4097_v42 = vcombine.low %v2313_v3, %v6035_v62  ;;  %v4098_v62 = vcombine.low %v2314_v8, %v6053_v61  ;;  %v4099_v61 = vcombine.low %v2315_v47, %v6070_v7  ;;  %v5057_v7 = vld [vmem:[#allocation12] sm:$0xff]  }
 0x336   : > { %2201 = vmatprep.mubr.bf16.mxu0 %v6077_v41  ;;  %v2362_v37 = vsel %vm2347_vm10, %v2360_v10, %v2361_v32  ;;  %4663 = vmatprep.subr.bf16.mxu1 %v5057_v7 }
 0x337   : > { %4664 = vmatpush3.bf16.msra.mxu1 %v5057_v7 }
 0x33c   : > { %2622 = vmatmul.mubr.bf16.gmra.mrb[44].mxu1 %v6096_v26  ;;  %v5046_v26 = vld [vmem:[#allocation11 + $0x210] sm:$0xff]  }
 0x33d   : > { %2202 = vmatmul.mubr.bf16.gmra.mrb[76].mxu0 %v6057_v25  ;;  %2629 = vmatprep.mubr.bf16.mxu1 %v6162_v60 }
 0x33e   : > { %4615 = vmatprep.mubr.bf16.mxu0 %v5887_v52  ;;  %v2364_v52 = vrot.slane %v5987_v15, 1  ;;  %v5049_v15 = vld [vmem:[#allocation11 + $0x220] sm:$0xff]  }
 0x340   : > { %v2365_v63 = vsel %vm2347_vm10, %v2363_v58, %v2364_v52 }
 0x344   : > { %2630 = vmatmul.mubr.bf16.gmra.mrb[48].mxu1 %v6153_v33 }
 0x345   : > { %4616 = vmatmul.mubr.bf16.vlgmr.msra.gmra.mrb[32].mxu0 %v5906_v21  ;;  %2637 = vmatprep.mubr.bf16.mxu1 %v2362_v37  ;;  %v2366_v21 = vrot.slane %v4097_v42, 1 }
 0x346   : > { %4632 = vmatpush3.bf16.msra.mxu0 %v5043_v36  ;;  %4619 = vmatprep.mubr.bf16.mxu0 %v5931_v2  ;;  %v2367_v2 = vrot.slane %v6051_v16, 1  ;;  %v5052_v16 = vld [vmem:[#allocation11 + $0x230] sm:$0xff]  }
 0x347   : > { %4633 = vmatprep.subr.bf16.mxu0 %v5044_v30 }
 0x348   : > { %v2368_v59 = vsel %vm2347_vm10, %v2366_v21, %v2367_v2 }
 0x34a   : > { %4634 = vmatpush3.bf16.msra.mxu0 %v5044_v30 }
 0x34b   : > { %4635 = vmatprep.subr.bf16.mxu0 %v5046_v26 }
 0x34c   : > { %2638 = vmatmul.mubr.bf16.gmra.mrb[52].mxu1 %v6162_v60 }
 0x34d   : > { %4620 = vmatmul.mubr.bf16.gmra.mrb[36].mxu0 %v5960_v50  ;;  %2645 = vmatprep.mubr.bf16.mxu1 %v2365_v63  ;;  %v2369_v50 = vrot.slane %v4098_v62, 1 }
 0x34e   : > { %4636 = vmatpush3.bf16.msra.mxu0 %v5046_v26  ;;  %4623 = vmatprep.mubr.bf16.mxu0 %v6043_v19  ;;  %v2370_v19 = vrot.slane %v6059_v48, 1  ;;  %v2373_v48 = vrot.slane %v6079_v54, 1  ;;  %v5058_v54 = vld [vmem:[#allocation12 + $0x8] sm:$0xff]  }
 0x34f   : > { %4637 = vmatprep.subr.bf16.mxu0 %v5047_v5  ;;  %4665 = vmatprep.subr.bf16.mxu1 %v5058_v54 }
 0x350   : > { %v2371_v0 = vsel %vm2347_vm10, %v2369_v50, %v2370_v19  ;;  %4666 = vmatpush3.bf16.msra.mxu1 %v5058_v54 }
 0x352   : > { %4638 = vmatpush3.bf16.msra.mxu0 %v5047_v5 }
 0x353   : > { %4639 = vmatprep.subr.bf16.mxu0 %v5049_v15 }
 0x354   : > { %2646 = vmatmul.mubr.bf16.gmra.mrb[56].mxu1 %v2362_v37 }
 0x355   : > { %4624 = vmatmul.mubr.bf16.gmra.mrb[40].mxu0 %v6057_v25  ;;  %2653 = vmatprep.mubr.bf16.mxu1 %v2368_v59  ;;  %v2372_v25 = vrot.slane %v4099_v61, 1 }
 0x356   : > { %4640 = vmatpush3.bf16.msra.mxu0 %v5049_v15  ;;  %4627 = vmatprep.mubr.bf16.mxu0 %v6077_v41 }
 0x357   : > { %4641 = vmatprep.subr.bf16.mxu0 %v5050_v18  ;;  %v2374_v41 = vsel %vm2347_vm10, %v2372_v25, %v2373_v48 }
 0x35a   : > { %4642 = vmatpush3.bf16.msra.mxu0 %v5050_v18 }
 0x35b   : > { %4643 = vmatprep.subr.bf16.mxu0 %v5052_v16 }
 0x35c   : > { %2654 = vmatmul.mubr.bf16.gmra.mrb[60].mxu1 %v2365_v63 }
 0x35d   : > { %4628 = vmatmul.mubr.bf16.gmra.mrb[44].mxu0 %v6114_v29  ;;  %2661 = vmatprep.mubr.bf16.mxu1 %v2371_v0  ;;  %v5059_v29 = vld [vmem:[#allocation12 + $0x10] sm:$0xff]  }
 0x35e   : > { %4644 = vmatpush3.bf16.msra.mxu0 %v5052_v16  ;;  %4647 = vmatprep.mubr.bf16.mxu0 %v6153_v33 }
 0x35f   : > { %4645 = vmatprep.subr.bf16.mxu0 %v5053_v9  ;;  %4667 = vmatprep.subr.bf16.mxu1 %v5059_v29 }
 0x360   : > { %4668 = vmatpush3.bf16.msra.mxu1 %v5059_v29 }
 0x361   : > { %4669 = vmatprep.subr.bf16.mxu1 %v5060_v1 }
 0x362   : > { %4646 = vmatpush3.bf16.msra.mxu0 %v5053_v9 }
 0x364   : > { %2662 = vmatmul.mubr.bf16.gmra.mrb[64].mxu1 %v2368_v59 }
 0x365   : > { %4648 = vmatmul.mubr.bf16.vlgmr.msra.gmra.mrb[32].mxu0 %v6162_v60  ;;  %2669 = vmatprep.mubr.bf16.mxu1 %v2374_v41 }
 0x366   : > { %4651 = vmatprep.mubr.bf16.mxu0 %v2362_v37  ;;  %4670 = vmatpush3.bf16.msra.mxu1 %v5060_v1 }
 0x367   : > { %4671 = vmatprep.subr.bf16.mxu1 %v5061_v13 }
 0x36a   : > { %4672 = vmatpush3.bf16.msra.mxu1 %v5061_v13 }
 0x36b   : > { %4673 = vmatprep.subr.bf16.mxu1 %v5062_v4 }
 0x36c   : > { %2670 = vmatmul.mubr.bf16.gmra.mrb[68].mxu1 %v2371_v0 }
 0x36d   : > { %4652 = vmatmul.mubr.bf16.gmra.mrb[36].mxu0 %v2365_v63 }
 0x36e   : > { %4655 = vmatprep.mubr.bf16.mxu0 %v2368_v59  ;;  %4674 = vmatpush3.bf16.msra.mxu1 %v5062_v4 }
 0x36f   : > { %4675 = vmatprep.subr.bf16.mxu1 %v5063_v12 }
 0x372   : > { %4676 = vmatpush3.bf16.msra.mxu1 %v5063_v12 }
 0x375   : > { %4656 = vmatmul.mubr.bf16.gmra.mrb[40].mxu0 %v2371_v0 }
 0x376   : > { %4659 = vmatprep.mubr.bf16.mxu0 %v2374_v41 }
 0x37d   : > { %4660 = vmatmul.mubr.bf16.gmra.mrb[44].mxu0 %v6120_v20  ;;  %v5064_v20 = vld [vmem:[#allocation12 + $0x38] sm:$0xff]  }
 0x37e   : > { %4677 = vmatprep.subr.bf16.mxu1 %v5064_v20 }
 0x37f   : > { %4678 = vmatpush3.bf16.msra.mxu1 %v5064_v20 }
 0x3c7   : > { %v4327_v45 = vpop.f32.mrb[8].mxu1 }
 0x3c8   : > { %v4328_v53 = vpop.f32.mrb[9].mxu1 }
 0x3c9   : > { %v4329_v46 = vadd.f32 %v4328_v53, %v4327_v45  ;;  %v4330_v38 = vpop.f32.mrb[10].mxu1 }
 0x3ca   : > { %v4331_v49 = vpop.f32.mrb[11].mxu1 }
 0x3cb   : > { %v4332_v11 = vadd.f32 %v4331_v49, %v4330_v38 }
 0x3cf   : > { %v4333_v36 = vpop.f32.mrb[12].mxu1 }
 0x3d0   : > { %v4334_v14 = vpop.f32.mrb[13].mxu1 }
 0x3d1   : > { %v4335_v40 = vadd.f32 %v4334_v14, %v4333_v36  ;;  %v4336_v22 = vpop.f32.mrb[14].mxu1 }
 0x3d2   : > { %v4337_v17 = vpop.f32.mrb[15].mxu1 }
 0x3d3   : > { %v4338_v24 = vadd.f32 %v4337_v17, %v4336_v22 }
 0x3d7   : > { %v4339_v33 = vpop.f32.mrb[16].mxu1  ;;  %v4407_v23 = vpop.f32.mrb[48].mxu0 }
 0x3d8   : > { %v4340_v56 = vpop.f32.mrb[17].mxu1  ;;  %v4408_v6 = vpop.f32.mrb[49].mxu0 }
 0x3d9   : > { %v4341_v57 = vadd.f32 %v4340_v56, %v4339_v33  ;;  %v4342_v60 = vpop.f32.mrb[18].mxu1  ;;  %v4409_v28 = vadd.f32 %v4408_v6, %v4407_v23  ;;  %v4410_v10 = vpop.f32.mrb[50].mxu0 }
 0x3da   : > { %v4343_v32 = vpop.f32.mrb[19].mxu1  ;;  %v4411_v34 = vpop.f32.mrb[51].mxu0 }
 0x3db   : > { %v4344_v37 = vadd.f32 %v4343_v32, %v4342_v60  ;;  %v6195_v44 = vadd.f32 %v4409_v28, %v4329_v46  ;;  %v4412_v30 = vadd.f32 %v4411_v34, %v4410_v10 }
 0x3dd   : > { %v6197_v58 = vadd.f32 %v4412_v30, %v4332_v11 }
 0x3df   : > { %v4345_v52 = vpop.f32.mrb[20].mxu1 }
 0x3e0   : > { %v4413_v26 = vpop.f32.mrb[52].mxu0  ;;  %v4346_v3 = vpop.f32.mrb[21].mxu1 }
 0x3e1   : > { %v4414_v63 = vpop.f32.mrb[53].mxu0  ;;  %v4347_v42 = vadd.f32 %v4346_v3, %v4345_v52  ;;  %v4348_v5 = vpop.f32.mrb[22].mxu1 }
 0x3e2   : > { %v4415_v21 = vadd.f32 %v4414_v63, %v4413_v26  ;;  %v4416_v2 = vpop.f32.mrb[54].mxu0  ;;  %v4349_v15 = vpop.f32.mrb[23].mxu1 }
 0x3e3   : > { %v4417_v8 = vpop.f32.mrb[55].mxu0  ;;  %v4350_v59 = vadd.f32 %v4349_v15, %v4348_v5 }
 0x3e4   : > { %v6199_v62 = vadd.f32 %v4415_v21, %v4335_v40  ;;  %v4418_v18 = vadd.f32 %v4417_v8, %v4416_v2 }
 0x3e6   : > { %v6201_v50 = vadd.f32 %v4418_v18, %v4338_v24 }
 0x3e7   : > { %v4351_v19 = vpop.f32.mrb[24].mxu1 }
 0x3e8   : > { %v4419_v16 = vpop.f32.mrb[56].mxu0  ;;  %v4352_v47 = vpop.f32.mrb[25].mxu1 }
 0x3e9   : > { %v4420_v0 = vpop.f32.mrb[57].mxu0  ;;  %v4353_v61 = vadd.f32 %v4352_v47, %v4351_v19  ;;  %v4354_v9 = vpop.f32.mrb[26].mxu1 }
 0x3ea   : > { %v4421_v25 = vadd.f32 %v4420_v0, %v4419_v16  ;;  %v4422_v48 = vpop.f32.mrb[58].mxu0  ;;  %v4355_v41 = vpop.f32.mrb[27].mxu1 }
 0x3eb   : > { %v4423_v7 = vpop.f32.mrb[59].mxu0  ;;  %v4356_v54 = vadd.f32 %v4355_v41, %v4354_v9 }
 0x3ec   : > { %v6203_v29 = vadd.f32 %v4421_v25, %v4341_v57  ;;  %v4424_v1 = vadd.f32 %v4423_v7, %v4422_v48 }
 0x3ee   : > { %v6205_v13 = vadd.f32 %v4424_v1, %v4344_v37 }
 0x3ef   : > { %v4357_v4 = vpop.f32.mrb[28].mxu1 }
 0x3f0   : > { %v4425_v12 = vpop.f32.mrb[60].mxu0  ;;  %v4358_v20 = vpop.f32.mrb[29].mxu1 }
 0x3f1   : > { %v4426_v45 = vpop.f32.mrb[61].mxu0  ;;  %v4359_v53 = vadd.f32 %v4358_v20, %v4357_v4  ;;  %v4360_v46 = vpop.f32.mrb[30].mxu1 }
 0x3f2   : > { %v4427_v38 = vadd.f32 %v4426_v45, %v4425_v12  ;;  %v4428_v49 = vpop.f32.mrb[62].mxu0  ;;  %v4361_v11 = vpop.f32.mrb[31].mxu1 }
 0x3f3   : > { %v4429_v36 = vpop.f32.mrb[63].mxu0  ;;  %v4362_v14 = vadd.f32 %v4361_v11, %v4360_v46 }
 0x3f4   : > { %v6207_v40 = vadd.f32 %v4427_v38, %v4347_v42  ;;  %v4430_v22 = vadd.f32 %v4429_v36, %v4428_v49 }
 0x3f6   : > { %v6209_v17 = vadd.f32 %v4430_v22, %v4350_v59 }
 0x3f7   : > { %v4363_v24 = vpop.f32.mrb[32].mxu1 }
 0x3f8   : > { %v4431_v33 = vpop.f32.mrb[64].mxu0  ;;  %v4364_v23 = vpop.f32.mrb[33].mxu1 }
 0x3f9   : > { %v4432_v56 = vpop.f32.mrb[65].mxu0  ;;  %v4365_v6 = vadd.f32 %v4364_v23, %v4363_v24  ;;  %v4366_v57 = vpop.f32.mrb[34].mxu1 }
 0x3fa   : > { %v4433_v60 = vadd.f32 %v4432_v56, %v4431_v33  ;;  %v4434_v28 = vpop.f32.mrb[66].mxu0  ;;  %v4367_v10 = vpop.f32.mrb[35].mxu1 }
 0x3fb   : > { %v4435_v32 = vpop.f32.mrb[67].mxu0  ;;  %v4368_v34 = vadd.f32 %v4367_v10, %v4366_v57 }
 0x3fc   : > { %v6211_v37 = vadd.f32 %v4433_v60, %v4353_v61  ;;  %v4436_v30 = vadd.f32 %v4435_v32, %v4434_v28 }
 0x3fe   : > { %v6213_v52 = vadd.f32 %v4436_v30, %v4356_v54 }
 0x3ff   : > { %v4369_v26 = vpop.f32.mrb[36].mxu1 }
 0x400   : > { %v4437_v3 = vpop.f32.mrb[68].mxu0  ;;  %v4370_v63 = vpop.f32.mrb[37].mxu1 }
 0x401   : > { %v4438_v42 = vpop.f32.mrb[69].mxu0  ;;  %v4371_v5 = vadd.f32 %v4370_v63, %v4369_v26  ;;  %v4372_v21 = vpop.f32.mrb[38].mxu1 }
 0x402   : > { %v4439_v2 = vadd.f32 %v4438_v42, %v4437_v3  ;;  %v4440_v15 = vpop.f32.mrb[70].mxu0  ;;  %v4373_v8 = vpop.f32.mrb[39].mxu1 }
 0x403   : > { %v4441_v59 = vpop.f32.mrb[71].mxu0  ;;  %v4374_v18 = vadd.f32 %v4373_v8, %v4372_v21 }
 0x404   : > { %v6215_v19 = vadd.f32 %v4439_v2, %v4359_v53  ;;  %v4442_v16 = vadd.f32 %v4441_v59, %v4440_v15 }
 0x406   : > { %v6217_v47 = vadd.f32 %v4442_v16, %v4362_v14 }
 0x407   : > { %v4487_v0 = vpop.f32.mrb[40].mxu1 }
 0x408   : > { %v4443_v61 = vpop.f32.mrb[72].mxu0  ;;  %v4488_v9 = vpop.f32.mrb[41].mxu1 }
 0x409   : > { %v4444_v25 = vpop.f32.mrb[73].mxu0  ;;  %v4489_v48 = vadd.f32 %v4488_v9, %v4487_v0  ;;  %v4490_v41 = vpop.f32.mrb[42].mxu1 }
 0x40a   : > { %v4445_v7 = vadd.f32 %v4444_v25, %v4443_v61  ;;  %v4446_v54 = vpop.f32.mrb[74].mxu0  ;;  %v4491_v1 = vpop.f32.mrb[43].mxu1 }
 0x40b   : > { %v4447_v4 = vpop.f32.mrb[75].mxu0  ;;  %v4492_v12 = vadd.f32 %v4491_v1, %v4490_v41  ;;  %v4699_v20 = vadd.f32 %v6195_v44, %v4489_v48 }
 0x40c   : > { %v6220_v45 = vadd.f32 %v4445_v7, %v4365_v6  ;;  %v4448_v53 = vadd.f32 %v4447_v4, %v4446_v54 }
 0x40d   : > { %v6223_v46 = vadd.f32 %v6197_v58, %v4492_v12 }
 0x40e   : > { %v6225_v38 = vadd.f32 %v4448_v53, %v4368_v34 }
 0x40f   : > { %v4493_v49 = vpop.f32.mrb[44].mxu1 }
 0x410   : > { %v4449_v11 = vpop.f32.mrb[76].mxu0  ;;  %v4494_v36 = vpop.f32.mrb[45].mxu1 }
 0x411   : > { %v4450_v14 = vpop.f32.mrb[77].mxu0  ;;  %v4495_v22 = vadd.f32 %v4494_v36, %v4493_v49  ;;  %v4496_v24 = vpop.f32.mrb[46].mxu1 }
 0x412   : > { %v4451_v33 = vadd.f32 %v4450_v14, %v4449_v11  ;;  %v4452_v23 = vpop.f32.mrb[78].mxu0  ;;  %v4497_v56 = vpop.f32.mrb[47].mxu1 }
 0x413   : > { %v4453_v57 = vpop.f32.mrb[79].mxu0  ;;  %v4498_v60 = vadd.f32 %v4497_v56, %v4496_v24  ;;  %v4696_v44 = vadd.f32 %v6199_v62, %v4495_v22 }
 0x414   : > { %v6228_v6 = vadd.f32 %v4451_v33, %v4371_v5  ;;  %v4454_v28 = vadd.f32 %v4453_v57, %v4452_v23 }
 0x415   : > { %v4702_v58 = vadd.f32 %v6201_v50, %v4498_v60 }
 0x416   : > { %v6231_v10 = vadd.f32 %v4454_v28, %v4374_v18 }
 0x417   : > { %v4499_v32 = vpop.f32.mrb[48].mxu1 }
 0x418   : > { %v4500_v34 = vpop.f32.mrb[49].mxu1 }
 0x419   : > { %v4501_v30 = vadd.f32 %v4500_v34, %v4499_v32  ;;  %v4502_v26 = vpop.f32.mrb[50].mxu1 }
 0x41a   : > { %v4503_v3 = vpop.f32.mrb[51].mxu1 }
 0x41b   : > { %v4504_v63 = vadd.f32 %v4503_v3, %v4502_v26  ;;  %v6234_v42 = vadd.f32 %v6203_v29, %v4501_v30 }
 0x41d   : > { %v6237_v21 = vadd.f32 %v6205_v13, %v4504_v63 }
 0x41f   : > { %v4505_v62 = vpop.f32.mrb[52].mxu1 }
 0x420   : > { %v4506_v5 = vpop.f32.mrb[53].mxu1 }
 0x421   : > { %v4507_v2 = vadd.f32 %v4506_v5, %v4505_v62  ;;  %v4508_v15 = vpop.f32.mrb[54].mxu1 }
 0x422   : > { %v4509_v8 = vpop.f32.mrb[55].mxu1 }
 0x423   : > { %v4510_v50 = vadd.f32 %v4509_v8, %v4508_v15  ;;  %v4708_v59 = vadd.f32 %v6207_v40, %v4507_v2 }
 0x425   : > { %v4714_v18 = vadd.f32 %v6209_v17, %v4510_v50 }
 0x427   : > { %v4511_v16 = vpop.f32.mrb[56].mxu1 }
 0x428   : > { %v4512_v0 = vpop.f32.mrb[57].mxu1 }
 0x429   : > { %v4513_v61 = vadd.f32 %v4512_v0, %v4511_v16  ;;  %v4514_v9 = vpop.f32.mrb[58].mxu1 }
 0x42a   : > { %v4515_v25 = vpop.f32.mrb[59].mxu1 }
 0x42b   : > { %v4516_v29 = vadd.f32 %v4515_v25, %v4514_v9  ;;  %v6242_v48 = vadd.f32 %v6211_v37, %v4513_v61 }
 0x42d   : > { %v6245_v13 = vadd.f32 %v6213_v52, %v4516_v29 }
 0x42f   : > { %v4517_v41 = vpop.f32.mrb[60].mxu1 }
 0x430   : > { %v4518_v7 = vpop.f32.mrb[61].mxu1 }
 0x431   : > { %v4519_v54 = vadd.f32 %v4518_v7, %v4517_v41  ;;  %v4520_v1 = vpop.f32.mrb[62].mxu1 }
 0x432   : > { %v4521_v4 = vpop.f32.mrb[63].mxu1 }
 0x433   : > { %v4522_v40 = vadd.f32 %v4521_v4, %v4520_v1  ;;  %v6248_v17 = vadd.f32 %v6215_v19, %v4519_v54 }
 0x435   : > { %v6251_v12 = vadd.f32 %v6217_v47, %v4522_v40 }
 0x437   : > { %v4523_v53 = vpop.f32.mrb[64].mxu1 }
 0x438   : > { %v4649_v49 = vpop.f32.mrb[32].mxu0  ;;  %v4524_v11 = vpop.f32.mrb[65].mxu1 }
 0x439   : > { %v4697_v37 = vadd.f32 %v4696_v44, %v4649_v49  ;;  %v4525_v36 = vadd.f32 %v4524_v11, %v4523_v53  ;;  %v2712_v14 = vpop.f32.mrb[33].mxu0  ;;  %v4526_v52 = vpop.f32.mrb[66].mxu1 }
 0x43a   : > { %v4700_v22 = vadd.f32 %v4699_v20, %v2712_v14  ;;  %v4650_v24 = vpop.f32.mrb[34].mxu0  ;;  %v4527_v33 = vpop.f32.mrb[67].mxu1 }
 0x43b   : > { %v2809_v23 = vmul.f32 0.2, %v4697_v37  ;;  %v4703_v56 = vadd.f32 %v4702_v58, %v4650_v24  ;;  %v4528_v57 = vadd.f32 %v4527_v33, %v4526_v52  ;;  %v2715_v60 = vpop.f32.mrb[35].mxu0  ;;  %vm2793_vm15 = vcmp.gt.f32.partialorder %v4697_v37, 0.0 }
 0x43c   : > { %v2807_v19 = vmul.f32 0.2, %v4700_v22  ;;  %v4706_v28 = vadd.f32 %v6223_v46, %v2715_v60  ;;  %v6255_v47 = vadd.f32 %v6220_v45, %v4525_v36  ;;  %vm2791_vm0 = vcmp.gt.f32.partialorder %v4700_v22, 0.0 }
 0x43d   : > { %vm2794_vm1 = vcmp.gt.f32.partialorder %v4703_v56, 0.0  ;;  %v2810_v44 = vmul.f32 0.2, %v4703_v56  ;;  %v6258_v32 = vadd.f32 %v6225_v38, %v4528_v57  ;;  %v2825_v34 = vsel %vm2793_vm15, %v4697_v37, %v2809_v23 }
 0x43e   : > { %vm2792_vm2 = vcmp.gt.f32.partialorder %v4706_v28, 0.0  ;;  %v2808_v20 = vmul.f32 0.2, %v4706_v28  ;;  %v2823_v62 = vsel %vm2791_vm0, %v4700_v22, %v2807_v19  ;;  %vm3288_vm15 = vcmask 1041408  }
 0x43f   : > { %v2826_v30 = vsel %vm2794_vm1, %v4703_v56, %v2810_v44  ;;  %v4529_v58 = vpop.f32.mrb[68].mxu1  ;;  %vm3673_vm0 = vcmask 1041409   ;;  %vm3675_vm1 = vcmask 1042434  }
 0x440   : > { %v2840_v26 = vpack.c.bf16 %v2826_v30, %v2825_v34  ;;  %v4653_v3 = vpop.f32.mrb[36].mxu0  ;;  %v4530_v63 = vpop.f32.mrb[69].mxu1  ;;  %v2824_v5 = vsel %vm2792_vm2, %v4706_v28, %v2808_v20  ;;  %vm3677_vm2 = vcmask 1043459  }
 0x441   : > { %v4709_v46 = vadd.f32 %v4708_v59, %v4653_v3  ;;  %v4531_v2 = vadd.f32 %v4530_v63, %v4529_v58  ;;  %v2728_v45 = vpop.f32.mrb[37].mxu0  ;;  %v4532_v15 = vpop.f32.mrb[70].mxu1  ;;  %v2839_v8 = vpack.c.bf16 %v2824_v5, %v2823_v62 }
 0x442   : > { %v4712_v50 = vadd.f32 %v6234_v42, %v2728_v45  ;;  %v4654_v16 = vpop.f32.mrb[38].mxu0  ;;  %v4533_v38 = vpop.f32.mrb[71].mxu1 }
 0x443   : > { %v2813_v0 = vmul.f32 0.2, %v4709_v46  ;;  %v4715_v61 = vadd.f32 %v4714_v18, %v4654_v16  ;;  %v4534_v9 = vadd.f32 %v4533_v38, %v4532_v15  ;;  %v2731_v25 = vpop.f32.mrb[39].mxu0  ;;  %4679 = vmatprep.mubr.bf16.mxu1 %v2839_v8  ;;  %vm2797_vm3 = vcmp.gt.f32.partialorder %v4709_v46, 0.0 }
 0x444   : > { %v2811_v29 = vmul.f32 0.2, %v4712_v50  ;;  %v4718_v41 = vadd.f32 %v6237_v21, %v2731_v25  ;;  %4680 = vmatmul.mubr.bf16.vlgmr.msra.gmra.mrb[72].mxu1 %v2840_v26  ;;  %v4732_v59 = vadd.f32 %v6228_v6, %v4531_v2  ;;  %vm2795_vm4 = vcmp.gt.f32.partialorder %v4712_v50, 0.0 }
 0x445   : > { %vm2798_vm5 = vcmp.gt.f32.partialorder %v4715_v61, 0.0  ;;  %v2814_v7 = vmul.f32 0.2, %v4715_v61  ;;  %v4738_v54 = vadd.f32 %v6231_v10, %v4534_v9  ;;  %v2829_v1 = vsel %vm2797_vm3, %v4709_v46, %v2813_v0 }
 0x446   : > { %vm2796_vm6 = vcmp.gt.f32.partialorder %v4718_v41, 0.0  ;;  %v2812_v42 = vmul.f32 0.2, %v4718_v41  ;;  %v2827_v40 = vsel %vm2795_vm4, %v4712_v50, %v2811_v29  ;;  %v5382_v8 = vmov 1983009808  }
 0x447   : > { %v2830_v4 = vsel %vm2798_vm5, %v4715_v61, %v2814_v7  ;;  %v3122_v50 = vunpack.c.l.s4 %v5382_v8  ;;  %v3124_v16 = vlaneseq  ;;  %vm3679_vm3 = vcmask 1044484  }
 0x448   : > { %v4657_v18 = vpop.f32.mrb[40].mxu0  ;;  %v2828_v53 = vsel %vm2796_vm6, %v4718_v41, %v2812_v42  ;;  %v2842_v49 = vpack.c.bf16 %v2830_v4, %v2829_v1  ;;  %vm3681_vm4 = vcmask 1045509   ;;  %vm3683_vm5 = vcmask 1046534  }
 0x449   : > { %v4721_v11 = vadd.f32 %v6248_v17, %v4657_v18  ;;  %v2744_v37 = vpop.f32.mrb[41].mxu0  ;;  %v2841_v21 = vpack.c.bf16 %v2828_v53, %v2827_v40  ;;  %v3123_v38 = vunpack.c.0.s8 %v3122_v50  ;;  %v3125_v0 = vshrl.u32 %v3124_v16, 7 }
 0x44a   : > { %v4724_v36 = vadd.f32 %v6242_v48, %v2744_v37  ;;  %v4658_v6 = vpop.f32.mrb[42].mxu0  ;;  %vm3685_vm6 = vcmask 1047559  }
 0x44b   : > { %v2817_v14 = vmul.f32 0.2, %v4721_v11  ;;  %v4727_v52 = vadd.f32 %v6251_v12, %v4658_v6  ;;  %v2747_v22 = vpop.f32.mrb[43].mxu0  ;;  %4683 = vmatprep.mubr.bf16.mxu1 %v2841_v21  ;;  %vm2801_vm7 = vcmp.gt.f32.partialorder %v4721_v11, 0.0  ;;  %v6272_v29 = vsub.s32 %v3123_v38, %v3125_v0 }
 0x44c   : > { %v2815_v10 = vmul.f32 0.2, %v4724_v36  ;;  %v4730_v24 = vadd.f32 %v6245_v13, %v2747_v22  ;;  %4684 = vmatmul.mubr.bf16.gmra.mrb[76].mxu1 %v2842_v49  ;;  %vm2799_vm8 = vcmp.gt.f32.partialorder %v4724_v36, 0.0 }
 0x44d   : > { %vm2802_vm9 = vcmp.gt.f32.partialorder %v4727_v52, 0.0  ;;  %v2818_v33 = vmul.f32 0.2, %v4727_v52  ;;  %v2833_v23 = vsel %vm2801_vm7, %v4721_v11, %v2817_v14 }
 0x44e   : > { %vm2800_vm10 = vcmp.gt.f32.partialorder %v4730_v24, 0.0  ;;  %v2816_v17 = vmul.f32 0.2, %v4730_v24  ;;  %v2831_v48 = vsel %vm2799_vm8, %v4724_v36, %v2815_v10 }
 0x44f   : > { %v2834_v56 = vsel %vm2802_vm9, %v4727_v52, %v2818_v33 }
 0x450   : > { %v4661_v57 = vpop.f32.mrb[44].mxu0  ;;  %v2832_v60 = vsel %vm2800_vm10, %v4730_v24, %v2816_v17  ;;  %v2844_v19 = vpack.c.bf16 %v2834_v56, %v2833_v23 }
 0x451   : > { %v4733_v28 = vadd.f32 %v4732_v59, %v4661_v57  ;;  %v2760_v12 = vpop.f32.mrb[45].mxu0  ;;  %v2843_v44 = vpack.c.bf16 %v2832_v60, %v2831_v48 }
 0x452   : > { %v4736_v20 = vadd.f32 %v6255_v47, %v2760_v12  ;;  %v4662_v34 = vpop.f32.mrb[46].mxu0 }
 0x453   : > { %v2821_v30 = vmul.f32 0.2, %v4733_v28  ;;  %v4739_v13 = vadd.f32 %v4738_v54, %v4662_v34  ;;  %v2763_v58 = vpop.f32.mrb[47].mxu0  ;;  %4687 = vmatprep.mubr.bf16.mxu1 %v2843_v44  ;;  %vm2805_vm11 = vcmp.gt.f32.partialorder %v4733_v28, 0.0 }
 0x454   : > { %v2819_v26 = vmul.f32 0.2, %v4736_v20  ;;  %v4742_v3 = vadd.f32 %v6258_v32, %v2763_v58  ;;  %4688 = vmatmul.mubr.bf16.gmra.mrb[80].mxu1 %v2844_v19  ;;  %vm2803_vm12 = vcmp.gt.f32.partialorder %v4736_v20, 0.0 }
 0x455   : > { %vm2806_vm13 = vcmp.gt.f32.partialorder %v4739_v13, 0.0  ;;  %v2822_v63 = vmul.f32 0.2, %v4739_v13  ;;  %v2837_v5 = vsel %vm2805_vm11, %v4733_v28, %v2821_v30 }
 0x456   : > { %vm2804_vm14 = vcmp.gt.f32.partialorder %v4742_v3, 0.0  ;;  %v2820_v62 = vmul.f32 0.2, %v4742_v3  ;;  %v2835_v2 = vsel %vm2803_vm12, %v4736_v20, %v2819_v26 }
 0x457   : > { %v2838_v46 = vsel %vm2806_vm13, %v4739_v13, %v2822_v63 }
 0x458   : > { %v2836_v45 = vsel %vm2804_vm14, %v4742_v3, %v2820_v62  ;;  %v2846_v47 = vpack.c.bf16 %v2838_v46, %v2837_v5 }
 0x459   : > { %v2845_v15 = vpack.c.bf16 %v2836_v45, %v2835_v2 }
 0x45b   : > { %4691 = vmatprep.mubr.bf16.mxu1 %v2845_v15 }
 0x45c   : > { %4692 = vmatmul.mubr.bf16.gmra.mrb[84].mxu1 %v2846_v47 }
 0x517   : > { %v4681_v32 = vpop.f32.mrb[72].mxu1 }
 0x518   : > { %v3010_v61 = vadd.f32 %v4681_v32, %v5721_v35  ;;  %v2945_v9 = vpop.f32.mrb[73].mxu1 }
 0x519   : > { %v3008_v25 = vadd.f32 %v2945_v9, %v5713_v27  ;;  %v4682_v41 = vpop.f32.mrb[74].mxu1 }
 0x51a   : > { %v3011_v59 = vadd.f32 %v4682_v41, %v5725_v39  ;;  %v2948_v7 = vpop.f32.mrb[75].mxu1 }
 0x51b   : > { %v3104_v54 = vmax.f32 %v3008_v25, %v3010_v61  ;;  %v3009_v42 = vadd.f32 %v2948_v7, %v5717_v31 }
 0x51c   : > { %v4272_v1 = vpack.c.bf16 %v3011_v59, %v3010_v61 }
 0x51d   : > { %v3120_v4 = vcombine.high %v3104_v54, %v3104_v54  ;;  %v3127_v18 = vrot.slane %v3104_v54, %v6272_v29  ;;  %v4267_v40 = vpack.c.bf16 %v3009_v42, %v3008_v25  ;;  %v3105_v35 = vmax.f32 %v3009_v42, %v3011_v59 }
 0x51e   : > { %4304 = vst [vmem:[%s5783_s7 + $0x8] sm:$0xff] %v4272_v1  }
 0x51f   : > { %v3134_v27 = vrot.slane %v3120_v4, %v6272_v29  ;;  %v3135_v53 = vcombine.high %v3127_v18, %v3127_v18  ;;  %v3289_v49 = vsel %vm3288_vm15, %v3127_v18, -inf  ;;  %4268 = vst [vmem:[%s5783_s7] sm:$0xff] %v4267_v40   ;;  %v3137_v11 = vcombine.high %v3105_v35, %v3105_v35  ;;  %v4685_v39 = vpop.f32.mrb[76].mxu1 }
 0x520   : > { %v3290_v37 = vrot.slane %v3289_v49, 4  ;;  %v3144_v21 = vrot.slane %v3105_v35, %v6272_v29  ;;  %v6283_v31 = vadd.f32 %v4685_v39, %v5737_v51  ;;  %v6285_v36 = vpop.f32.mrb[77].mxu1 }
 0x521   : > { %v3136_v6 = vcombine.high %v3134_v27, %v3134_v27  ;;  %v3296_v14 = vsel %vm3288_vm15, %v3135_v53, -inf  ;;  %v3303_v52 = vsel %vm3288_vm15, %v3134_v27, -inf  ;;  %v3151_v22 = vrot.slane %v3137_v11, %v6272_v29  ;;  %v6290_v10 = vpop.f32.mrb[78].mxu1 }
 0x522   : > { %v3291_v24 = vmax.f32 %v3289_v49, %v3290_v37  ;;  %v3297_v33 = vrot.slane %v3296_v14, 4  ;;  %v3304_v17 = vrot.slane %v3303_v52, 4  ;;  %v3152_v23 = vcombine.high %v3144_v21, %v3144_v21  ;;  %v6292_v56 = vpop.f32.mrb[79].mxu1 }
 0x523   : > { %v3310_v51 = vsel %vm3288_vm15, %v3136_v6, -inf  ;;  %v3153_v57 = vcombine.high %v3151_v22, %v3151_v22  ;;  %v3317_v48 = vsel %vm3288_vm15, %v3144_v21, -inf  ;;  %v3331_v60 = vsel %vm3288_vm15, %v3151_v22, -inf }
 0x524   : > { %v3292_v19 = vrot.slane %v3291_v24, 2  ;;  %v3298_v28 = vmax.f32 %v3296_v14, %v3297_v33  ;;  %v3305_v12 = vmax.f32 %v3303_v52, %v3304_v17  ;;  %v3311_v44 = vrot.slane %v3310_v51, 4 }
 0x525   : > { %v3318_v20 = vrot.slane %v3317_v48, 4  ;;  %v3324_v34 = vsel %vm3288_vm15, %v3152_v23, -inf  ;;  %v3332_v30 = vrot.slane %v3331_v60, 4  ;;  %v3338_v13 = vsel %vm3288_vm15, %v3153_v57, -inf }
 0x526   : > { %v3293_v58 = vmax.f32 %v3291_v24, %v3292_v19  ;;  %v3299_v26 = vrot.slane %v3298_v28, 2  ;;  %v3306_v3 = vrot.slane %v3305_v12, 2  ;;  %v3312_v63 = vmax.f32 %v3310_v51, %v3311_v44 }
 0x527   : > { %v3319_v62 = vmax.f32 %v3317_v48, %v3318_v20  ;;  %v3325_v5 = vrot.slane %v3324_v34, 4  ;;  %v3333_v46 = vmax.f32 %v3331_v60, %v3332_v30  ;;  %v3339_v2 = vrot.slane %v3338_v13, 4  ;;  %v6299_v45 = vpop.f32.mrb[80].mxu1 }
 0x528   : > { %v3294_v47 = vrot.slane %v3293_v58, 1  ;;  %v3300_v15 = vmax.f32 %v3298_v28, %v3299_v26  ;;  %v3307_v8 = vmax.f32 %v3305_v12, %v3306_v3  ;;  %v3313_v50 = vrot.slane %v3312_v63, 2  ;;  %v6301_v16 = vpop.f32.mrb[81].mxu1 }
 0x529   : > { %v3320_v38 = vrot.slane %v3319_v62, 2  ;;  %v3326_v0 = vmax.f32 %v3324_v34, %v3325_v5  ;;  %v3334_v32 = vrot.slane %v3333_v46, 2  ;;  %v3340_v61 = vmax.f32 %v3338_v13, %v3339_v2  ;;  %v6303_v9 = vpop.f32.mrb[82].mxu1 }
 0x52a   : > { %v3295_v25 = vmax.f32 %v3293_v58, %v3294_v47  ;;  %v3301_v41 = vrot.slane %v3300_v15, 1  ;;  %v3308_v59 = vrot.slane %v3307_v8, 1  ;;  %v3314_v7 = vmax.f32 %v3312_v63, %v3313_v50  ;;  %v6305_v54 = vpop.f32.mrb[83].mxu1 }
 0x52b   : > { %v3321_v42 = vmax.f32 %v3319_v62, %v3320_v38  ;;  %v3327_v1 = vrot.slane %v3326_v0, 2  ;;  %v3335_v4 = vmax.f32 %v3333_v46, %v3334_v32  ;;  %v3341_v18 = vrot.slane %v3340_v61, 2  ;;  %v6603_v32 = vld [vmem:[#allocation33_spill] sm:$0xff] }
 0x52c   : > { %v3302_v40 = vmax.f32 %v3300_v15, %v3301_v41  ;;  %v3309_v35 = vmax.f32 %v3307_v8, %v3308_v59  ;;  %v3315_v27 = vrot.slane %v3314_v7, 1  ;;  %v4231_v53 = vpack.c.bf16 %v3295_v25, %v3295_v25  ;;  %v6604_v59 = vld [vmem:[#allocation36_spill] sm:$0xff] }
 0x52d   : > { %v3322_v49 = vrot.slane %v3321_v42, 1  ;;  %v3328_v11 = vmax.f32 %v3326_v0, %v3327_v1  ;;  %v3336_v39 = vrot.slane %v3335_v4, 1  ;;  %v3342_v37 = vmax.f32 %v3340_v61, %v3341_v18 }
 0x52e   : > { %v3316_v21 = vmax.f32 %v3314_v7, %v3315_v27  ;;  %v4232_v6 = vpack.c.bf16 %v3302_v40, %v3302_v40  ;;  %v4233_v14 = vpack.c.bf16 %v3309_v35, %v3309_v35  ;;  %v3641_v52 = vunpack.c.l.b16 %v4231_v53 }
 0x52f   : > { %v3323_v22 = vmax.f32 %v3321_v42, %v3322_v49  ;;  %v3329_v24 = vrot.slane %v3328_v11, 1  ;;  %v3337_v33 = vmax.f32 %v3335_v4, %v3336_v39  ;;  %v3343_v17 = vrot.slane %v3342_v37, 1  ;;  %v6307_v23 = vpop.f32.mrb[84].mxu1  ;;  %v6605_v42 = vld [vmem:[#allocation34_spill] sm:$0xff] }
 0x530   : > { %v4234_v51 = vpack.c.bf16 %v3316_v21, %v3316_v21  ;;  %v3642_v57 = vunpack.c.l.b16 %v4232_v6  ;;  %v3643_v48 = vunpack.c.l.b16 %v4233_v14  ;;  %v3012_v60 = vadd.f32 %v6285_v36, %v5729_v43  ;;  %v6311_v19 = vpop.f32.mrb[85].mxu1 }
 0x531   : > { %v3330_v28 = vmax.f32 %v3328_v11, %v3329_v24  ;;  %v3344_v12 = vmax.f32 %v3342_v37, %v3343_v17  ;;  %v4235_v44 = vpack.c.bf16 %v3323_v22, %v3323_v22  ;;  %v4237_v20 = vpack.c.bf16 %v3337_v33, %v3337_v33  ;;  %v6313_v34 = vpop.f32.mrb[86].mxu1  ;;  %v6606_v24 = vld [vmem:[#allocation37_spill] sm:$0xff] }
 0x532   : > { %v3644_v30 = vunpack.c.l.b16 %v4234_v51  ;;  %v3674_v13 = vsel %vm3673_vm0, %v3642_v57, %v3641_v52  ;;  %v3106_v58 = vmax.f32 %v3012_v60, %v6283_v31  ;;  %v3015_v26 = vadd.f32 %v6290_v10, %v5741_v55  ;;  %v6319_v3 = vpop.f32.mrb[87].mxu1 }
 0x533   : > { %v3676_v43 = vsel %vm3675_vm1, %v3643_v48, %v3674_v13  ;;  %v4236_v36 = vpack.c.bf16 %v3330_v28, %v3330_v28  ;;  %v4238_v63 = vpack.c.bf16 %v3344_v12, %v3344_v12  ;;  %v3645_v62 = vunpack.c.l.b16 %v4235_v44 }
 0x534   : > { %v3647_v5 = vunpack.c.l.b16 %v4237_v20  ;;  %v3678_v46 = vsel %vm3677_vm2, %v3644_v30, %v3676_v43  ;;  %v3154_v2 = vcombine.high %v3106_v58, %v3106_v58  ;;  %v3161_v47 = vrot.slane %v3106_v58, %v6272_v29 }
 0x535   : > { %v3646_v15 = vunpack.c.l.b16 %v4236_v36  ;;  %v3648_v8 = vunpack.c.l.b16 %v4238_v63  ;;  %v3680_v50 = vsel %vm3679_vm3, %v3645_v62, %v3678_v46  ;;  %v4282_v55 = vpack.c.bf16 %v3015_v26, %v6283_v31 }
 0x536   : > { %v3168_v10 = vrot.slane %v3154_v2, %v6272_v29  ;;  %v3169_v38 = vcombine.high %v3161_v47, %v3161_v47  ;;  %v3345_v0 = vsel %vm3288_vm15, %v3161_v47, -inf  ;;  %v3013_v61 = vadd.f32 %v6292_v56, %v6603_v32 }
 0x537   : > { %v3682_v25 = vsel %vm3681_vm4, %v3646_v15, %v3680_v50  ;;  %v3346_v41 = vrot.slane %v3345_v0, 4  ;;  %4306 = vst [vmem:[%s5783_s7 + $0x18] sm:$0xff] %v4282_v55   ;;  %v6334_v7 = vadd.f32 %v6299_v45, %v6604_v59  ;;  %v6338_v1 = vadd.f32 %v6301_v16, %v6605_v42 }
 0x538   : > { %v3684_v31 = vsel %vm3683_vm5, %v3647_v5, %v3682_v25  ;;  %v3170_v4 = vcombine.high %v3168_v10, %v3168_v10  ;;  %v3352_v18 = vsel %vm3288_vm15, %v3169_v38, -inf  ;;  %v3359_v56 = vsel %vm3288_vm15, %v3168_v10, -inf }
 0x539   : > { %v3686_v40 = vsel %vm3685_vm6, %v3648_v8, %v3684_v31  ;;  %v3347_v35 = vmax.f32 %v3345_v0, %v3346_v41  ;;  %v3353_v27 = vrot.slane %v3352_v18, 4  ;;  %v3360_v53 = vrot.slane %v3359_v56, 4 }
 0x53a   : > { %v3708_v45 = vpack.c.b16 %v3686_v40, %v3686_v40  ;;  %v3366_v49 = vsel %vm3288_vm15, %v3170_v4, -inf  ;;  %v4277_v11 = vpack.c.bf16 %v3013_v61, %v3012_v60  ;;  %v3107_v16 = vmax.f32 %v3013_v61, %v3015_v26 }
 0x53b   : > { %v3348_v39 = vrot.slane %v3347_v35, 2  ;;  %v3354_v37 = vmax.f32 %v3352_v18, %v3353_v27  ;;  %v3361_v21 = vmax.f32 %v3359_v56, %v3360_v53  ;;  %v3367_v6 = vrot.slane %v3366_v49, 4 }
 0x53c   : > { %3716 = vst [vmem:[%s5779_s17] sm:$0xf] %v3708_v45  ;;  %4305 = vst [vmem:[%s5783_s7 + $0x10] sm:$0xff] %v4277_v11   ;;  %v3171_v14 = vcombine.high %v3107_v16, %v3107_v16  ;;  %v3178_v52 = vrot.slane %v3107_v16, %v6272_v29  ;;  %v3108_v22 = vmax.f32 %v6338_v1, %v6334_v7 }
 0x53d   : > { %v6352_v33 = vadd.f32 %v6303_v9, %v6606_v24  ;;  %v3349_v17 = vmax.f32 %v3347_v35, %v3348_v39  ;;  %v3355_v51 = vrot.slane %v3354_v37, 2  ;;  %v3362_v57 = vrot.slane %v3361_v21, 2 }
 0x53e   : > { %v3368_v48 = vmax.f32 %v3366_v49, %v3367_v6  ;;  %v3185_v60 = vrot.slane %v3171_v14, %v6272_v29  ;;  %v3186_v28 = vcombine.high %v3178_v52, %v3178_v52  ;;  %v3373_v12 = vsel %vm3288_vm15, %v3178_v52, -inf }
 0x53f   : > { %v3188_v44 = vcombine.high %v3108_v22, %v3108_v22  ;;  %v3350_v20 = vrot.slane %v3349_v17, 1  ;;  %v3356_v30 = vmax.f32 %v3354_v37, %v3355_v51  ;;  %v3363_v13 = vmax.f32 %v3361_v21, %v3362_v57 }
 0x540   : > { %v3369_v58 = vrot.slane %v3368_v48, 2  ;;  %v3187_v26 = vcombine.high %v3185_v60, %v3185_v60  ;;  %v3374_v43 = vrot.slane %v3373_v12, 4  ;;  %v3380_v36 = vsel %vm3288_vm15, %v3186_v28, -inf }
 0x541   : > { %v3387_v9 = vsel %vm3288_vm15, %v3185_v60, -inf  ;;  %v3351_v63 = vmax.f32 %v3349_v17, %v3350_v20  ;;  %v3357_v62 = vrot.slane %v3356_v30, 1  ;;  %v3364_v5 = vrot.slane %v3363_v13, 1 }
 0x542   : > { %v3370_v46 = vmax.f32 %v3368_v48, %v3369_v58  ;;  %v3375_v2 = vmax.f32 %v3373_v12, %v3374_v43  ;;  %v3381_v47 = vrot.slane %v3380_v36, 4  ;;  %v3388_v15 = vrot.slane %v3387_v9, 4 }
 0x543   : > { %v3394_v8 = vsel %vm3288_vm15, %v3187_v26, -inf  ;;  %v3358_v50 = vmax.f32 %v3356_v30, %v3357_v62  ;;  %v3365_v55 = vmax.f32 %v3363_v13, %v3364_v5  ;;  %v4239_v38 = vpack.c.bf16 %v3351_v63, %v3351_v63 }
 0x544   : > { %v3371_v10 = vrot.slane %v3370_v46, 1  ;;  %v3376_v0 = vrot.slane %v3375_v2, 2  ;;  %v3382_v32 = vmax.f32 %v3380_v36, %v3381_v47  ;;  %v3389_v61 = vmax.f32 %v3387_v9, %v3388_v15 }
 0x545   : > { %v3395_v25 = vrot.slane %v3394_v8, 4  ;;  %v4240_v59 = vpack.c.bf16 %v3358_v50, %v3358_v50  ;;  %v4241_v42 = vpack.c.bf16 %v3365_v55, %v3365_v55  ;;  %v3649_v31 = vunpack.c.l.b16 %v4239_v38 }
 0x546   : > { %v3372_v41 = vmax.f32 %v3370_v46, %v3371_v10  ;;  %v3377_v4 = vmax.f32 %v3375_v2, %v3376_v0  ;;  %v3383_v18 = vrot.slane %v3382_v32, 2  ;;  %v3390_v56 = vrot.slane %v3389_v61, 2 }
 0x547   : > { %v3396_v40 = vmax.f32 %v3394_v8, %v3395_v25  ;;  %v3650_v27 = vunpack.c.l.b16 %v4240_v59  ;;  %v3651_v53 = vunpack.c.l.b16 %v4241_v42  ;;  %v3195_v45 = vrot.slane %v3108_v22, %v6272_v29 }
 0x548   : > { %v4242_v35 = vpack.c.bf16 %v3372_v41, %v3372_v41  ;;  %v3378_v49 = vrot.slane %v3377_v4, 1  ;;  %v3384_v11 = vmax.f32 %v3382_v32, %v3383_v18  ;;  %v3391_v16 = vmax.f32 %v3389_v61, %v3390_v56  ;;  %v6607_v41 = vld [vmem:[#allocation35_spill] sm:$0xff] }
 0x549   : > { %v3397_v39 = vrot.slane %v3396_v40, 2  ;;  %v3687_v21 = vsel %vm3673_vm0, %v3650_v27, %v3649_v31  ;;  %v3202_v6 = vrot.slane %v3188_v44, %v6272_v29  ;;  %v3203_v14 = vcombine.high %v3195_v45, %v3195_v45 }
 0x54a   : > { %v3652_v37 = vunpack.c.l.b16 %v4242_v35  ;;  %v3688_v52 = vsel %vm3675_vm1, %v3651_v53, %v3687_v21  ;;  %v3379_v24 = vmax.f32 %v3377_v4, %v3378_v49  ;;  %v3385_v17 = vrot.slane %v3384_v11, 1  ;;  %v6608_v49 = vld [vmem:[#allocation40_spill] sm:$0xff] }
 0x54b   : > { %v3392_v51 = vrot.slane %v3391_v16, 1  ;;  %v3398_v57 = vmax.f32 %v3396_v40, %v3397_v39  ;;  %v3204_v60 = vcombine.high %v3202_v6, %v3202_v6  ;;  %v3401_v22 = vsel %vm3288_vm15, %v3195_v45, -inf }
 0x54c   : > { %v3689_v48 = vsel %vm3677_vm2, %v3652_v37, %v3688_v52  ;;  %v3386_v28 = vmax.f32 %v3384_v11, %v3385_v17  ;;  %v4243_v20 = vpack.c.bf16 %v3379_v24, %v3379_v24  ;;  %v3402_v30 = vrot.slane %v3401_v22, 4 }
 0x54d   : > { %v3393_v12 = vmax.f32 %v3391_v16, %v3392_v51  ;;  %v3399_v13 = vrot.slane %v3398_v57, 1  ;;  %v3408_v58 = vsel %vm3288_vm15, %v3203_v14, -inf  ;;  %v3415_v44 = vsel %vm3288_vm15, %v3202_v6, -inf }
 0x54e   : > { %v3422_v26 = vsel %vm3288_vm15, %v3204_v60, -inf  ;;  %v4244_v43 = vpack.c.bf16 %v3386_v28, %v3386_v28  ;;  %v3653_v9 = vunpack.c.l.b16 %v4243_v20  ;;  %v3403_v63 = vmax.f32 %v3401_v22, %v3402_v30 }
 0x54f   : > { %v4245_v36 = vpack.c.bf16 %v3393_v12, %v3393_v12  ;;  %v3400_v62 = vmax.f32 %v3398_v57, %v3399_v13  ;;  %v3409_v5 = vrot.slane %v3408_v58, 4  ;;  %v3416_v46 = vrot.slane %v3415_v44, 4 }
 0x550   : > { %v3423_v2 = vrot.slane %v3422_v26, 4  ;;  %v3654_v47 = vunpack.c.l.b16 %v4244_v43  ;;  %v3690_v8 = vsel %vm3679_vm3, %v3653_v9, %v3689_v48  ;;  %v3404_v50 = vrot.slane %v3403_v63, 2 }
 0x551   : > { %v3655_v15 = vunpack.c.l.b16 %v4245_v36  ;;  %v4246_v55 = vpack.c.bf16 %v3400_v62, %v3400_v62  ;;  %v3410_v10 = vmax.f32 %v3408_v58, %v3409_v5  ;;  %v3417_v38 = vmax.f32 %v3415_v44, %v3416_v46 }
 0x552   : > { %v3424_v0 = vmax.f32 %v3422_v26, %v3423_v2  ;;  %v3691_v32 = vsel %vm3681_vm4, %v3654_v47, %v3690_v8  ;;  %v3405_v61 = vmax.f32 %v3403_v63, %v3404_v50  ;;  %v4292_v25 = vpack.c.bf16 %v6352_v33, %v6334_v7 }
 0x553   : > { %v3017_v59 = vadd.f32 %v6305_v54, %v6607_v41  ;;  %v3656_v42 = vunpack.c.l.b16 %v4246_v55  ;;  %v3692_v31 = vsel %vm3683_vm5, %v3655_v15, %v3691_v32  ;;  %v3411_v4 = vrot.slane %v3410_v10, 2 }
 0x554   : > { %v3418_v18 = vrot.slane %v3417_v38, 2  ;;  %v3406_v56 = vrot.slane %v3405_v61, 1  ;;  %v3425_v40 = vrot.slane %v3424_v0, 2  ;;  %4308 = vst [vmem:[%s5783_s7 + $0x28] sm:$0xff] %v4292_v25   ;;  %v6381_v54 = vadd.f32 %v6307_v23, %v6608_v49  ;;  %v6610_v23 = vld [vmem:[#allocation41_spill] sm:$0xff] }
 0x555   : > { %v4287_v35 = vpack.c.bf16 %v3017_v59, %v6338_v1  ;;  %v3109_v27 = vmax.f32 %v3017_v59, %v6352_v33  ;;  %v3693_v53 = vsel %vm3685_vm6, %v3656_v42, %v3692_v31  ;;  %v3412_v7 = vmax.f32 %v3410_v10, %v3411_v4  ;;  %v6609_v1 = vld [vmem:[#allocation38_spill] sm:$0xff] }
 0x556   : > { %v3419_v45 = vmax.f32 %v3417_v38, %v3418_v18  ;;  %v3709_v11 = vpack.c.b16 %v3693_v53, %v3693_v53  ;;  %v3407_v16 = vmax.f32 %v3405_v61, %v3406_v56  ;;  %v3426_v39 = vmax.f32 %v3424_v0, %v3425_v40 }
 0x557   : > { %4307 = vst [vmem:[%s5783_s7 + $0x20] sm:$0xff] %v4287_v35   ;;  %v3205_v37 = vcombine.high %v3109_v27, %v3109_v27  ;;  %v3413_v21 = vrot.slane %v3412_v7, 1  ;;  %v3212_v14 = vrot.slane %v3109_v27, %v6272_v29  ;;  %v6387_v33 = vadd.f32 %v6311_v19, %v6609_v1 }
 0x558   : > { %v3420_v6 = vrot.slane %v3419_v45, 1  ;;  %3717 = vst [vmem:[%s5779_s17 + $0x4] sm:$0xf] %v3709_v11  ;;  %v3427_v52 = vrot.slane %v3426_v39, 1  ;;  %v4247_v24 = vpack.c.bf16 %v3407_v16, %v3407_v16  ;;  %v6393_v51 = vadd.f32 %v6313_v34, %v6610_v23 }
 0x559   : > { %v3219_v17 = vrot.slane %v3205_v37, %v6272_v29  ;;  %v3414_v57 = vmax.f32 %v3412_v7, %v3413_v21  ;;  %v3220_v60 = vcombine.high %v3212_v14, %v3212_v14  ;;  %v3429_v22 = vsel %vm3288_vm15, %v3212_v14, -inf }
 0x55a   : > { %v3421_v48 = vmax.f32 %v3419_v45, %v3420_v6  ;;  %v3428_v28 = vmax.f32 %v3426_v39, %v3427_v52  ;;  %v3657_v12 = vunpack.c.l.b16 %v4247_v24  ;;  %v3430_v30 = vrot.slane %v3429_v22, 4 }
 0x55b   : > { %v3221_v20 = vcombine.high %v3219_v17, %v3219_v17  ;;  %v4248_v19 = vpack.c.bf16 %v3414_v57, %v3414_v57  ;;  %v3436_v58 = vsel %vm3288_vm15, %v3220_v60, -inf  ;;  %v3443_v44 = vsel %vm3288_vm15, %v3219_v17, -inf }
 0x55c   : > { %v4249_v13 = vpack.c.bf16 %v3421_v48, %v3421_v48  ;;  %v4250_v26 = vpack.c.bf16 %v3428_v28, %v3428_v28  ;;  %v3431_v43 = vmax.f32 %v3429_v22, %v3430_v30  ;;  %v3437_v36 = vrot.slane %v3436_v58, 4 }
 0x55d   : > { %v3444_v34 = vrot.slane %v3443_v44, 4  ;;  %v3658_v9 = vunpack.c.l.b16 %v4248_v19  ;;  %v3450_v62 = vsel %vm3288_vm15, %v3221_v20, -inf  ;;  %v3110_v5 = vmax.f32 %v6387_v33, %v6381_v54 }
 0x55e   : > { %v3659_v63 = vunpack.c.l.b16 %v4249_v13  ;;  %v3660_v46 = vunpack.c.l.b16 %v4250_v26  ;;  %v3432_v2 = vrot.slane %v3431_v43, 2  ;;  %v3438_v47 = vmax.f32 %v3436_v58, %v3437_v36 }
 0x55f   : > { %v3445_v15 = vmax.f32 %v3443_v44, %v3444_v34  ;;  %v3694_v8 = vsel %vm3673_vm0, %v3658_v9, %v3657_v12  ;;  %v3451_v50 = vrot.slane %v3450_v62, 4  ;;  %v3222_v55 = vcombine.high %v3110_v5, %v3110_v5 }
 0x560   : > { %v3229_v10 = vrot.slane %v3110_v5, %v6272_v29  ;;  %v3695_v38 = vsel %vm3675_vm1, %v3659_v63, %v3694_v8  ;;  %v3433_v0 = vmax.f32 %v3431_v43, %v3432_v2  ;;  %v3439_v32 = vrot.slane %v3438_v47, 2 }
 0x561   : > { %v3446_v61 = vrot.slane %v3445_v15, 2  ;;  %v3452_v25 = vmax.f32 %v3450_v62, %v3451_v50  ;;  %v3696_v41 = vsel %vm3677_vm2, %v3660_v46, %v3695_v38  ;;  %v3236_v59 = vrot.slane %v3222_v55, %v6272_v29  ;;  %v6611_v46 = vld [vmem:[#allocation39_spill] sm:$0xff] }
 0x562   : > { %v3237_v42 = vcombine.high %v3229_v10, %v3229_v10  ;;  %v3434_v31 = vrot.slane %v3433_v0, 1  ;;  %v3440_v4 = vmax.f32 %v3438_v47, %v3439_v32  ;;  %v3457_v56 = vsel %vm3288_vm15, %v3229_v10, -inf }
 0x563   : > { %v3447_v18 = vmax.f32 %v3445_v15, %v3446_v61  ;;  %v3453_v40 = vrot.slane %v3452_v25, 2  ;;  %v3238_v35 = vcombine.high %v3236_v59, %v3236_v59  ;;  %v3458_v27 = vrot.slane %v3457_v56, 4 }
 0x564   : > { %v3464_v53 = vsel %vm3288_vm15, %v3237_v42, -inf  ;;  %v3435_v7 = vmax.f32 %v3433_v0, %v3434_v31  ;;  %v3441_v45 = vrot.slane %v3440_v4, 1  ;;  %v3471_v37 = vsel %vm3288_vm15, %v3236_v59, -inf }
 0x565   : > { %v3448_v49 = vrot.slane %v3447_v18, 1  ;;  %v3465_v11 = vrot.slane %v3464_v53, 4  ;;  %v3454_v16 = vmax.f32 %v3452_v25, %v3453_v40  ;;  %v3459_v39 = vmax.f32 %v3457_v56, %v3458_v27 }
 0x566   : > { %v3478_v21 = vsel %vm3288_vm15, %v3238_v35, -inf  ;;  %v3442_v6 = vmax.f32 %v3440_v4, %v3441_v45  ;;  %v4251_v1 = vpack.c.bf16 %v3435_v7, %v3435_v7  ;;  %v3472_v23 = vrot.slane %v3471_v37, 4 }
 0x567   : > { %v3449_v14 = vmax.f32 %v3447_v18, %v3448_v49  ;;  %v3466_v52 = vmax.f32 %v3464_v53, %v3465_v11  ;;  %v3455_v24 = vrot.slane %v3454_v16, 1  ;;  %v3460_v17 = vrot.slane %v3459_v39, 2 }
 0x568   : > { %v3479_v57 = vrot.slane %v3478_v21, 4  ;;  %v4252_v48 = vpack.c.bf16 %v3442_v6, %v3442_v6  ;;  %v3661_v22 = vunpack.c.l.b16 %v4251_v1  ;;  %v3473_v30 = vmax.f32 %v3471_v37, %v3472_v23 }
 0x569   : > { %v4253_v60 = vpack.c.bf16 %v3449_v14, %v3449_v14  ;;  %v3467_v28 = vrot.slane %v3466_v52, 2  ;;  %v3456_v12 = vmax.f32 %v3454_v16, %v3455_v24  ;;  %v3461_v20 = vmax.f32 %v3459_v39, %v3460_v17 }
 0x56a   : > { %v3480_v19 = vmax.f32 %v3478_v21, %v3479_v57  ;;  %v3662_v13 = vunpack.c.l.b16 %v4252_v48  ;;  %v3697_v44 = vsel %vm3679_vm3, %v3661_v22, %v3696_v41  ;;  %v3474_v34 = vrot.slane %v3473_v30, 2 }
 0x56b   : > { %v3663_v58 = vunpack.c.l.b16 %v4253_v60  ;;  %v3468_v26 = vmax.f32 %v3466_v52, %v3467_v28  ;;  %v4254_v43 = vpack.c.bf16 %v3456_v12, %v3456_v12  ;;  %v3462_v36 = vrot.slane %v3461_v20, 1 }
 0x56c   : > { %v3481_v9 = vrot.slane %v3480_v19, 2  ;;  %v3698_v63 = vsel %vm3681_vm4, %v3662_v13, %v3697_v44  ;;  %v4302_v5 = vpack.c.bf16 %v6393_v51, %v6381_v54  ;;  %v3021_v2 = vadd.f32 %v6319_v3, %v6611_v46 }
 0x56d   : > { %v3469_v62 = vrot.slane %v3468_v26, 1  ;;  %v3664_v47 = vunpack.c.l.b16 %v4254_v43  ;;  %v3699_v15 = vsel %vm3683_vm5, %v3663_v58, %v3698_v63  ;;  %v3475_v8 = vmax.f32 %v3473_v30, %v3474_v34 }
 0x56e   : > { %v3482_v55 = vmax.f32 %v3480_v19, %v3481_v9  ;;  %4310 = vst [vmem:[%s5783_s7 + $0x38] sm:$0xff] %v4302_v5   ;;  %v4297_v10 = vpack.c.bf16 %v3021_v2, %v6387_v33  ;;  %v3111_v38 = vmax.f32 %v3021_v2, %v6393_v51  ;;  %v3463_v54 = vmax.f32 %v3461_v20, %v3462_v36 }
 0x56f   : > { %v3470_v50 = vmax.f32 %v3468_v26, %v3469_v62  ;;  %v3700_v3 = vsel %vm3685_vm6, %v3664_v47, %v3699_v15  ;;  %v3476_v0 = vrot.slane %v3475_v8, 1 }
 0x570   : > { %v3710_v32 = vpack.c.b16 %v3700_v3, %v3700_v3  ;;  %v3483_v61 = vrot.slane %v3482_v55, 1  ;;  %4309 = vst [vmem:[%s5783_s7 + $0x30] sm:$0xff] %v4297_v10   ;;  %v3239_v33 = vcombine.high %v3111_v38, %v3111_v38  ;;  %v3246_v41 = vrot.slane %v3111_v38, %v6272_v29 }
 0x571   : > { %v3477_v51 = vmax.f32 %v3475_v8, %v3476_v0  ;;  %v4256_v25 = vpack.c.bf16 %v3470_v50, %v3470_v50 }
 0x572   : > { %5240 = shalt.err (!%p5237_p5)
}
 0x573   : > { %s5241_s7 = scalar_lea.hbm %s6426_s15, 1024  ;;  %s5245_s11 = scalar_lea.hbm %s6612_s19, 4096 }
 0x574   : > { %p5242_p9 = scmp.ne.s32.totalorder %s6426_s15, %s5241_s7  ;;  %p5246_p4 = scmp.lt.u32.totalorder %s6426_s15, %s6612_s19 }
 0x575   : > { %p5247_p10 = scmp.lt.u32.totalorder %s5245_s11, %s5241_s7  ;;  %p5249_p13 = scmp.lt.u32.totalorder %s5241_s7, %s6426_s15 }
 0x576   : > { %p5243_p0 = pnand %p5242_p9, %p5584_p6 }
 0x577   : > { %p5248_p8 = por %p5247_p10, %p5246_p4 }
 0x578   : > { %p5244_p2 = pneg %p5243_p0 }
 0x579   : > { %p5250_p3 = por %p5249_p13, %p5248_p8 }
 0x57b   : > { %p5251_p7 = pnand %p5250_p3, %p5244_p2 }
 0x57d   : > { %5254 = shalt.err (!%p5251_p7)
}
 0x57e   : > { %s5384_s30 = smov 64   ;;  %s5385_s18 = smov 4   ;;  %3718 = vst [vmem:[%s5779_s17 + $0x8] sm:$0xf] %v3710_v32  ;;  %v3253_v59 = vrot.slane %v3239_v33, %v6272_v29  ;;  %v4255_v42 = vpack.c.bf16 %v3463_v54, %v3463_v54  ;;  %v3254_v31 = vcombine.high %v3246_v41, %v3246_v41  ;;  %v3485_v4 = vsel %vm3288_vm15, %v3246_v41, -inf }
 0x57f   : > { %4790 = dma.vmem_to_hbm [thread:$0]  (%p5584_p6), %s6428_s20, 1024, %s6426_s15, %s3726_s16, %s5384_s30, %s5384_s30, %s5385_s18   ;;  %v3484_v18 = vmax.f32 %v3482_v55, %v3483_v61  ;;  %v3486_v40 = vrot.slane %v3485_v4, 4  ;;  %v4257_v35 = vpack.c.bf16 %v3477_v51, %v3477_v51  ;;  %v3666_v27 = vunpack.c.l.b16 %v4256_v25 }
 0x580   : > { %v3255_v56 = vcombine.high %v3253_v59, %v3253_v59  ;;  %v3492_v53 = vsel %vm3288_vm15, %v3254_v31, -inf  ;;  %v3499_v7 = vsel %vm3288_vm15, %v3253_v59, -inf  ;;  %v3665_v16 = vunpack.c.l.b16 %v4255_v42  ;;  %s4183_s20 = sshll.u32 %s5353_s24, 2  ;;  %s4184_s6 = sshll.u32 %s5357_s25, 3 }
 0x581   : > { %v3487_v45 = vmax.f32 %v3485_v4, %v3486_v40  ;;  %v3493_v49 = vrot.slane %v3492_v53, 4  ;;  %v3500_v11 = vrot.slane %v3499_v7, 4  ;;  %v4258_v14 = vpack.c.bf16 %v3484_v18, %v3484_v18  ;;  %s3738_s15 = sadd.s32 %s4184_s6, %s4183_s20  ;;  %s3741_s25 = sshll.u32 %s5779_s17, 4  ;;  %s6481_s25 = int_to_ptr.vmem [resolvable:$true] %s3741_s25 }
 0x582   : > { %v3506_v39 = vsel %vm3288_vm15, %v3255_v56, -inf  ;;  %v3667_v1 = vunpack.c.l.b16 %v4257_v35  ;;  %v3701_v52 = vsel %vm3673_vm0, %v3666_v27, %v3665_v16  ;;  %s4185_s24 = sshll.u32 %s3738_s15, 6  ;;  %s6613_s3 = sld [smem:[#allocation45_spill]] }
 0x583   : > { %v3488_v29 = vrot.slane %v3487_v45, 2  ;;  %v3494_v37 = vmax.f32 %v3492_v53, %v3493_v49  ;;  %v3501_v21 = vmax.f32 %v3499_v7, %v3500_v11  ;;  %v3507_v6 = vrot.slane %v3506_v39, 4  ;;  %s3721_s8 = scalar_lea.sflag [#allocation8], %s5652_s5  ;;  %s5255_s7 = scalar_lea.vmem %s6481_s25, 256 }
 0x584   : > { %v3668_v12 = vunpack.c.l.b16 %v4258_v14  ;;  %v3702_v20 = vsel %vm3675_vm1, %v3667_v1, %v3701_v52  ;;  %p5256_p12 = scmp.ne.s32.totalorder %s6481_s25, %s5255_s7  ;;  %s5386_s9 = smov [#allocation14]  }
 0x585   : > { %v3489_v24 = vmax.f32 %v3487_v45, %v3488_v29  ;;  %v3495_v17 = vrot.slane %v3494_v37, 2  ;;  %v3502_v23 = vrot.slane %v3501_v21, 2  ;;  %v3508_v57 = vmax.f32 %v3506_v39, %v3507_v6  ;;  %s5259_s2 = sshll.u32 %s5386_s9, 4  ;;  %s5260_s2 = int_to_ptr.vmem [resolvable:$false] %s5259_s2 }
 0x586   : > { %v3703_v34 = vsel %vm3677_vm2, %v3668_v12, %v3702_v20  ;;  %p5257_p11 = pnand %p5256_p12, %p5584_p6  ;;  %s5261_s11 = scalar_lea.vmem %s5260_s2, 512 }
 0x587   : > { %v3490_v48 = vrot.slane %v3489_v24, 1  ;;  %v3496_v60 = vmax.f32 %v3494_v37, %v3495_v17  ;;  %v3503_v22 = vmax.f32 %v3501_v21, %v3502_v23  ;;  %v3509_v28 = vrot.slane %v3508_v57, 2  ;;  %p5262_p5 = scmp.lt.s32.totalorder %s6481_s25, %s5260_s2  ;;  %p5263_p9 = scmp.lt.s32.totalorder %s5261_s11, %s5255_s7 }
 0x588   : > { %s6479_s12 = scalar_lea.hbm %s6613_s3, %s4185_s24  ;;  %p5258_p1 = pneg %p5257_p11 }
 0x589   : > { %v3491_v30 = vmax.f32 %v3489_v24, %v3490_v48  ;;  %v3497_v19 = vrot.slane %v3496_v60, 1  ;;  %v3504_v13 = vrot.slane %v3503_v22, 1  ;;  %v3510_v58 = vmax.f32 %v3508_v57, %v3509_v28  ;;  %p5264_p0 = por %p5263_p9, %p5262_p5 }
 0x58b   : > { %v3498_v44 = vmax.f32 %v3496_v60, %v3497_v19  ;;  %v3505_v26 = vmax.f32 %v3503_v22, %v3504_v13  ;;  %v3511_v43 = vrot.slane %v3510_v58, 1  ;;  %v4259_v36 = vpack.c.bf16 %v3491_v30, %v3491_v30  ;;  %p5265_p2 = pnand %p5264_p0, %p5258_p1 }
 0x58d   : > { %v3512_v9 = vmax.f32 %v3510_v58, %v3511_v43  ;;  %v4260_v63 = vpack.c.bf16 %v3498_v44, %v3498_v44  ;;  %v4261_v62 = vpack.c.bf16 %v3505_v26, %v3505_v26  ;;  %v3669_v5 = vunpack.c.l.b16 %v4259_v36 }
 0x58f   : > { %v4262_v46 = vpack.c.bf16 %v3512_v9, %v3512_v9  ;;  %v3670_v2 = vunpack.c.l.b16 %v4260_v63  ;;  %v3704_v47 = vsel %vm3679_vm3, %v3669_v5, %v3703_v34  ;;  %v3671_v15 = vunpack.c.l.b16 %v4261_v62 }
 0x591   : > { %v3672_v8 = vunpack.c.l.b16 %v4262_v46  ;;  %v3705_v50 = vsel %vm3681_vm4, %v3670_v2, %v3704_v47 }
 0x592   : > { %v3706_v55 = vsel %vm3683_vm5, %v3671_v15, %v3705_v50 }
 0x593   : > { %v3707_v10 = vsel %vm3685_vm6, %v3672_v8, %v3706_v55 }
 0x594   : > { %v3711_v38 = vpack.c.b16 %v3707_v10, %v3707_v10 }
 0x596   : > { %3719 = vst [vmem:[%s5779_s17 + $0xc] sm:$0xf] %v3711_v38 }
 0x597   : > { %5268 = shalt.err (!%p5265_p2)
}
 0x598   : > { %s5269_s17 = scalar_lea.hbm %s6479_s12, 256  ;;  %s5273_s20 = scalar_lea.hbm %s6613_s3, 1024 }
 0x599   : > { %p5270_p4 = scmp.ne.s32.totalorder %s6479_s12, %s5269_s17  ;;  %p5274_p13 = scmp.lt.u32.totalorder %s6479_s12, %s6613_s3 }
 0x59a   : > { %p5275_p3 = scmp.lt.u32.totalorder %s5273_s20, %s5269_s17  ;;  %p5277_p12 = scmp.lt.u32.totalorder %s5269_s17, %s6479_s12 }
 0x59b   : > { %p5271_p10 = pnand %p5270_p4, %p5584_p6 }
 0x59c   : > { %p5276_p7 = por %p5275_p3, %p5274_p13 }
 0x59d   : > { %p5272_p8 = pneg %p5271_p10 }
 0x59e   : > { %p5278_p11 = por %p5277_p12, %p5276_p7 }
 0x5a0   : > { %p5279_p1 = pnand %p5278_p11, %p5272_p8 }
 0x5a2   : > { %5282 = shalt.err (!%p5279_p1)
}
 0x5a3   : > { %4789 = dma.vmem_to_hbm [thread:$0]  (%p5584_p6), %s6481_s25, 256, %s6479_s12, %s3721_s8, %s5384_s30, %s5384_s30, %s5385_s18  }
 0x5a4 PF: > { %s6614_s24 = sld [smem:[#allocation30_spill]]  ;;  %s6615_s16 = sld [smem:[#allocation31_spill]] }
 0x5a5   : > { %p4821_p5 = scmp.ge.s32.totalorder %s5369_s28, 2 }
 0x5aa   : > { %s3775_s4 = sand.u32 1, %s6614_s24   ;;  %p6616_p9 = scmp.ne.s32.totalorder %s6615_s16, 0 }
 0x5ab   : > { %s3776_s7 = scalar_lea.sflag [#allocation8], %s3775_s4 }
 0x5ac   : > { %p4808_p0 = pnand %p4821_p5, %p6616_p9 }
 0x5ae   : > { %5332 = dma.done.wait (!%p4808_p0), %s3776_s7, 256  }
 0x5af   : > { %5334 = vsyncadd (!%p4808_p0), %s3776_s7, 4294967040  ;;  %s3785_s29 = scalar_lea.sflag [#allocation16], %s3775_s4 }
 0x5b0   : > { %5336 = dma.done.wait (!%p4808_p0), %s3785_s29, 1024  }
 0x5b1   : > { %5338 = vsyncadd (!%p4808_p0), %s3785_s29, 4294966272  ;;  %s28_s28 = sadd.s32 1, %s5369_s28   ;;  %s6617_s5 = smov %s5601_s21 }
 0x5b2   : > { %p25_p2 = scmp.ge.s32.totalorder %s28_s28, 6   ;;  %s6618_s30 = sld [smem:[#allocation32_spill]] }
 0x5b3   : > { %s6619_s21 = smov %s5345_s22  ;;  %s6620_s22 = smov %s5349_s23 }
 0x5b4   : > { %s6621_s23 = smov %s6617_s5  ;;  %s6622_s24 = smov %s5361_s26 }
 0x5b5   : > { %s6623_s25 = smov %s5365_s27  ;;  %s6624_s26 = smov %s6627_s14 }
 0x5b6   :  { %27 = sbr.rel (!%p25_p2) target bundleno = 17 (0x11), region = 124 }
 0x5b8   : > { %s6625_s27 = smov %s6618_s30 }
 0x5bd   :  { %3790 = vsyncpa [#allocation7], 1 }
 0x5be   :  { %3792 = vsyncpa [#allocation7 + $0x1], 1 }
 0x5bf   :  { %3793 = vsyncpa [#allocation10], 1 }
 0x5c0   :  { %3794 = vsyncpa [#allocation13], 1 }
 0x5c1   :  { %3795 = vsyncpa [#allocation8], 1 }
 0x5c2   :  { %3797 = vsyncpa [#allocation8 + $0x1], 1 }
 0x5c3   :  { %3798 = vsyncpa [#allocation16], 1 }
 0x5c4   :  { %3800 = vsyncpa [#allocation16 + $0x1], 1 }
 0x5c5   :  { %3801 = vsyncmov [#allocation5] }
 0x5c8   :  { %s3802_s18 = vpop.sfrf %3801 }
 0x5c9   :  { %p4192_p6 = scmp.ne.s32.totalorder %s3802_s18, 0 }
 0x5cb   :  { %3806 = shalt.err (%p4192_p6)  }
 0x5cc   :  { %3808 = vsyncmov [#allocation5 + $0x1] }
 0x5cf   :  { %s3809_s12 = vpop.sfrf %3808 }
 0x5d0   :  { %p4193_p4 = scmp.ne.s32.totalorder %s3809_s12, 0 }
 0x5d2   :  { %3813 = shalt.err (%p4193_p4)  }

</bundles_post_ra>
